<compile_context>
chip_gen: v5e
topology: v5e:2x2
jax: 0.10.0
libtpu: 0.0.40
codegen_flags: <defaults>
</compile_context>

<pallas_src>
import functools

import jax
import jax.numpy as jnp
from jax import lax
from jax.experimental import pallas as pl
from jax.experimental.pallas import tpu as pltpu

# ---------------- configuration (matches Single_Tab defaults) ----------------
CATEGORIES   = (20,) * 12
NUM_CONT     = 67
DIM          = 4                      # token embedding dim
DIM_OUT      = 16                     # TabTransformer output dim
DEPTH        = 3
HEADS        = 2
DIM_HEAD     = 16                     # lucidrains default
INNER        = HEADS * DIM_HEAD       # 32
FF_HIDDEN    = DIM * 4 * 2            # 32 (GEGLU => 2x)
NUM_SPECIAL  = 2
NUM_CAT      = len(CATEGORIES)        # 12
TOTAL_TOKENS = sum(CATEGORIES) + NUM_SPECIAL   # 242
MLP_IN       = DIM * NUM_CAT + NUM_CONT        # 115
_L           = MLP_IN // 8                     # 14
MLP_DIMS     = [MLP_IN, _L * 3, _L * 2, DIM_OUT]   # [115, 42, 28, 16]
LN_EPS       = 1e-5
SCALE        = DIM_HEAD ** -0.5

PACK_COLS = 128                        # lane-dense pack width


# --------------------- packed-weight layout (static offsets) -------------------
def _build_layout():
    layout = {}
    off = 0

    def add(name, rows, cols):
        nonlocal off
        layout[name] = (off, rows, cols)
        off += -(-rows // 8) * 8        # 8-row (sublane-tile) alignment

    add('emb', TOTAL_TOKENS, DIM)
    for l in range(DEPTH):
        add(f'ln1_g_{l}', 1, DIM)
        add(f'ln1_b_{l}', 1, DIM)
        add(f'w_qkv_{l}', DIM, 3 * INNER)
        add(f'w_out_{l}', INNER, DIM)
        add(f'b_out_{l}', 1, DIM)
        add(f'ln2_g_{l}', 1, DIM)
        add(f'ln2_b_{l}', 1, DIM)
        add(f'w_ff1_{l}', DIM, FF_HIDDEN)
        add(f'b_ff1_{l}', 1, FF_HIDDEN)
        add(f'w_ff2_{l}', FF_HIDDEN // 2, DIM)
        add(f'b_ff2_{l}', 1, DIM)
    add('lnc_g', 1, NUM_CONT)
    add('lnc_b', 1, NUM_CONT)
    add('w1', MLP_IN, MLP_DIMS[1])      # pre-concatenated [w1a ; w1b]
    add('b1', 1, MLP_DIMS[1])
    add('w2', MLP_DIMS[1], MLP_DIMS[2])
    add('b2', 1, MLP_DIMS[2])
    add('w3', MLP_DIMS[2], MLP_DIMS[3])
    add('b3', 1, MLP_DIMS[3])
    add('fc1_w', 16, 32)
    add('fc1_b', 1, 32)
    add('fc2_w', 32, 32)
    add('fc2_b', 1, 32)
    add('lfc_w', 32, 8)
    add('lfc_b', 1, 8)
    add('lo_w', 8, 2)
    add('lo_b', 1, 2)
    return layout, off


LAYOUT, PACK_ROWS = _build_layout()     # (968, 128) f32 pack ~ 484 KiB in VMEM


# ------------------------------ kernel helpers --------------------------------
def _layernorm(x, g, b):
    mu = jnp.mean(x, axis=-1, keepdims=True)
    var = jnp.mean((x - mu) ** 2, axis=-1, keepdims=True)
    return (x - mu) * lax.rsqrt(var + LN_EPS) * g + b


def _gelu(x):
    # TODO(synk): PyTorch F.gelu default is the exact erf GELU; tanh approximation
    # is used here for robust Mosaic lowering (difference ~1e-3).
    c = 0.7978845608028654  # sqrt(2/pi)
    return 0.5 * x * (1.0 + jnp.tanh(c * (x + 0.044715 * x * x * x)))


def _mac_small_k(x, w):
    # (N, K) @ (K, M) with tiny K as broadcast multiply-accumulate on the VPU,
    # avoiding an MXU push/drain round-trip on the strictly serial critical path.
    acc = x[:, 0:1] * w[0:1, :]
    for k in range(1, w.shape[0]):
        acc = acc + x[:, k:k + 1] * w[k:k + 1, :]
    return acc


# ----------------------- single fused Single_Tab kernel ------------------------
def single_tab_kernel(ids_ref, cont_ref, wp_ref, out_ref, *, batch):
    B = batch
    N = B * NUM_CAT                                    # all tokens of all batch rows

    def ld(name):                                      # static slice of the weight pack
        r0, nr, nc = LAYOUT[name]
        return wp_ref[r0:r0 + nr, 0:nc]

    # ---- embedding lookup as one-hot matmul (242x4 table lives in the pack) ----
    ids = ids_ref[...]                                            # (N, 1) int32
    iota = lax.broadcasted_iota(jnp.int32, (N, TOTAL_TOKENS), 1)
    onehot = (iota == ids).astype(jnp.float32)                    # (N, 242)
    x = jnp.dot(onehot, ld('emb'), preferred_element_type=jnp.float32)   # (N, DIM)

    # ---- additive block-diagonal mask, built ONCE (token-major: row = tok*B + b) ----
    rr = lax.broadcasted_iota(jnp.int32, (N, N), 0)
    cc = lax.broadcasted_iota(jnp.int32, (N, N), 1)
    mask_add = jnp.where((rr % B) == (cc % B), 0.0, -1e30).astype(jnp.float32)

    # ---------------------- TabTransformer: 3 layers -----------------------
    for l in range(DEPTH):
        # pre-norm multi-head self-attention + residual (1/sqrt(d) folded into Q cols)
        xn = _layernorm(x, ld(f'ln1_g_{l}'), ld(f'ln1_b_{l}'))
        qkv = _mac_small_k(xn, ld(f'w_qkv_{l}'))                  # (N, 96), K=4 on VPU
        head_outs = []
        for h in range(HEADS):
            qh = qkv[:, h * DIM_HEAD:(h + 1) * DIM_HEAD]
            kh = qkv[:, INNER + h * DIM_HEAD:INNER + (h + 1) * DIM_HEAD]
            vh = qkv[:, 2 * INNER + h * DIM_HEAD:2 * INNER + (h + 1) * DIM_HEAD]
            sim = lax.dot_general(qh, kh, (((1,), (1,)), ((), ())),
                                  preferred_element_type=jnp.float32) + mask_add
            sim = sim - jnp.max(sim, axis=-1, keepdims=True)
            p = jnp.exp(sim)
            attn = p * pl.reciprocal(jnp.sum(p, axis=-1, keepdims=True), approx=True)
            head_outs.append(jnp.dot(attn, vh, preferred_element_type=jnp.float32))
        heads = jnp.concatenate(head_outs, axis=-1)               # (N, 32) lane concat
        x = x + jnp.dot(heads, ld(f'w_out_{l}'),
                        preferred_element_type=jnp.float32) + ld(f'b_out_{l}')

        # pre-norm GEGLU feed-forward + residual (a/gates from one K=4 VPU MAC)
        xn = _layernorm(x, ld(f'ln2_g_{l}'), ld(f'ln2_b_{l}'))
        ff = _mac_small_k(xn, ld(f'w_ff1_{l}')) + ld(f'b_ff1_{l}')
        a = ff[:, :FF_HIDDEN // 2]
        gates = ff[:, FF_HIDDEN // 2:]
        x = x + jnp.dot(a * _gelu(gates), ld(f'w_ff2_{l}'),
                        preferred_element_type=jnp.float32) + ld(f'b_ff2_{l}')

    # --------------- head: LayerNorm(cont) + MLP + fc + last layers ----------------
    cn = _layernorm(cont_ref[...], ld('lnc_g'), ld('lnc_b'))      # (B, 67)

    # [flat_categ | cn] assembled with lane concats -> ONE (B,115)@(115,42) matmul
    feat = jnp.concatenate(
        [x[t * B:(t + 1) * B, :] for t in range(NUM_CAT)] + [cn], axis=-1)   # (B, 115)
    h = jnp.dot(feat, ld('w1'), preferred_element_type=jnp.float32) + ld('b1')
    h = jnp.maximum(h, 0.0)
    h = jnp.maximum(
        jnp.dot(h, ld('w2'), preferred_element_type=jnp.float32) + ld('b2'), 0.0)
    h = jnp.dot(h, ld('w3'), preferred_element_type=jnp.float32) + ld('b3')   # (B, 16)
    # Single_Tab fc: Linear(16,32)+ReLU, Linear(32,32)+ReLU
    h = jnp.maximum(
        jnp.dot(h, ld('fc1_w'), preferred_element_type=jnp.float32) + ld('fc1_b'), 0.0)
    h = jnp.maximum(
        jnp.dot(h, ld('fc2_w'), preferred_element_type=jnp.float32) + ld('fc2_b'), 0.0)
    # last_fc -> ReLU -> last_out
    h = jnp.maximum(
        jnp.dot(h, ld('lfc_w'), preferred_element_type=jnp.float32) + ld('lfc_b'), 0.0)
    out_ref[...] = jnp.dot(h, ld('lo_w'), preferred_element_type=jnp.float32) + ld('lo_b')


def single_tab_pallas(ids_tm, cont, wpack):
    B = cont.shape[0]
    vmem = pl.BlockSpec(memory_space=pltpu.MemorySpace.VMEM)
    return pl.pallas_call(
        functools.partial(single_tab_kernel, batch=B),
        out_shape=jax.ShapeDtypeStruct((B, 2), jnp.float32),
        in_specs=[vmem, vmem, vmem],
        out_specs=vmem,
    )(ids_tm, cont, wpack)


# ------------------------------- parameters ------------------------------------
def init_params(key):
    keys = jax.random.split(key, 16)
    it = iter(keys)

    def nrm(shape, scale=0.05):
        return (scale * jax.random.normal(next(it), shape)).astype(jnp.float32)

    z = lambda shape: jnp.zeros(shape, jnp.float32)
    o = lambda shape: jnp.ones(shape, jnp.float32)

    p = {}
    p['emb'] = nrm((TOTAL_TOKENS, DIM), 0.1)                    # nn.Embedding(242, 4)
    # transformer layers stacked along leading DEPTH axis
    p['ln1_g'], p['ln1_b'] = o((DEPTH, DIM)), z((DEPTH, DIM))
    p['w_qkv'] = nrm((DEPTH, DIM, 3 * INNER))                   # Linear(4, 96, bias=False)
    p['w_out'], p['b_out'] = nrm((DEPTH, INNER, DIM)), z((DEPTH, DIM))
    p['ln2_g'], p['ln2_b'] = o((DEPTH, DIM)), z((DEPTH, DIM))
    p['w_ff1'], p['b_ff1'] = nrm((DEPTH, DIM, FF_HIDDEN)), z((DEPTH, FF_HIDDEN))
    p['w_ff2'], p['b_ff2'] = nrm((DEPTH, FF_HIDDEN // 2, DIM)), z((DEPTH, DIM))
    # LayerNorm over continuous features
    p['lnc_g'], p['lnc_b'] = o((1, NUM_CONT)), z((1, NUM_CONT))
    # TabTransformer MLP [115, 42, 28, 16] (first layer split: categ rows / cont rows)
    p['w1a'] = nrm((DIM * NUM_CAT, MLP_DIMS[1]))
    p['w1b'] = nrm((NUM_CONT, MLP_DIMS[1]))
    p['b1'] = z((1, MLP_DIMS[1]))
    p['w2'], p['b2'] = nrm((MLP_DIMS[1], MLP_DIMS[2])), z((1, MLP_DIMS[2]))
    p['w3'], p['b3'] = nrm((MLP_DIMS[2], MLP_DIMS[3])), z((1, MLP_DIMS[3]))
    # Single_Tab fc / heads
    p['fc1_w'], p['fc1_b'] = nrm((16, 32)), z((1, 32))
    p['fc2_w'], p['fc2_b'] = nrm((32, 32)), z((1, 32))
    p['lfc_w'], p['lfc_b'] = nrm((32, 8)), z((1, 8))
    p['lo_w'], p['lo_b'] = nrm((8, 2)), z((1, 2))
    return p


def pack_params(p):
    """Pack all weights into one (PACK_ROWS, 128) f32 buffer (one HBM->VMEM DMA)."""
    wp = jnp.zeros((PACK_ROWS, PACK_COLS), jnp.float32)

    def put(wp, name, arr):
        arr = jnp.asarray(arr, jnp.float32)
        if arr.ndim == 1:
            arr = arr[None, :]
        r0, _, _ = LAYOUT[name]
        return wp.at[r0:r0 + arr.shape[0], 0:arr.shape[1]].set(arr)

    wp = put(wp, 'emb', p['emb'])
    for l in range(DEPTH):
        # fold the 1/sqrt(d_head) attention scale into the Q columns (exact: no qkv bias)
        wq = p['w_qkv'][l]
        wq = jnp.concatenate([wq[:, :INNER] * SCALE, wq[:, INNER:]], axis=-1)
        wp = put(wp, f'ln1_g_{l}', p['ln1_g'][l])
        wp = put(wp, f'ln1_b_{l}', p['ln1_b'][l])
        wp = put(wp, f'w_qkv_{l}', wq)
        wp = put(wp, f'w_out_{l}', p['w_out'][l])
        wp = put(wp, f'b_out_{l}', p['b_out'][l])
        wp = put(wp, f'ln2_g_{l}', p['ln2_g'][l])
        wp = put(wp, f'ln2_b_{l}', p['ln2_b'][l])
        wp = put(wp, f'w_ff1_{l}', p['w_ff1'][l])
        wp = put(wp, f'b_ff1_{l}', p['b_ff1'][l])
        wp = put(wp, f'w_ff2_{l}', p['w_ff2'][l])
        wp = put(wp, f'b_ff2_{l}', p['b_ff2'][l])
    wp = put(wp, 'lnc_g', p['lnc_g'])
    wp = put(wp, 'lnc_b', p['lnc_b'])
    wp = put(wp, 'w1', jnp.concatenate([p['w1a'], p['w1b']], axis=0))   # (115, 42)
    wp = put(wp, 'b1', p['b1'])
    wp = put(wp, 'w2', p['w2'])
    wp = put(wp, 'b2', p['b2'])
    wp = put(wp, 'w3', p['w3'])
    wp = put(wp, 'b3', p['b3'])
    wp = put(wp, 'fc1_w', p['fc1_w'])
    wp = put(wp, 'fc1_b', p['fc1_b'])
    wp = put(wp, 'fc2_w', p['fc2_w'])
    wp = put(wp, 'fc2_b', p['fc2_b'])
    wp = put(wp, 'lfc_w', p['lfc_w'])
    wp = put(wp, 'lfc_b', p['lfc_b'])
    wp = put(wp, 'lo_w', p['lo_w'])
    wp = put(wp, 'lo_b', p['lo_b'])
    return wp


# ------------------------------ forward (glue + kernel) -----------------------
@jax.jit
def single_tab_forward(img_data, wpack):
    B = img_data.shape[0]
    pixel = img_data[:, :, 3, 3]                                # (B, 79)
    categ = pixel[:, :NUM_CAT].astype(jnp.int32)                # (B, 12)  .long()
    cont = pixel[:, NUM_CAT:].astype(jnp.float32)               # (B, 67)  .float()

    cat_sizes = jnp.array(CATEGORIES, dtype=jnp.int32)
    offsets = NUM_SPECIAL + jnp.concatenate(
        [jnp.zeros((1,), jnp.int32), jnp.cumsum(cat_sizes)[:-1]])
    tok_ids = categ + offsets[None, :]                          # categories_offset (B, 12)
    # token-major ids: row = token*B + batch  (lets the kernel avoid any reshape)
    ids_tm = tok_ids.T.reshape(NUM_CAT * B, 1)

    return single_tab_pallas(ids_tm, cont, wpack)               # (B, 2)


if __name__ == "__main__":
    key = jax.random.PRNGKey(0)
    kp, kc, kx = jax.random.split(key, 3)
    params = init_params(kp)
    wpack = pack_params(params)                                 # one packed weight buffer

    B, H, W = 2, 8, 8
    cat_img = jax.random.randint(kc, (B, NUM_CAT, H, W), 0, CATEGORIES[0]).astype(jnp.float32)
    cont_img = jax.random.normal(kx, (B, NUM_CONT, H, W), jnp.float32)
    img_data = jnp.concatenate([cat_img, cont_img], axis=1)     # (2, 79, 8, 8) NCHW

    out = single_tab_forward(img_data, wpack)
    out = jax.block_until_ready(out)
    assert out.shape == (B, 2) and out.dtype == jnp.float32
    print("KERNEL_OK")
</pallas_src>

<mosaic_0001>
module attributes {stable_mosaic.version = 11 : i64} {
  func.func @single_tab_kernel(%arg0: memref<24x1xi32, #tpu.memory_space<vmem>>, %arg1: memref<2x67xf32, #tpu.memory_space<vmem>>, %arg2: memref<968x128xf32, #tpu.memory_space<vmem>>, %arg3: memref<2x2xf32, #tpu.memory_space<vmem>>) attributes {dimension_semantics = [], scalar_prefetch = 0 : i64, scratch_operands = 0 : i64, tpu.core_type = #tpu.core_type<tc>} {
    %c0 = arith.constant 0 : index
    %c0_0 = arith.constant 0 : index
    %0 = vector.load %arg0[%c0, %c0_0] : memref<24x1xi32, #tpu.memory_space<vmem>>, vector<24x1xi32>
    %1 = tpu.iota {dimensions = array<i32: 1>} : vector<24x242xi32>
    %2 = vector.broadcast %0 : vector<24x1xi32> to vector<24x242xi32>
    %3 = arith.cmpi eq, %1, %2 : vector<24x242xi32>
    %4 = arith.extui %3 : vector<24x242xi1> to vector<24x242xi32>
    %5 = arith.sitofp %4 : vector<24x242xi32> to vector<24x242xf32>
    %c0_1 = arith.constant 0 : index
    %c0_2 = arith.constant 0 : index
    %6 = vector.load %arg2[%c0_1, %c0_2] : memref<968x128xf32, #tpu.memory_space<vmem>>, vector<242x4xf32>
    %cst = arith.constant dense<0.000000e+00> : vector<24x4xf32>
    %7 = tpu.matmul %5, %6, %cst {dimension_numbers = #tpu.dot_dimension_numbers<[1], [0], [0], [1], [0, 0, 1, 1], [], []>} : vector<24x242xf32>, vector<242x4xf32>, vector<24x4xf32> -> vector<24x4xf32>
    %8 = tpu.iota {dimensions = array<i32: 0>} : vector<24x24xi32>
    %9 = tpu.iota {dimensions = array<i32: 1>} : vector<24x24xi32>
    %c2_i32 = arith.constant 2 : i32
    %c0_i32 = arith.constant 0 : i32
    %10 = arith.cmpi eq, %c2_i32, %c0_i32 : i32
    %c1_i32 = arith.constant 1 : i32
    %11 = arith.select %10, %c1_i32, %c2_i32 : i32
    %12 = vector.broadcast %11 : i32 to vector<24x24xi32>
    %13 = arith.remsi %8, %12 : vector<24x24xi32>
    %c0_i32_3 = arith.constant 0 : i32
    %14 = vector.broadcast %c0_i32_3 : i32 to vector<24x24xi32>
    %15 = arith.cmpi ne, %13, %14 : vector<24x24xi32>
    %c0_i32_4 = arith.constant 0 : i32
    %16 = vector.broadcast %c0_i32_4 : i32 to vector<24x24xi32>
    %17 = arith.cmpi slt, %13, %16 : vector<24x24xi32>
    %c0_i32_5 = arith.constant 0 : i32
    %18 = arith.cmpi slt, %11, %c0_i32_5 : i32
    %19 = vector.broadcast %18 : i1 to vector<24x24xi1>
    %20 = vector.broadcast %19 : vector<24x24xi1> to vector<24x24xi1>
    %21 = arith.xori %17, %20 : vector<24x24xi1>
    %22 = arith.andi %21, %15 : vector<24x24xi1>
    %23 = vector.broadcast %11 : i32 to vector<24x24xi32>
    %24 = arith.addi %13, %23 : vector<24x24xi32>
    %25 = arith.select %22, %24, %13 : vector<24x24xi1>, vector<24x24xi32>
    %c2_i32_6 = arith.constant 2 : i32
    %c0_i32_7 = arith.constant 0 : i32
    %26 = arith.cmpi eq, %c2_i32_6, %c0_i32_7 : i32
    %c1_i32_8 = arith.constant 1 : i32
    %27 = arith.select %26, %c1_i32_8, %c2_i32_6 : i32
    %28 = vector.broadcast %27 : i32 to vector<24x24xi32>
    %29 = arith.remsi %9, %28 : vector<24x24xi32>
    %c0_i32_9 = arith.constant 0 : i32
    %30 = vector.broadcast %c0_i32_9 : i32 to vector<24x24xi32>
    %31 = arith.cmpi ne, %29, %30 : vector<24x24xi32>
    %c0_i32_10 = arith.constant 0 : i32
    %32 = vector.broadcast %c0_i32_10 : i32 to vector<24x24xi32>
    %33 = arith.cmpi slt, %29, %32 : vector<24x24xi32>
    %c0_i32_11 = arith.constant 0 : i32
    %34 = arith.cmpi slt, %27, %c0_i32_11 : i32
    %35 = vector.broadcast %34 : i1 to vector<24x24xi1>
    %36 = vector.broadcast %35 : vector<24x24xi1> to vector<24x24xi1>
    %37 = arith.xori %33, %36 : vector<24x24xi1>
    %38 = arith.andi %37, %31 : vector<24x24xi1>
    %39 = vector.broadcast %27 : i32 to vector<24x24xi32>
    %40 = arith.addi %29, %39 : vector<24x24xi32>
    %41 = arith.select %38, %40, %29 : vector<24x24xi1>, vector<24x24xi32>
    %42 = arith.cmpi eq, %25, %41 : vector<24x24xi32>
    %cst_12 = arith.constant 0.000000e+00 : f32
    %cst_13 = arith.constant -1.000000e+30 : f32
    %43 = vector.broadcast %cst_12 : f32 to vector<24x24xf32>
    %44 = vector.broadcast %cst_13 : f32 to vector<24x24xf32>
    %45 = arith.select %42, %43, %44 : vector<24x24xi1>, vector<24x24xf32>
    %c248 = arith.constant 248 : index
    %c0_14 = arith.constant 0 : index
    %46 = vector.load %arg2[%c248, %c0_14] : memref<968x128xf32, #tpu.memory_space<vmem>>, vector<1x4xf32>
    %c256 = arith.constant 256 : index
    %c0_15 = arith.constant 0 : index
    %47 = vector.load %arg2[%c256, %c0_15] : memref<968x128xf32, #tpu.memory_space<vmem>>, vector<1x4xf32>
    %cst_16 = arith.constant dense<0.000000e+00> : vector<24xf32>
    %48 = vector.multi_reduction <add>, %7, %cst_16 [1] : vector<24x4xf32> to vector<24xf32>
    %49 = vector.shape_cast %48 : vector<24xf32> to vector<24x1xf32>
    %cst_17 = arith.constant 4.000000e+00 : f32
    %50 = vector.broadcast %cst_17 : f32 to vector<24x1xf32>
    %51 = arith.divf %49, %50 : vector<24x1xf32>
    %52 = vector.broadcast %51 : vector<24x1xf32> to vector<24x4xf32>
    %53 = arith.subf %7, %52 : vector<24x4xf32>
    %54 = arith.mulf %53, %53 : vector<24x4xf32>
    %cst_18 = arith.constant dense<0.000000e+00> : vector<24xf32>
    %55 = vector.multi_reduction <add>, %54, %cst_18 [1] : vector<24x4xf32> to vector<24xf32>
    %56 = vector.shape_cast %55 : vector<24xf32> to vector<24x1xf32>
    %cst_19 = arith.constant 4.000000e+00 : f32
    %57 = vector.broadcast %cst_19 : f32 to vector<24x1xf32>
    %58 = arith.divf %56, %57 : vector<24x1xf32>
    %59 = vector.broadcast %51 : vector<24x1xf32> to vector<24x4xf32>
    %60 = arith.subf %7, %59 : vector<24x4xf32>
    %cst_20 = arith.constant 9.99999974E-6 : f32
    %61 = vector.broadcast %cst_20 : f32 to vector<24x1xf32>
    %62 = arith.addf %58, %61 : vector<24x1xf32>
    %63 = math.rsqrt %62 : vector<24x1xf32>
    %64 = vector.broadcast %63 : vector<24x1xf32> to vector<24x4xf32>
    %65 = arith.mulf %60, %64 : vector<24x4xf32>
    %66 = vector.broadcast %46 : vector<1x4xf32> to vector<24x4xf32>
    %67 = arith.mulf %65, %66 : vector<24x4xf32>
    %68 = vector.broadcast %47 : vector<1x4xf32> to vector<24x4xf32>
    %69 = arith.addf %67, %68 : vector<24x4xf32>
    %c264 = arith.constant 264 : index
    %c0_21 = arith.constant 0 : index
    %70 = vector.load %arg2[%c264, %c0_21] : memref<968x128xf32, #tpu.memory_space<vmem>>, vector<4x96xf32>
    %71 = vector.extract_strided_slice %69 {offsets = [0, 0], sizes = [24, 1], strides = [1, 1]} : vector<24x4xf32> to vector<24x1xf32>
    %72 = vector.extract_strided_slice %70 {offsets = [0, 0], sizes = [1, 96], strides = [1, 1]} : vector<4x96xf32> to vector<1x96xf32>
    %73 = vector.broadcast %71 : vector<24x1xf32> to vector<24x96xf32>
    %74 = vector.broadcast %72 : vector<1x96xf32> to vector<24x96xf32>
    %75 = arith.mulf %73, %74 : vector<24x96xf32>
    %76 = vector.extract_strided_slice %69 {offsets = [0, 1], sizes = [24, 1], strides = [1, 1]} : vector<24x4xf32> to vector<24x1xf32>
    %77 = vector.extract_strided_slice %70 {offsets = [1, 0], sizes = [1, 96], strides = [1, 1]} : vector<4x96xf32> to vector<1x96xf32>
    %78 = vector.broadcast %76 : vector<24x1xf32> to vector<24x96xf32>
    %79 = vector.broadcast %77 : vector<1x96xf32> to vector<24x96xf32>
    %80 = arith.mulf %78, %79 : vector<24x96xf32>
    %81 = arith.addf %75, %80 : vector<24x96xf32>
    %82 = vector.extract_strided_slice %69 {offsets = [0, 2], sizes = [24, 1], strides = [1, 1]} : vector<24x4xf32> to vector<24x1xf32>
    %83 = vector.extract_strided_slice %70 {offsets = [2, 0], sizes = [1, 96], strides = [1, 1]} : vector<4x96xf32> to vector<1x96xf32>
    %84 = vector.broadcast %82 : vector<24x1xf32> to vector<24x96xf32>
    %85 = vector.broadcast %83 : vector<1x96xf32> to vector<24x96xf32>
    %86 = arith.mulf %84, %85 : vector<24x96xf32>
    %87 = arith.addf %81, %86 : vector<24x96xf32>
    %88 = vector.extract_strided_slice %69 {offsets = [0, 3], sizes = [24, 1], strides = [1, 1]} : vector<24x4xf32> to vector<24x1xf32>
    %89 = vector.extract_strided_slice %70 {offsets = [3, 0], sizes = [1, 96], strides = [1, 1]} : vector<4x96xf32> to vector<1x96xf32>
    %90 = vector.broadcast %88 : vector<24x1xf32> to vector<24x96xf32>
    %91 = vector.broadcast %89 : vector<1x96xf32> to vector<24x96xf32>
    %92 = arith.mulf %90, %91 : vector<24x96xf32>
    %93 = arith.addf %87, %92 : vector<24x96xf32>
    %94 = vector.extract_strided_slice %93 {offsets = [0, 0], sizes = [24, 16], strides = [1, 1]} : vector<24x96xf32> to vector<24x16xf32>
    %95 = vector.extract_strided_slice %93 {offsets = [0, 32], sizes = [24, 16], strides = [1, 1]} : vector<24x96xf32> to vector<24x16xf32>
    %96 = vector.extract_strided_slice %93 {offsets = [0, 64], sizes = [24, 16], strides = [1, 1]} : vector<24x96xf32> to vector<24x16xf32>
    %cst_22 = arith.constant dense<0.000000e+00> : vector<24x24xf32>
    %97 = tpu.matmul %94, %95, %cst_22 {dimension_numbers = #tpu.dot_dimension_numbers<[1], [1], [0], [0], [0, 0, 1, 0], [], []>} : vector<24x16xf32>, vector<24x16xf32>, vector<24x24xf32> -> vector<24x24xf32>
    %98 = arith.addf %97, %45 : vector<24x24xf32>
    %cst_23 = arith.constant dense<0xFF800000> : vector<24xf32>
    %99 = vector.multi_reduction <maximumf>, %98, %cst_23 [1] : vector<24x24xf32> to vector<24xf32>
    %100 = vector.shape_cast %99 : vector<24xf32> to vector<24x1xf32>
    %101 = vector.broadcast %100 : vector<24x1xf32> to vector<24x24xf32>
    %102 = arith.subf %98, %101 : vector<24x24xf32>
    %103 = math.exp %102 : vector<24x24xf32>
    %cst_24 = arith.constant dense<0.000000e+00> : vector<24xf32>
    %104 = vector.multi_reduction <add>, %103, %cst_24 [1] : vector<24x24xf32> to vector<24xf32>
    %105 = vector.shape_cast %104 : vector<24xf32> to vector<24x1xf32>
    %106 = tpu.reciprocal %105 {approx = true} : vector<24x1xf32> -> vector<24x1xf32>
    %107 = vector.broadcast %106 : vector<24x1xf32> to vector<24x24xf32>
    %108 = arith.mulf %103, %107 : vector<24x24xf32>
    %cst_25 = arith.constant dense<0.000000e+00> : vector<24x16xf32>
    %109 = tpu.matmul %108, %96, %cst_25 {dimension_numbers = #tpu.dot_dimension_numbers<[1], [0], [0], [1], [0, 0, 1, 1], [], []>} : vector<24x24xf32>, vector<24x16xf32>, vector<24x16xf32> -> vector<24x16xf32>
    %110 = vector.extract_strided_slice %93 {offsets = [0, 16], sizes = [24, 16], strides = [1, 1]} : vector<24x96xf32> to vector<24x16xf32>
    %111 = vector.extract_strided_slice %93 {offsets = [0, 48], sizes = [24, 16], strides = [1, 1]} : vector<24x96xf32> to vector<24x16xf32>
    %112 = vector.extract_strided_slice %93 {offsets = [0, 80], sizes = [24, 16], strides = [1, 1]} : vector<24x96xf32> to vector<24x16xf32>
    %cst_26 = arith.constant dense<0.000000e+00> : vector<24x24xf32>
    %113 = tpu.matmul %110, %111, %cst_26 {dimension_numbers = #tpu.dot_dimension_numbers<[1], [1], [0], [0], [0, 0, 1, 0], [], []>} : vector<24x16xf32>, vector<24x16xf32>, vector<24x24xf32> -> vector<24x24xf32>
    %114 = arith.addf %113, %45 : vector<24x24xf32>
    %cst_27 = arith.constant dense<0xFF800000> : vector<24xf32>
    %115 = vector.multi_reduction <maximumf>, %114, %cst_27 [1] : vector<24x24xf32> to vector<24xf32>
    %116 = vector.shape_cast %115 : vector<24xf32> to vector<24x1xf32>
    %117 = vector.broadcast %116 : vector<24x1xf32> to vector<24x24xf32>
    %118 = arith.subf %114, %117 : vector<24x24xf32>
    %119 = math.exp %118 : vector<24x24xf32>
    %cst_28 = arith.constant dense<0.000000e+00> : vector<24xf32>
    %120 = vector.multi_reduction <add>, %119, %cst_28 [1] : vector<24x24xf32> to vector<24xf32>
    %121 = vector.shape_cast %120 : vector<24xf32> to vector<24x1xf32>
    %122 = tpu.reciprocal %121 {approx = true} : vector<24x1xf32> -> vector<24x1xf32>
    %123 = vector.broadcast %122 : vector<24x1xf32> to vector<24x24xf32>
    %124 = arith.mulf %119, %123 : vector<24x24xf32>
    %cst_29 = arith.constant dense<0.000000e+00> : vector<24x16xf32>
    %125 = tpu.matmul %124, %112, %cst_29 {dimension_numbers = #tpu.dot_dimension_numbers<[1], [0], [0], [1], [0, 0, 1, 1], [], []>} : vector<24x24xf32>, vector<24x16xf32>, vector<24x16xf32> -> vector<24x16xf32>
    %126 = tpu.concatenate %109, %125 in 1 : vector<24x16xf32>, vector<24x16xf32> -> vector<24x32xf32>
    %c272 = arith.constant 272 : index
    %c0_30 = arith.constant 0 : index
    %127 = vector.load %arg2[%c272, %c0_30] : memref<968x128xf32, #tpu.memory_space<vmem>>, vector<32x4xf32>
    %cst_31 = arith.constant dense<0.000000e+00> : vector<24x4xf32>
    %128 = tpu.matmul %126, %127, %cst_31 {dimension_numbers = #tpu.dot_dimension_numbers<[1], [0], [0], [1], [0, 0, 1, 1], [], []>} : vector<24x32xf32>, vector<32x4xf32>, vector<24x4xf32> -> vector<24x4xf32>
    %129 = arith.addf %7, %128 : vector<24x4xf32>
    %c304 = arith.constant 304 : index
    %c0_32 = arith.constant 0 : index
    %130 = vector.load %arg2[%c304, %c0_32] : memref<968x128xf32, #tpu.memory_space<vmem>>, vector<1x4xf32>
    %131 = vector.broadcast %130 : vector<1x4xf32> to vector<24x4xf32>
    %132 = arith.addf %129, %131 : vector<24x4xf32>
    %c312 = arith.constant 312 : index
    %c0_33 = arith.constant 0 : index
    %133 = vector.load %arg2[%c312, %c0_33] : memref<968x128xf32, #tpu.memory_space<vmem>>, vector<1x4xf32>
    %c320 = arith.constant 320 : index
    %c0_34 = arith.constant 0 : index
    %134 = vector.load %arg2[%c320, %c0_34] : memref<968x128xf32, #tpu.memory_space<vmem>>, vector<1x4xf32>
    %cst_35 = arith.constant dense<0.000000e+00> : vector<24xf32>
    %135 = vector.multi_reduction <add>, %132, %cst_35 [1] : vector<24x4xf32> to vector<24xf32>
    %136 = vector.shape_cast %135 : vector<24xf32> to vector<24x1xf32>
    %cst_36 = arith.constant 4.000000e+00 : f32
    %137 = vector.broadcast %cst_36 : f32 to vector<24x1xf32>
    %138 = arith.divf %136, %137 : vector<24x1xf32>
    %139 = vector.broadcast %138 : vector<24x1xf32> to vector<24x4xf32>
    %140 = arith.subf %132, %139 : vector<24x4xf32>
    %141 = arith.mulf %140, %140 : vector<24x4xf32>
    %cst_37 = arith.constant dense<0.000000e+00> : vector<24xf32>
    %142 = vector.multi_reduction <add>, %141, %cst_37 [1] : vector<24x4xf32> to vector<24xf32>
    %143 = vector.shape_cast %142 : vector<24xf32> to vector<24x1xf32>
    %cst_38 = arith.constant 4.000000e+00 : f32
    %144 = vector.broadcast %cst_38 : f32 to vector<24x1xf32>
    %145 = arith.divf %143, %144 : vector<24x1xf32>
    %146 = vector.broadcast %138 : vector<24x1xf32> to vector<24x4xf32>
    %147 = arith.subf %132, %146 : vector<24x4xf32>
    %cst_39 = arith.constant 9.99999974E-6 : f32
    %148 = vector.broadcast %cst_39 : f32 to vector<24x1xf32>
    %149 = arith.addf %145, %148 : vector<24x1xf32>
    %150 = math.rsqrt %149 : vector<24x1xf32>
    %151 = vector.broadcast %150 : vector<24x1xf32> to vector<24x4xf32>
    %152 = arith.mulf %147, %151 : vector<24x4xf32>
    %153 = vector.broadcast %133 : vector<1x4xf32> to vector<24x4xf32>
    %154 = arith.mulf %152, %153 : vector<24x4xf32>
    %155 = vector.broadcast %134 : vector<1x4xf32> to vector<24x4xf32>
    %156 = arith.addf %154, %155 : vector<24x4xf32>
    %c328 = arith.constant 328 : index
    %c0_40 = arith.constant 0 : index
    %157 = vector.load %arg2[%c328, %c0_40] : memref<968x128xf32, #tpu.memory_space<vmem>>, vector<4x32xf32>
    %158 = vector.extract_strided_slice %156 {offsets = [0, 0], sizes = [24, 1], strides = [1, 1]} : vector<24x4xf32> to vector<24x1xf32>
    %159 = vector.extract_strided_slice %157 {offsets = [0, 0], sizes = [1, 32], strides = [1, 1]} : vector<4x32xf32> to vector<1x32xf32>
    %160 = vector.broadcast %158 : vector<24x1xf32> to vector<24x32xf32>
    %161 = vector.broadcast %159 : vector<1x32xf32> to vector<24x32xf32>
    %162 = arith.mulf %160, %161 : vector<24x32xf32>
    %163 = vector.extract_strided_slice %156 {offsets = [0, 1], sizes = [24, 1], strides = [1, 1]} : vector<24x4xf32> to vector<24x1xf32>
    %164 = vector.extract_strided_slice %157 {offsets = [1, 0], sizes = [1, 32], strides = [1, 1]} : vector<4x32xf32> to vector<1x32xf32>
    %165 = vector.broadcast %163 : vector<24x1xf32> to vector<24x32xf32>
    %166 = vector.broadcast %164 : vector<1x32xf32> to vector<24x32xf32>
    %167 = arith.mulf %165, %166 : vector<24x32xf32>
    %168 = arith.addf %162, %167 : vector<24x32xf32>
    %169 = vector.extract_strided_slice %156 {offsets = [0, 2], sizes = [24, 1], strides = [1, 1]} : vector<24x4xf32> to vector<24x1xf32>
    %170 = vector.extract_strided_slice %157 {offsets = [2, 0], sizes = [1, 32], strides = [1, 1]} : vector<4x32xf32> to vector<1x32xf32>
    %171 = vector.broadcast %169 : vector<24x1xf32> to vector<24x32xf32>
    %172 = vector.broadcast %170 : vector<1x32xf32> to vector<24x32xf32>
    %173 = arith.mulf %171, %172 : vector<24x32xf32>
    %174 = arith.addf %168, %173 : vector<24x32xf32>
    %175 = vector.extract_strided_slice %156 {offsets = [0, 3], sizes = [24, 1], strides = [1, 1]} : vector<24x4xf32> to vector<24x1xf32>
    %176 = vector.extract_strided_slice %157 {offsets = [3, 0], sizes = [1, 32], strides = [1, 1]} : vector<4x32xf32> to vector<1x32xf32>
    %177 = vector.broadcast %175 : vector<24x1xf32> to vector<24x32xf32>
    %178 = vector.broadcast %176 : vector<1x32xf32> to vector<24x32xf32>
    %179 = arith.mulf %177, %178 : vector<24x32xf32>
    %180 = arith.addf %174, %179 : vector<24x32xf32>
    %c336 = arith.constant 336 : index
    %c0_41 = arith.constant 0 : index
    %181 = vector.load %arg2[%c336, %c0_41] : memref<968x128xf32, #tpu.memory_space<vmem>>, vector<1x32xf32>
    %182 = vector.broadcast %181 : vector<1x32xf32> to vector<24x32xf32>
    %183 = arith.addf %180, %182 : vector<24x32xf32>
    %184 = vector.extract_strided_slice %183 {offsets = [0, 0], sizes = [24, 16], strides = [1, 1]} : vector<24x32xf32> to vector<24x16xf32>
    %185 = vector.extract_strided_slice %183 {offsets = [0, 16], sizes = [24, 16], strides = [1, 1]} : vector<24x32xf32> to vector<24x16xf32>
    %cst_42 = arith.constant 5.000000e-01 : f32
    %186 = vector.broadcast %cst_42 : f32 to vector<24x16xf32>
    %187 = arith.mulf %186, %185 : vector<24x16xf32>
    %cst_43 = arith.constant 4.471500e-02 : f32
    %188 = vector.broadcast %cst_43 : f32 to vector<24x16xf32>
    %189 = arith.mulf %188, %185 : vector<24x16xf32>
    %190 = arith.mulf %189, %185 : vector<24x16xf32>
    %191 = arith.mulf %190, %185 : vector<24x16xf32>
    %192 = arith.addf %185, %191 : vector<24x16xf32>
    %cst_44 = arith.constant 0.797884583 : f32
    %193 = vector.broadcast %cst_44 : f32 to vector<24x16xf32>
    %194 = arith.mulf %193, %192 : vector<24x16xf32>
    %195 = math.tanh %194 : vector<24x16xf32>
    %cst_45 = arith.constant 1.000000e+00 : f32
    %196 = vector.broadcast %cst_45 : f32 to vector<24x16xf32>
    %197 = arith.addf %196, %195 : vector<24x16xf32>
    %198 = arith.mulf %187, %197 : vector<24x16xf32>
    %199 = arith.mulf %184, %198 : vector<24x16xf32>
    %c344 = arith.constant 344 : index
    %c0_46 = arith.constant 0 : index
    %200 = vector.load %arg2[%c344, %c0_46] : memref<968x128xf32, #tpu.memory_space<vmem>>, vector<16x4xf32>
    %cst_47 = arith.constant dense<0.000000e+00> : vector<24x4xf32>
    %201 = tpu.matmul %199, %200, %cst_47 {dimension_numbers = #tpu.dot_dimension_numbers<[1], [0], [0], [1], [0, 0, 1, 1], [], []>} : vector<24x16xf32>, vector<16x4xf32>, vector<24x4xf32> -> vector<24x4xf32>
    %202 = arith.addf %132, %201 : vector<24x4xf32>
    %c360 = arith.constant 360 : index
    %c0_48 = arith.constant 0 : index
    %203 = vector.load %arg2[%c360, %c0_48] : memref<968x128xf32, #tpu.memory_space<vmem>>, vector<1x4xf32>
    %204 = vector.broadcast %203 : vector<1x4xf32> to vector<24x4xf32>
    %205 = arith.addf %202, %204 : vector<24x4xf32>
    %c368 = arith.constant 368 : index
    %c0_49 = arith.constant 0 : index
    %206 = vector.load %arg2[%c368, %c0_49] : memref<968x128xf32, #tpu.memory_space<vmem>>, vector<1x4xf32>
    %c376 = arith.constant 376 : index
    %c0_50 = arith.constant 0 : index
    %207 = vector.load %arg2[%c376, %c0_50] : memref<968x128xf32, #tpu.memory_space<vmem>>, vector<1x4xf32>
    %cst_51 = arith.constant dense<0.000000e+00> : vector<24xf32>
    %208 = vector.multi_reduction <add>, %205, %cst_51 [1] : vector<24x4xf32> to vector<24xf32>
    %209 = vector.shape_cast %208 : vector<24xf32> to vector<24x1xf32>
    %cst_52 = arith.constant 4.000000e+00 : f32
    %210 = vector.broadcast %cst_52 : f32 to vector<24x1xf32>
    %211 = arith.divf %209, %210 : vector<24x1xf32>
    %212 = vector.broadcast %211 : vector<24x1xf32> to vector<24x4xf32>
    %213 = arith.subf %205, %212 : vector<24x4xf32>
    %214 = arith.mulf %213, %213 : vector<24x4xf32>
    %cst_53 = arith.constant dense<0.000000e+00> : vector<24xf32>
    %215 = vector.multi_reduction <add>, %214, %cst_53 [1] : vector<24x4xf32> to vector<24xf32>
    %216 = vector.shape_cast %215 : vector<24xf32> to vector<24x1xf32>
    %cst_54 = arith.constant 4.000000e+00 : f32
    %217 = vector.broadcast %cst_54 : f32 to vector<24x1xf32>
    %218 = arith.divf %216, %217 : vector<24x1xf32>
    %219 = vector.broadcast %211 : vector<24x1xf32> to vector<24x4xf32>
    %220 = arith.subf %205, %219 : vector<24x4xf32>
    %cst_55 = arith.constant 9.99999974E-6 : f32
    %221 = vector.broadcast %cst_55 : f32 to vector<24x1xf32>
    %222 = arith.addf %218, %221 : vector<24x1xf32>
    %223 = math.rsqrt %222 : vector<24x1xf32>
    %224 = vector.broadcast %223 : vector<24x1xf32> to vector<24x4xf32>
    %225 = arith.mulf %220, %224 : vector<24x4xf32>
    %226 = vector.broadcast %206 : vector<1x4xf32> to vector<24x4xf32>
    %227 = arith.mulf %225, %226 : vector<24x4xf32>
    %228 = vector.broadcast %207 : vector<1x4xf32> to vector<24x4xf32>
    %229 = arith.addf %227, %228 : vector<24x4xf32>
    %c384 = arith.constant 384 : index
    %c0_56 = arith.constant 0 : index
    %230 = vector.load %arg2[%c384, %c0_56] : memref<968x128xf32, #tpu.memory_space<vmem>>, vector<4x96xf32>
    %231 = vector.extract_strided_slice %229 {offsets = [0, 0], sizes = [24, 1], strides = [1, 1]} : vector<24x4xf32> to vector<24x1xf32>
    %232 = vector.extract_strided_slice %230 {offsets = [0, 0], sizes = [1, 96], strides = [1, 1]} : vector<4x96xf32> to vector<1x96xf32>
    %233 = vector.broadcast %231 : vector<24x1xf32> to vector<24x96xf32>
    %234 = vector.broadcast %232 : vector<1x96xf32> to vector<24x96xf32>
    %235 = arith.mulf %233, %234 : vector<24x96xf32>
    %236 = vector.extract_strided_slice %229 {offsets = [0, 1], sizes = [24, 1], strides = [1, 1]} : vector<24x4xf32> to vector<24x1xf32>
    %237 = vector.extract_strided_slice %230 {offsets = [1, 0], sizes = [1, 96], strides = [1, 1]} : vector<4x96xf32> to vector<1x96xf32>
    %238 = vector.broadcast %236 : vector<24x1xf32> to vector<24x96xf32>
    %239 = vector.broadcast %237 : vector<1x96xf32> to vector<24x96xf32>
    %240 = arith.mulf %238, %239 : vector<24x96xf32>
    %241 = arith.addf %235, %240 : vector<24x96xf32>
    %242 = vector.extract_strided_slice %229 {offsets = [0, 2], sizes = [24, 1], strides = [1, 1]} : vector<24x4xf32> to vector<24x1xf32>
    %243 = vector.extract_strided_slice %230 {offsets = [2, 0], sizes = [1, 96], strides = [1, 1]} : vector<4x96xf32> to vector<1x96xf32>
    %244 = vector.broadcast %242 : vector<24x1xf32> to vector<24x96xf32>
    %245 = vector.broadcast %243 : vector<1x96xf32> to vector<24x96xf32>
    %246 = arith.mulf %244, %245 : vector<24x96xf32>
    %247 = arith.addf %241, %246 : vector<24x96xf32>
    %248 = vector.extract_strided_slice %229 {offsets = [0, 3], sizes = [24, 1], strides = [1, 1]} : vector<24x4xf32> to vector<24x1xf32>
    %249 = vector.extract_strided_slice %230 {offsets = [3, 0], sizes = [1, 96], strides = [1, 1]} : vector<4x96xf32> to vector<1x96xf32>
    %250 = vector.broadcast %248 : vector<24x1xf32> to vector<24x96xf32>
    %251 = vector.broadcast %249 : vector<1x96xf32> to vector<24x96xf32>
    %252 = arith.mulf %250, %251 : vector<24x96xf32>
    %253 = arith.addf %247, %252 : vector<24x96xf32>
    %254 = vector.extract_strided_slice %253 {offsets = [0, 0], sizes = [24, 16], strides = [1, 1]} : vector<24x96xf32> to vector<24x16xf32>
    %255 = vector.extract_strided_slice %253 {offsets = [0, 32], sizes = [24, 16], strides = [1, 1]} : vector<24x96xf32> to vector<24x16xf32>
    %256 = vector.extract_strided_slice %253 {offsets = [0, 64], sizes = [24, 16], strides = [1, 1]} : vector<24x96xf32> to vector<24x16xf32>
    %cst_57 = arith.constant dense<0.000000e+00> : vector<24x24xf32>
    %257 = tpu.matmul %254, %255, %cst_57 {dimension_numbers = #tpu.dot_dimension_numbers<[1], [1], [0], [0], [0, 0, 1, 0], [], []>} : vector<24x16xf32>, vector<24x16xf32>, vector<24x24xf32> -> vector<24x24xf32>
    %258 = arith.addf %257, %45 : vector<24x24xf32>
    %cst_58 = arith.constant dense<0xFF800000> : vector<24xf32>
    %259 = vector.multi_reduction <maximumf>, %258, %cst_58 [1] : vector<24x24xf32> to vector<24xf32>
    %260 = vector.shape_cast %259 : vector<24xf32> to vector<24x1xf32>
    %261 = vector.broadcast %260 : vector<24x1xf32> to vector<24x24xf32>
    %262 = arith.subf %258, %261 : vector<24x24xf32>
    %263 = math.exp %262 : vector<24x24xf32>
    %cst_59 = arith.constant dense<0.000000e+00> : vector<24xf32>
    %264 = vector.multi_reduction <add>, %263, %cst_59 [1] : vector<24x24xf32> to vector<24xf32>
    %265 = vector.shape_cast %264 : vector<24xf32> to vector<24x1xf32>
    %266 = tpu.reciprocal %265 {approx = true} : vector<24x1xf32> -> vector<24x1xf32>
    %267 = vector.broadcast %266 : vector<24x1xf32> to vector<24x24xf32>
    %268 = arith.mulf %263, %267 : vector<24x24xf32>
    %cst_60 = arith.constant dense<0.000000e+00> : vector<24x16xf32>
    %269 = tpu.matmul %268, %256, %cst_60 {dimension_numbers = #tpu.dot_dimension_numbers<[1], [0], [0], [1], [0, 0, 1, 1], [], []>} : vector<24x24xf32>, vector<24x16xf32>, vector<24x16xf32> -> vector<24x16xf32>
    %270 = vector.extract_strided_slice %253 {offsets = [0, 16], sizes = [24, 16], strides = [1, 1]} : vector<24x96xf32> to vector<24x16xf32>
    %271 = vector.extract_strided_slice %253 {offsets = [0, 48], sizes = [24, 16], strides = [1, 1]} : vector<24x96xf32> to vector<24x16xf32>
    %272 = vector.extract_strided_slice %253 {offsets = [0, 80], sizes = [24, 16], strides = [1, 1]} : vector<24x96xf32> to vector<24x16xf32>
    %cst_61 = arith.constant dense<0.000000e+00> : vector<24x24xf32>
    %273 = tpu.matmul %270, %271, %cst_61 {dimension_numbers = #tpu.dot_dimension_numbers<[1], [1], [0], [0], [0, 0, 1, 0], [], []>} : vector<24x16xf32>, vector<24x16xf32>, vector<24x24xf32> -> vector<24x24xf32>
    %274 = arith.addf %273, %45 : vector<24x24xf32>
    %cst_62 = arith.constant dense<0xFF800000> : vector<24xf32>
    %275 = vector.multi_reduction <maximumf>, %274, %cst_62 [1] : vector<24x24xf32> to vector<24xf32>
    %276 = vector.shape_cast %275 : vector<24xf32> to vector<24x1xf32>
    %277 = vector.broadcast %276 : vector<24x1xf32> to vector<24x24xf32>
    %278 = arith.subf %274, %277 : vector<24x24xf32>
    %279 = math.exp %278 : vector<24x24xf32>
    %cst_63 = arith.constant dense<0.000000e+00> : vector<24xf32>
    %280 = vector.multi_reduction <add>, %279, %cst_63 [1] : vector<24x24xf32> to vector<24xf32>
    %281 = vector.shape_cast %280 : vector<24xf32> to vector<24x1xf32>
    %282 = tpu.reciprocal %281 {approx = true} : vector<24x1xf32> -> vector<24x1xf32>
    %283 = vector.broadcast %282 : vector<24x1xf32> to vector<24x24xf32>
    %284 = arith.mulf %279, %283 : vector<24x24xf32>
    %cst_64 = arith.constant dense<0.000000e+00> : vector<24x16xf32>
    %285 = tpu.matmul %284, %272, %cst_64 {dimension_numbers = #tpu.dot_dimension_numbers<[1], [0], [0], [1], [0, 0, 1, 1], [], []>} : vector<24x24xf32>, vector<24x16xf32>, vector<24x16xf32> -> vector<24x16xf32>
    %286 = tpu.concatenate %269, %285 in 1 : vector<24x16xf32>, vector<24x16xf32> -> vector<24x32xf32>
    %c392 = arith.constant 392 : index
    %c0_65 = arith.constant 0 : index
    %287 = vector.load %arg2[%c392, %c0_65] : memref<968x128xf32, #tpu.memory_space<vmem>>, vector<32x4xf32>
    %cst_66 = arith.constant dense<0.000000e+00> : vector<24x4xf32>
    %288 = tpu.matmul %286, %287, %cst_66 {dimension_numbers = #tpu.dot_dimension_numbers<[1], [0], [0], [1], [0, 0, 1, 1], [], []>} : vector<24x32xf32>, vector<32x4xf32>, vector<24x4xf32> -> vector<24x4xf32>
    %289 = arith.addf %205, %288 : vector<24x4xf32>
    %c424 = arith.constant 424 : index
    %c0_67 = arith.constant 0 : index
    %290 = vector.load %arg2[%c424, %c0_67] : memref<968x128xf32, #tpu.memory_space<vmem>>, vector<1x4xf32>
    %291 = vector.broadcast %290 : vector<1x4xf32> to vector<24x4xf32>
    %292 = arith.addf %289, %291 : vector<24x4xf32>
    %c432 = arith.constant 432 : index
    %c0_68 = arith.constant 0 : index
    %293 = vector.load %arg2[%c432, %c0_68] : memref<968x128xf32, #tpu.memory_space<vmem>>, vector<1x4xf32>
    %c440 = arith.constant 440 : index
    %c0_69 = arith.constant 0 : index
    %294 = vector.load %arg2[%c440, %c0_69] : memref<968x128xf32, #tpu.memory_space<vmem>>, vector<1x4xf32>
    %cst_70 = arith.constant dense<0.000000e+00> : vector<24xf32>
    %295 = vector.multi_reduction <add>, %292, %cst_70 [1] : vector<24x4xf32> to vector<24xf32>
    %296 = vector.shape_cast %295 : vector<24xf32> to vector<24x1xf32>
    %cst_71 = arith.constant 4.000000e+00 : f32
    %297 = vector.broadcast %cst_71 : f32 to vector<24x1xf32>
    %298 = arith.divf %296, %297 : vector<24x1xf32>
    %299 = vector.broadcast %298 : vector<24x1xf32> to vector<24x4xf32>
    %300 = arith.subf %292, %299 : vector<24x4xf32>
    %301 = arith.mulf %300, %300 : vector<24x4xf32>
    %cst_72 = arith.constant dense<0.000000e+00> : vector<24xf32>
    %302 = vector.multi_reduction <add>, %301, %cst_72 [1] : vector<24x4xf32> to vector<24xf32>
    %303 = vector.shape_cast %302 : vector<24xf32> to vector<24x1xf32>
    %cst_73 = arith.constant 4.000000e+00 : f32
    %304 = vector.broadcast %cst_73 : f32 to vector<24x1xf32>
    %305 = arith.divf %303, %304 : vector<24x1xf32>
    %306 = vector.broadcast %298 : vector<24x1xf32> to vector<24x4xf32>
    %307 = arith.subf %292, %306 : vector<24x4xf32>
    %cst_74 = arith.constant 9.99999974E-6 : f32
    %308 = vector.broadcast %cst_74 : f32 to vector<24x1xf32>
    %309 = arith.addf %305, %308 : vector<24x1xf32>
    %310 = math.rsqrt %309 : vector<24x1xf32>
    %311 = vector.broadcast %310 : vector<24x1xf32> to vector<24x4xf32>
    %312 = arith.mulf %307, %311 : vector<24x4xf32>
    %313 = vector.broadcast %293 : vector<1x4xf32> to vector<24x4xf32>
    %314 = arith.mulf %312, %313 : vector<24x4xf32>
    %315 = vector.broadcast %294 : vector<1x4xf32> to vector<24x4xf32>
    %316 = arith.addf %314, %315 : vector<24x4xf32>
    %c448 = arith.constant 448 : index
    %c0_75 = arith.constant 0 : index
    %317 = vector.load %arg2[%c448, %c0_75] : memref<968x128xf32, #tpu.memory_space<vmem>>, vector<4x32xf32>
    %318 = vector.extract_strided_slice %316 {offsets = [0, 0], sizes = [24, 1], strides = [1, 1]} : vector<24x4xf32> to vector<24x1xf32>
    %319 = vector.extract_strided_slice %317 {offsets = [0, 0], sizes = [1, 32], strides = [1, 1]} : vector<4x32xf32> to vector<1x32xf32>
    %320 = vector.broadcast %318 : vector<24x1xf32> to vector<24x32xf32>
    %321 = vector.broadcast %319 : vector<1x32xf32> to vector<24x32xf32>
    %322 = arith.mulf %320, %321 : vector<24x32xf32>
    %323 = vector.extract_strided_slice %316 {offsets = [0, 1], sizes = [24, 1], strides = [1, 1]} : vector<24x4xf32> to vector<24x1xf32>
    %324 = vector.extract_strided_slice %317 {offsets = [1, 0], sizes = [1, 32], strides = [1, 1]} : vector<4x32xf32> to vector<1x32xf32>
    %325 = vector.broadcast %323 : vector<24x1xf32> to vector<24x32xf32>
    %326 = vector.broadcast %324 : vector<1x32xf32> to vector<24x32xf32>
    %327 = arith.mulf %325, %326 : vector<24x32xf32>
    %328 = arith.addf %322, %327 : vector<24x32xf32>
    %329 = vector.extract_strided_slice %316 {offsets = [0, 2], sizes = [24, 1], strides = [1, 1]} : vector<24x4xf32> to vector<24x1xf32>
    %330 = vector.extract_strided_slice %317 {offsets = [2, 0], sizes = [1, 32], strides = [1, 1]} : vector<4x32xf32> to vector<1x32xf32>
    %331 = vector.broadcast %329 : vector<24x1xf32> to vector<24x32xf32>
    %332 = vector.broadcast %330 : vector<1x32xf32> to vector<24x32xf32>
    %333 = arith.mulf %331, %332 : vector<24x32xf32>
    %334 = arith.addf %328, %333 : vector<24x32xf32>
    %335 = vector.extract_strided_slice %316 {offsets = [0, 3], sizes = [24, 1], strides = [1, 1]} : vector<24x4xf32> to vector<24x1xf32>
    %336 = vector.extract_strided_slice %317 {offsets = [3, 0], sizes = [1, 32], strides = [1, 1]} : vector<4x32xf32> to vector<1x32xf32>
    %337 = vector.broadcast %335 : vector<24x1xf32> to vector<24x32xf32>
    %338 = vector.broadcast %336 : vector<1x32xf32> to vector<24x32xf32>
    %339 = arith.mulf %337, %338 : vector<24x32xf32>
    %340 = arith.addf %334, %339 : vector<24x32xf32>
    %c456 = arith.constant 456 : index
    %c0_76 = arith.constant 0 : index
    %341 = vector.load %arg2[%c456, %c0_76] : memref<968x128xf32, #tpu.memory_space<vmem>>, vector<1x32xf32>
    %342 = vector.broadcast %341 : vector<1x32xf32> to vector<24x32xf32>
    %343 = arith.addf %340, %342 : vector<24x32xf32>
    %344 = vector.extract_strided_slice %343 {offsets = [0, 0], sizes = [24, 16], strides = [1, 1]} : vector<24x32xf32> to vector<24x16xf32>
    %345 = vector.extract_strided_slice %343 {offsets = [0, 16], sizes = [24, 16], strides = [1, 1]} : vector<24x32xf32> to vector<24x16xf32>
    %cst_77 = arith.constant 5.000000e-01 : f32
    %346 = vector.broadcast %cst_77 : f32 to vector<24x16xf32>
    %347 = arith.mulf %346, %345 : vector<24x16xf32>
    %cst_78 = arith.constant 4.471500e-02 : f32
    %348 = vector.broadcast %cst_78 : f32 to vector<24x16xf32>
    %349 = arith.mulf %348, %345 : vector<24x16xf32>
    %350 = arith.mulf %349, %345 : vector<24x16xf32>
    %351 = arith.mulf %350, %345 : vector<24x16xf32>
    %352 = arith.addf %345, %351 : vector<24x16xf32>
    %cst_79 = arith.constant 0.797884583 : f32
    %353 = vector.broadcast %cst_79 : f32 to vector<24x16xf32>
    %354 = arith.mulf %353, %352 : vector<24x16xf32>
    %355 = math.tanh %354 : vector<24x16xf32>
    %cst_80 = arith.constant 1.000000e+00 : f32
    %356 = vector.broadcast %cst_80 : f32 to vector<24x16xf32>
    %357 = arith.addf %356, %355 : vector<24x16xf32>
    %358 = arith.mulf %347, %357 : vector<24x16xf32>
    %359 = arith.mulf %344, %358 : vector<24x16xf32>
    %c464 = arith.constant 464 : index
    %c0_81 = arith.constant 0 : index
    %360 = vector.load %arg2[%c464, %c0_81] : memref<968x128xf32, #tpu.memory_space<vmem>>, vector<16x4xf32>
    %cst_82 = arith.constant dense<0.000000e+00> : vector<24x4xf32>
    %361 = tpu.matmul %359, %360, %cst_82 {dimension_numbers = #tpu.dot_dimension_numbers<[1], [0], [0], [1], [0, 0, 1, 1], [], []>} : vector<24x16xf32>, vector<16x4xf32>, vector<24x4xf32> -> vector<24x4xf32>
    %362 = arith.addf %292, %361 : vector<24x4xf32>
    %c480 = arith.constant 480 : index
    %c0_83 = arith.constant 0 : index
    %363 = vector.load %arg2[%c480, %c0_83] : memref<968x128xf32, #tpu.memory_space<vmem>>, vector<1x4xf32>
    %364 = vector.broadcast %363 : vector<1x4xf32> to vector<24x4xf32>
    %365 = arith.addf %362, %364 : vector<24x4xf32>
    %c488 = arith.constant 488 : index
    %c0_84 = arith.constant 0 : index
    %366 = vector.load %arg2[%c488, %c0_84] : memref<968x128xf32, #tpu.memory_space<vmem>>, vector<1x4xf32>
    %c496 = arith.constant 496 : index
    %c0_85 = arith.constant 0 : index
    %367 = vector.load %arg2[%c496, %c0_85] : memref<968x128xf32, #tpu.memory_space<vmem>>, vector<1x4xf32>
    %cst_86 = arith.constant dense<0.000000e+00> : vector<24xf32>
    %368 = vector.multi_reduction <add>, %365, %cst_86 [1] : vector<24x4xf32> to vector<24xf32>
    %369 = vector.shape_cast %368 : vector<24xf32> to vector<24x1xf32>
    %cst_87 = arith.constant 4.000000e+00 : f32
    %370 = vector.broadcast %cst_87 : f32 to vector<24x1xf32>
    %371 = arith.divf %369, %370 : vector<24x1xf32>
    %372 = vector.broadcast %371 : vector<24x1xf32> to vector<24x4xf32>
    %373 = arith.subf %365, %372 : vector<24x4xf32>
    %374 = arith.mulf %373, %373 : vector<24x4xf32>
    %cst_88 = arith.constant dense<0.000000e+00> : vector<24xf32>
    %375 = vector.multi_reduction <add>, %374, %cst_88 [1] : vector<24x4xf32> to vector<24xf32>
    %376 = vector.shape_cast %375 : vector<24xf32> to vector<24x1xf32>
    %cst_89 = arith.constant 4.000000e+00 : f32
    %377 = vector.broadcast %cst_89 : f32 to vector<24x1xf32>
    %378 = arith.divf %376, %377 : vector<24x1xf32>
    %379 = vector.broadcast %371 : vector<24x1xf32> to vector<24x4xf32>
    %380 = arith.subf %365, %379 : vector<24x4xf32>
    %cst_90 = arith.constant 9.99999974E-6 : f32
    %381 = vector.broadcast %cst_90 : f32 to vector<24x1xf32>
    %382 = arith.addf %378, %381 : vector<24x1xf32>
    %383 = math.rsqrt %382 : vector<24x1xf32>
    %384 = vector.broadcast %383 : vector<24x1xf32> to vector<24x4xf32>
    %385 = arith.mulf %380, %384 : vector<24x4xf32>
    %386 = vector.broadcast %366 : vector<1x4xf32> to vector<24x4xf32>
    %387 = arith.mulf %385, %386 : vector<24x4xf32>
    %388 = vector.broadcast %367 : vector<1x4xf32> to vector<24x4xf32>
    %389 = arith.addf %387, %388 : vector<24x4xf32>
    %c504 = arith.constant 504 : index
    %c0_91 = arith.constant 0 : index
    %390 = vector.load %arg2[%c504, %c0_91] : memref<968x128xf32, #tpu.memory_space<vmem>>, vector<4x96xf32>
    %391 = vector.extract_strided_slice %389 {offsets = [0, 0], sizes = [24, 1], strides = [1, 1]} : vector<24x4xf32> to vector<24x1xf32>
    %392 = vector.extract_strided_slice %390 {offsets = [0, 0], sizes = [1, 96], strides = [1, 1]} : vector<4x96xf32> to vector<1x96xf32>
    %393 = vector.broadcast %391 : vector<24x1xf32> to vector<24x96xf32>
    %394 = vector.broadcast %392 : vector<1x96xf32> to vector<24x96xf32>
    %395 = arith.mulf %393, %394 : vector<24x96xf32>
    %396 = vector.extract_strided_slice %389 {offsets = [0, 1], sizes = [24, 1], strides = [1, 1]} : vector<24x4xf32> to vector<24x1xf32>
    %397 = vector.extract_strided_slice %390 {offsets = [1, 0], sizes = [1, 96], strides = [1, 1]} : vector<4x96xf32> to vector<1x96xf32>
    %398 = vector.broadcast %396 : vector<24x1xf32> to vector<24x96xf32>
    %399 = vector.broadcast %397 : vector<1x96xf32> to vector<24x96xf32>
    %400 = arith.mulf %398, %399 : vector<24x96xf32>
    %401 = arith.addf %395, %400 : vector<24x96xf32>
    %402 = vector.extract_strided_slice %389 {offsets = [0, 2], sizes = [24, 1], strides = [1, 1]} : vector<24x4xf32> to vector<24x1xf32>
    %403 = vector.extract_strided_slice %390 {offsets = [2, 0], sizes = [1, 96], strides = [1, 1]} : vector<4x96xf32> to vector<1x96xf32>
    %404 = vector.broadcast %402 : vector<24x1xf32> to vector<24x96xf32>
    %405 = vector.broadcast %403 : vector<1x96xf32> to vector<24x96xf32>
    %406 = arith.mulf %404, %405 : vector<24x96xf32>
    %407 = arith.addf %401, %406 : vector<24x96xf32>
    %408 = vector.extract_strided_slice %389 {offsets = [0, 3], sizes = [24, 1], strides = [1, 1]} : vector<24x4xf32> to vector<24x1xf32>
    %409 = vector.extract_strided_slice %390 {offsets = [3, 0], sizes = [1, 96], strides = [1, 1]} : vector<4x96xf32> to vector<1x96xf32>
    %410 = vector.broadcast %408 : vector<24x1xf32> to vector<24x96xf32>
    %411 = vector.broadcast %409 : vector<1x96xf32> to vector<24x96xf32>
    %412 = arith.mulf %410, %411 : vector<24x96xf32>
    %413 = arith.addf %407, %412 : vector<24x96xf32>
    %414 = vector.extract_strided_slice %413 {offsets = [0, 0], sizes = [24, 16], strides = [1, 1]} : vector<24x96xf32> to vector<24x16xf32>
    %415 = vector.extract_strided_slice %413 {offsets = [0, 32], sizes = [24, 16], strides = [1, 1]} : vector<24x96xf32> to vector<24x16xf32>
    %416 = vector.extract_strided_slice %413 {offsets = [0, 64], sizes = [24, 16], strides = [1, 1]} : vector<24x96xf32> to vector<24x16xf32>
    %cst_92 = arith.constant dense<0.000000e+00> : vector<24x24xf32>
    %417 = tpu.matmul %414, %415, %cst_92 {dimension_numbers = #tpu.dot_dimension_numbers<[1], [1], [0], [0], [0, 0, 1, 0], [], []>} : vector<24x16xf32>, vector<24x16xf32>, vector<24x24xf32> -> vector<24x24xf32>
    %418 = arith.addf %417, %45 : vector<24x24xf32>
    %cst_93 = arith.constant dense<0xFF800000> : vector<24xf32>
    %419 = vector.multi_reduction <maximumf>, %418, %cst_93 [1] : vector<24x24xf32> to vector<24xf32>
    %420 = vector.shape_cast %419 : vector<24xf32> to vector<24x1xf32>
    %421 = vector.broadcast %420 : vector<24x1xf32> to vector<24x24xf32>
    %422 = arith.subf %418, %421 : vector<24x24xf32>
    %423 = math.exp %422 : vector<24x24xf32>
    %cst_94 = arith.constant dense<0.000000e+00> : vector<24xf32>
    %424 = vector.multi_reduction <add>, %423, %cst_94 [1] : vector<24x24xf32> to vector<24xf32>
    %425 = vector.shape_cast %424 : vector<24xf32> to vector<24x1xf32>
    %426 = tpu.reciprocal %425 {approx = true} : vector<24x1xf32> -> vector<24x1xf32>
    %427 = vector.broadcast %426 : vector<24x1xf32> to vector<24x24xf32>
    %428 = arith.mulf %423, %427 : vector<24x24xf32>
    %cst_95 = arith.constant dense<0.000000e+00> : vector<24x16xf32>
    %429 = tpu.matmul %428, %416, %cst_95 {dimension_numbers = #tpu.dot_dimension_numbers<[1], [0], [0], [1], [0, 0, 1, 1], [], []>} : vector<24x24xf32>, vector<24x16xf32>, vector<24x16xf32> -> vector<24x16xf32>
    %430 = vector.extract_strided_slice %413 {offsets = [0, 16], sizes = [24, 16], strides = [1, 1]} : vector<24x96xf32> to vector<24x16xf32>
    %431 = vector.extract_strided_slice %413 {offsets = [0, 48], sizes = [24, 16], strides = [1, 1]} : vector<24x96xf32> to vector<24x16xf32>
    %432 = vector.extract_strided_slice %413 {offsets = [0, 80], sizes = [24, 16], strides = [1, 1]} : vector<24x96xf32> to vector<24x16xf32>
    %cst_96 = arith.constant dense<0.000000e+00> : vector<24x24xf32>
    %433 = tpu.matmul %430, %431, %cst_96 {dimension_numbers = #tpu.dot_dimension_numbers<[1], [1], [0], [0], [0, 0, 1, 0], [], []>} : vector<24x16xf32>, vector<24x16xf32>, vector<24x24xf32> -> vector<24x24xf32>
    %434 = arith.addf %433, %45 : vector<24x24xf32>
    %cst_97 = arith.constant dense<0xFF800000> : vector<24xf32>
    %435 = vector.multi_reduction <maximumf>, %434, %cst_97 [1] : vector<24x24xf32> to vector<24xf32>
    %436 = vector.shape_cast %435 : vector<24xf32> to vector<24x1xf32>
    %437 = vector.broadcast %436 : vector<24x1xf32> to vector<24x24xf32>
    %438 = arith.subf %434, %437 : vector<24x24xf32>
    %439 = math.exp %438 : vector<24x24xf32>
    %cst_98 = arith.constant dense<0.000000e+00> : vector<24xf32>
    %440 = vector.multi_reduction <add>, %439, %cst_98 [1] : vector<24x24xf32> to vector<24xf32>
    %441 = vector.shape_cast %440 : vector<24xf32> to vector<24x1xf32>
    %442 = tpu.reciprocal %441 {approx = true} : vector<24x1xf32> -> vector<24x1xf32>
    %443 = vector.broadcast %442 : vector<24x1xf32> to vector<24x24xf32>
    %444 = arith.mulf %439, %443 : vector<24x24xf32>
    %cst_99 = arith.constant dense<0.000000e+00> : vector<24x16xf32>
    %445 = tpu.matmul %444, %432, %cst_99 {dimension_numbers = #tpu.dot_dimension_numbers<[1], [0], [0], [1], [0, 0, 1, 1], [], []>} : vector<24x24xf32>, vector<24x16xf32>, vector<24x16xf32> -> vector<24x16xf32>
    %446 = tpu.concatenate %429, %445 in 1 : vector<24x16xf32>, vector<24x16xf32> -> vector<24x32xf32>
    %c512 = arith.constant 512 : index
    %c0_100 = arith.constant 0 : index
    %447 = vector.load %arg2[%c512, %c0_100] : memref<968x128xf32, #tpu.memory_space<vmem>>, vector<32x4xf32>
    %cst_101 = arith.constant dense<0.000000e+00> : vector<24x4xf32>
    %448 = tpu.matmul %446, %447, %cst_101 {dimension_numbers = #tpu.dot_dimension_numbers<[1], [0], [0], [1], [0, 0, 1, 1], [], []>} : vector<24x32xf32>, vector<32x4xf32>, vector<24x4xf32> -> vector<24x4xf32>
    %449 = arith.addf %365, %448 : vector<24x4xf32>
    %c544 = arith.constant 544 : index
    %c0_102 = arith.constant 0 : index
    %450 = vector.load %arg2[%c544, %c0_102] : memref<968x128xf32, #tpu.memory_space<vmem>>, vector<1x4xf32>
    %451 = vector.broadcast %450 : vector<1x4xf32> to vector<24x4xf32>
    %452 = arith.addf %449, %451 : vector<24x4xf32>
    %c552 = arith.constant 552 : index
    %c0_103 = arith.constant 0 : index
    %453 = vector.load %arg2[%c552, %c0_103] : memref<968x128xf32, #tpu.memory_space<vmem>>, vector<1x4xf32>
    %c560 = arith.constant 560 : index
    %c0_104 = arith.constant 0 : index
    %454 = vector.load %arg2[%c560, %c0_104] : memref<968x128xf32, #tpu.memory_space<vmem>>, vector<1x4xf32>
    %cst_105 = arith.constant dense<0.000000e+00> : vector<24xf32>
    %455 = vector.multi_reduction <add>, %452, %cst_105 [1] : vector<24x4xf32> to vector<24xf32>
    %456 = vector.shape_cast %455 : vector<24xf32> to vector<24x1xf32>
    %cst_106 = arith.constant 4.000000e+00 : f32
    %457 = vector.broadcast %cst_106 : f32 to vector<24x1xf32>
    %458 = arith.divf %456, %457 : vector<24x1xf32>
    %459 = vector.broadcast %458 : vector<24x1xf32> to vector<24x4xf32>
    %460 = arith.subf %452, %459 : vector<24x4xf32>
    %461 = arith.mulf %460, %460 : vector<24x4xf32>
    %cst_107 = arith.constant dense<0.000000e+00> : vector<24xf32>
    %462 = vector.multi_reduction <add>, %461, %cst_107 [1] : vector<24x4xf32> to vector<24xf32>
    %463 = vector.shape_cast %462 : vector<24xf32> to vector<24x1xf32>
    %cst_108 = arith.constant 4.000000e+00 : f32
    %464 = vector.broadcast %cst_108 : f32 to vector<24x1xf32>
    %465 = arith.divf %463, %464 : vector<24x1xf32>
    %466 = vector.broadcast %458 : vector<24x1xf32> to vector<24x4xf32>
    %467 = arith.subf %452, %466 : vector<24x4xf32>
    %cst_109 = arith.constant 9.99999974E-6 : f32
    %468 = vector.broadcast %cst_109 : f32 to vector<24x1xf32>
    %469 = arith.addf %465, %468 : vector<24x1xf32>
    %470 = math.rsqrt %469 : vector<24x1xf32>
    %471 = vector.broadcast %470 : vector<24x1xf32> to vector<24x4xf32>
    %472 = arith.mulf %467, %471 : vector<24x4xf32>
    %473 = vector.broadcast %453 : vector<1x4xf32> to vector<24x4xf32>
    %474 = arith.mulf %472, %473 : vector<24x4xf32>
    %475 = vector.broadcast %454 : vector<1x4xf32> to vector<24x4xf32>
    %476 = arith.addf %474, %475 : vector<24x4xf32>
    %c568 = arith.constant 568 : index
    %c0_110 = arith.constant 0 : index
    %477 = vector.load %arg2[%c568, %c0_110] : memref<968x128xf32, #tpu.memory_space<vmem>>, vector<4x32xf32>
    %478 = vector.extract_strided_slice %476 {offsets = [0, 0], sizes = [24, 1], strides = [1, 1]} : vector<24x4xf32> to vector<24x1xf32>
    %479 = vector.extract_strided_slice %477 {offsets = [0, 0], sizes = [1, 32], strides = [1, 1]} : vector<4x32xf32> to vector<1x32xf32>
    %480 = vector.broadcast %478 : vector<24x1xf32> to vector<24x32xf32>
    %481 = vector.broadcast %479 : vector<1x32xf32> to vector<24x32xf32>
    %482 = arith.mulf %480, %481 : vector<24x32xf32>
    %483 = vector.extract_strided_slice %476 {offsets = [0, 1], sizes = [24, 1], strides = [1, 1]} : vector<24x4xf32> to vector<24x1xf32>
    %484 = vector.extract_strided_slice %477 {offsets = [1, 0], sizes = [1, 32], strides = [1, 1]} : vector<4x32xf32> to vector<1x32xf32>
    %485 = vector.broadcast %483 : vector<24x1xf32> to vector<24x32xf32>
    %486 = vector.broadcast %484 : vector<1x32xf32> to vector<24x32xf32>
    %487 = arith.mulf %485, %486 : vector<24x32xf32>
    %488 = arith.addf %482, %487 : vector<24x32xf32>
    %489 = vector.extract_strided_slice %476 {offsets = [0, 2], sizes = [24, 1], strides = [1, 1]} : vector<24x4xf32> to vector<24x1xf32>
    %490 = vector.extract_strided_slice %477 {offsets = [2, 0], sizes = [1, 32], strides = [1, 1]} : vector<4x32xf32> to vector<1x32xf32>
    %491 = vector.broadcast %489 : vector<24x1xf32> to vector<24x32xf32>
    %492 = vector.broadcast %490 : vector<1x32xf32> to vector<24x32xf32>
    %493 = arith.mulf %491, %492 : vector<24x32xf32>
    %494 = arith.addf %488, %493 : vector<24x32xf32>
    %495 = vector.extract_strided_slice %476 {offsets = [0, 3], sizes = [24, 1], strides = [1, 1]} : vector<24x4xf32> to vector<24x1xf32>
    %496 = vector.extract_strided_slice %477 {offsets = [3, 0], sizes = [1, 32], strides = [1, 1]} : vector<4x32xf32> to vector<1x32xf32>
    %497 = vector.broadcast %495 : vector<24x1xf32> to vector<24x32xf32>
    %498 = vector.broadcast %496 : vector<1x32xf32> to vector<24x32xf32>
    %499 = arith.mulf %497, %498 : vector<24x32xf32>
    %500 = arith.addf %494, %499 : vector<24x32xf32>
    %c576 = arith.constant 576 : index
    %c0_111 = arith.constant 0 : index
    %501 = vector.load %arg2[%c576, %c0_111] : memref<968x128xf32, #tpu.memory_space<vmem>>, vector<1x32xf32>
    %502 = vector.broadcast %501 : vector<1x32xf32> to vector<24x32xf32>
    %503 = arith.addf %500, %502 : vector<24x32xf32>
    %504 = vector.extract_strided_slice %503 {offsets = [0, 0], sizes = [24, 16], strides = [1, 1]} : vector<24x32xf32> to vector<24x16xf32>
    %505 = vector.extract_strided_slice %503 {offsets = [0, 16], sizes = [24, 16], strides = [1, 1]} : vector<24x32xf32> to vector<24x16xf32>
    %cst_112 = arith.constant 5.000000e-01 : f32
    %506 = vector.broadcast %cst_112 : f32 to vector<24x16xf32>
    %507 = arith.mulf %506, %505 : vector<24x16xf32>
    %cst_113 = arith.constant 4.471500e-02 : f32
    %508 = vector.broadcast %cst_113 : f32 to vector<24x16xf32>
    %509 = arith.mulf %508, %505 : vector<24x16xf32>
    %510 = arith.mulf %509, %505 : vector<24x16xf32>
    %511 = arith.mulf %510, %505 : vector<24x16xf32>
    %512 = arith.addf %505, %511 : vector<24x16xf32>
    %cst_114 = arith.constant 0.797884583 : f32
    %513 = vector.broadcast %cst_114 : f32 to vector<24x16xf32>
    %514 = arith.mulf %513, %512 : vector<24x16xf32>
    %515 = math.tanh %514 : vector<24x16xf32>
    %cst_115 = arith.constant 1.000000e+00 : f32
    %516 = vector.broadcast %cst_115 : f32 to vector<24x16xf32>
    %517 = arith.addf %516, %515 : vector<24x16xf32>
    %518 = arith.mulf %507, %517 : vector<24x16xf32>
    %519 = arith.mulf %504, %518 : vector<24x16xf32>
    %c584 = arith.constant 584 : index
    %c0_116 = arith.constant 0 : index
    %520 = vector.load %arg2[%c584, %c0_116] : memref<968x128xf32, #tpu.memory_space<vmem>>, vector<16x4xf32>
    %cst_117 = arith.constant dense<0.000000e+00> : vector<24x4xf32>
    %521 = tpu.matmul %519, %520, %cst_117 {dimension_numbers = #tpu.dot_dimension_numbers<[1], [0], [0], [1], [0, 0, 1, 1], [], []>} : vector<24x16xf32>, vector<16x4xf32>, vector<24x4xf32> -> vector<24x4xf32>
    %522 = arith.addf %452, %521 : vector<24x4xf32>
    %c600 = arith.constant 600 : index
    %c0_118 = arith.constant 0 : index
    %523 = vector.load %arg2[%c600, %c0_118] : memref<968x128xf32, #tpu.memory_space<vmem>>, vector<1x4xf32>
    %524 = vector.broadcast %523 : vector<1x4xf32> to vector<24x4xf32>
    %525 = arith.addf %522, %524 : vector<24x4xf32>
    %c0_119 = arith.constant 0 : index
    %c0_120 = arith.constant 0 : index
    %526 = vector.load %arg1[%c0_119, %c0_120] : memref<2x67xf32, #tpu.memory_space<vmem>>, vector<2x67xf32>
    %c608 = arith.constant 608 : index
    %c0_121 = arith.constant 0 : index
    %527 = vector.load %arg2[%c608, %c0_121] : memref<968x128xf32, #tpu.memory_space<vmem>>, vector<1x67xf32>
    %c616 = arith.constant 616 : index
    %c0_122 = arith.constant 0 : index
    %528 = vector.load %arg2[%c616, %c0_122] : memref<968x128xf32, #tpu.memory_space<vmem>>, vector<1x67xf32>
    %cst_123 = arith.constant dense<0.000000e+00> : vector<2xf32>
    %529 = vector.multi_reduction <add>, %526, %cst_123 [1] : vector<2x67xf32> to vector<2xf32>
    %530 = vector.shape_cast %529 : vector<2xf32> to vector<2x1xf32>
    %cst_124 = arith.constant 6.700000e+01 : f32
    %531 = vector.broadcast %cst_124 : f32 to vector<2x1xf32>
    %532 = arith.divf %530, %531 : vector<2x1xf32>
    %533 = vector.broadcast %532 : vector<2x1xf32> to vector<2x67xf32>
    %534 = arith.subf %526, %533 : vector<2x67xf32>
    %535 = arith.mulf %534, %534 : vector<2x67xf32>
    %cst_125 = arith.constant dense<0.000000e+00> : vector<2xf32>
    %536 = vector.multi_reduction <add>, %535, %cst_125 [1] : vector<2x67xf32> to vector<2xf32>
    %537 = vector.shape_cast %536 : vector<2xf32> to vector<2x1xf32>
    %cst_126 = arith.constant 6.700000e+01 : f32
    %538 = vector.broadcast %cst_126 : f32 to vector<2x1xf32>
    %539 = arith.divf %537, %538 : vector<2x1xf32>
    %540 = vector.broadcast %532 : vector<2x1xf32> to vector<2x67xf32>
    %541 = arith.subf %526, %540 : vector<2x67xf32>
    %cst_127 = arith.constant 9.99999974E-6 : f32
    %542 = vector.broadcast %cst_127 : f32 to vector<2x1xf32>
    %543 = arith.addf %539, %542 : vector<2x1xf32>
    %544 = math.rsqrt %543 : vector<2x1xf32>
    %545 = vector.broadcast %544 : vector<2x1xf32> to vector<2x67xf32>
    %546 = arith.mulf %541, %545 : vector<2x67xf32>
    %547 = vector.broadcast %527 : vector<1x67xf32> to vector<2x67xf32>
    %548 = arith.mulf %546, %547 : vector<2x67xf32>
    %549 = vector.broadcast %528 : vector<1x67xf32> to vector<2x67xf32>
    %550 = arith.addf %548, %549 : vector<2x67xf32>
    %551 = vector.extract_strided_slice %525 {offsets = [0, 0], sizes = [2, 4], strides = [1, 1]} : vector<24x4xf32> to vector<2x4xf32>
    %552 = vector.extract_strided_slice %525 {offsets = [2, 0], sizes = [2, 4], strides = [1, 1]} : vector<24x4xf32> to vector<2x4xf32>
    %553 = vector.extract_strided_slice %525 {offsets = [4, 0], sizes = [2, 4], strides = [1, 1]} : vector<24x4xf32> to vector<2x4xf32>
    %554 = vector.extract_strided_slice %525 {offsets = [6, 0], sizes = [2, 4], strides = [1, 1]} : vector<24x4xf32> to vector<2x4xf32>
    %555 = vector.extract_strided_slice %525 {offsets = [8, 0], sizes = [2, 4], strides = [1, 1]} : vector<24x4xf32> to vector<2x4xf32>
    %556 = vector.extract_strided_slice %525 {offsets = [10, 0], sizes = [2, 4], strides = [1, 1]} : vector<24x4xf32> to vector<2x4xf32>
    %557 = vector.extract_strided_slice %525 {offsets = [12, 0], sizes = [2, 4], strides = [1, 1]} : vector<24x4xf32> to vector<2x4xf32>
    %558 = vector.extract_strided_slice %525 {offsets = [14, 0], sizes = [2, 4], strides = [1, 1]} : vector<24x4xf32> to vector<2x4xf32>
    %559 = vector.extract_strided_slice %525 {offsets = [16, 0], sizes = [2, 4], strides = [1, 1]} : vector<24x4xf32> to vector<2x4xf32>
    %560 = vector.extract_strided_slice %525 {offsets = [18, 0], sizes = [2, 4], strides = [1, 1]} : vector<24x4xf32> to vector<2x4xf32>
    %561 = vector.extract_strided_slice %525 {offsets = [20, 0], sizes = [2, 4], strides = [1, 1]} : vector<24x4xf32> to vector<2x4xf32>
    %562 = vector.extract_strided_slice %525 {offsets = [22, 0], sizes = [2, 4], strides = [1, 1]} : vector<24x4xf32> to vector<2x4xf32>
    %563 = tpu.concatenate %551, %552, %553, %554, %555, %556, %557, %558, %559, %560, %561, %562, %550 in 1 : vector<2x4xf32>, vector<2x4xf32>, vector<2x4xf32>, vector<2x4xf32>, vector<2x4xf32>, vector<2x4xf32>, vector<2x4xf32>, vector<2x4xf32>, vector<2x4xf32>, vector<2x4xf32>, vector<2x4xf32>, vector<2x4xf32>, vector<2x67xf32> -> vector<2x115xf32>
    %c624 = arith.constant 624 : index
    %c0_128 = arith.constant 0 : index
    %564 = vector.load %arg2[%c624, %c0_128] : memref<968x128xf32, #tpu.memory_space<vmem>>, vector<115x42xf32>
    %cst_129 = arith.constant dense<0.000000e+00> : vector<2x42xf32>
    %565 = tpu.matmul %563, %564, %cst_129 {dimension_numbers = #tpu.dot_dimension_numbers<[1], [0], [0], [1], [0, 0, 1, 1], [], []>} : vector<2x115xf32>, vector<115x42xf32>, vector<2x42xf32> -> vector<2x42xf32>
    %c744 = arith.constant 744 : index
    %c0_130 = arith.constant 0 : index
    %566 = vector.load %arg2[%c744, %c0_130] : memref<968x128xf32, #tpu.memory_space<vmem>>, vector<1x42xf32>
    %567 = vector.broadcast %566 : vector<1x42xf32> to vector<2x42xf32>
    %568 = arith.addf %565, %567 : vector<2x42xf32>
    %cst_131 = arith.constant 0.000000e+00 : f32
    %569 = vector.broadcast %cst_131 : f32 to vector<2x42xf32>
    %570 = arith.maximumf %568, %569 : vector<2x42xf32>
    %c752 = arith.constant 752 : index
    %c0_132 = arith.constant 0 : index
    %571 = vector.load %arg2[%c752, %c0_132] : memref<968x128xf32, #tpu.memory_space<vmem>>, vector<42x28xf32>
    %cst_133 = arith.constant dense<0.000000e+00> : vector<2x28xf32>
    %572 = tpu.matmul %570, %571, %cst_133 {dimension_numbers = #tpu.dot_dimension_numbers<[1], [0], [0], [1], [0, 0, 1, 1], [], []>} : vector<2x42xf32>, vector<42x28xf32>, vector<2x28xf32> -> vector<2x28xf32>
    %c800 = arith.constant 800 : index
    %c0_134 = arith.constant 0 : index
    %573 = vector.load %arg2[%c800, %c0_134] : memref<968x128xf32, #tpu.memory_space<vmem>>, vector<1x28xf32>
    %574 = vector.broadcast %573 : vector<1x28xf32> to vector<2x28xf32>
    %575 = arith.addf %572, %574 : vector<2x28xf32>
    %cst_135 = arith.constant 0.000000e+00 : f32
    %576 = vector.broadcast %cst_135 : f32 to vector<2x28xf32>
    %577 = arith.maximumf %575, %576 : vector<2x28xf32>
    %c808 = arith.constant 808 : index
    %c0_136 = arith.constant 0 : index
    %578 = vector.load %arg2[%c808, %c0_136] : memref<968x128xf32, #tpu.memory_space<vmem>>, vector<28x16xf32>
    %cst_137 = arith.constant dense<0.000000e+00> : vector<2x16xf32>
    %579 = tpu.matmul %577, %578, %cst_137 {dimension_numbers = #tpu.dot_dimension_numbers<[1], [0], [0], [1], [0, 0, 1, 1], [], []>} : vector<2x28xf32>, vector<28x16xf32>, vector<2x16xf32> -> vector<2x16xf32>
    %c840 = arith.constant 840 : index
    %c0_138 = arith.constant 0 : index
    %580 = vector.load %arg2[%c840, %c0_138] : memref<968x128xf32, #tpu.memory_space<vmem>>, vector<1x16xf32>
    %581 = vector.broadcast %580 : vector<1x16xf32> to vector<2x16xf32>
    %582 = arith.addf %579, %581 : vector<2x16xf32>
    %c848 = arith.constant 848 : index
    %c0_139 = arith.constant 0 : index
    %583 = vector.load %arg2[%c848, %c0_139] : memref<968x128xf32, #tpu.memory_space<vmem>>, vector<16x32xf32>
    %cst_140 = arith.constant dense<0.000000e+00> : vector<2x32xf32>
    %584 = tpu.matmul %582, %583, %cst_140 {dimension_numbers = #tpu.dot_dimension_numbers<[1], [0], [0], [1], [0, 0, 1, 1], [], []>} : vector<2x16xf32>, vector<16x32xf32>, vector<2x32xf32> -> vector<2x32xf32>
    %c864 = arith.constant 864 : index
    %c0_141 = arith.constant 0 : index
    %585 = vector.load %arg2[%c864, %c0_141] : memref<968x128xf32, #tpu.memory_space<vmem>>, vector<1x32xf32>
    %586 = vector.broadcast %585 : vector<1x32xf32> to vector<2x32xf32>
    %587 = arith.addf %584, %586 : vector<2x32xf32>
    %cst_142 = arith.constant 0.000000e+00 : f32
    %588 = vector.broadcast %cst_142 : f32 to vector<2x32xf32>
    %589 = arith.maximumf %587, %588 : vector<2x32xf32>
    %c872 = arith.constant 872 : index
    %c0_143 = arith.constant 0 : index
    %590 = vector.load %arg2[%c872, %c0_143] : memref<968x128xf32, #tpu.memory_space<vmem>>, vector<32x32xf32>
    %cst_144 = arith.constant dense<0.000000e+00> : vector<2x32xf32>
    %591 = tpu.matmul %589, %590, %cst_144 {dimension_numbers = #tpu.dot_dimension_numbers<[1], [0], [0], [1], [0, 0, 1, 1], [], []>} : vector<2x32xf32>, vector<32x32xf32>, vector<2x32xf32> -> vector<2x32xf32>
    %c904 = arith.constant 904 : index
    %c0_145 = arith.constant 0 : index
    %592 = vector.load %arg2[%c904, %c0_145] : memref<968x128xf32, #tpu.memory_space<vmem>>, vector<1x32xf32>
    %593 = vector.broadcast %592 : vector<1x32xf32> to vector<2x32xf32>
    %594 = arith.addf %591, %593 : vector<2x32xf32>
    %cst_146 = arith.constant 0.000000e+00 : f32
    %595 = vector.broadcast %cst_146 : f32 to vector<2x32xf32>
    %596 = arith.maximumf %594, %595 : vector<2x32xf32>
    %c912 = arith.constant 912 : index
    %c0_147 = arith.constant 0 : index
    %597 = vector.load %arg2[%c912, %c0_147] : memref<968x128xf32, #tpu.memory_space<vmem>>, vector<32x8xf32>
    %cst_148 = arith.constant dense<0.000000e+00> : vector<2x8xf32>
    %598 = tpu.matmul %596, %597, %cst_148 {dimension_numbers = #tpu.dot_dimension_numbers<[1], [0], [0], [1], [0, 0, 1, 1], [], []>} : vector<2x32xf32>, vector<32x8xf32>, vector<2x8xf32> -> vector<2x8xf32>
    %c944 = arith.constant 944 : index
    %c0_149 = arith.constant 0 : index
    %599 = vector.load %arg2[%c944, %c0_149] : memref<968x128xf32, #tpu.memory_space<vmem>>, vector<1x8xf32>
    %600 = vector.broadcast %599 : vector<1x8xf32> to vector<2x8xf32>
    %601 = arith.addf %598, %600 : vector<2x8xf32>
    %cst_150 = arith.constant 0.000000e+00 : f32
    %602 = vector.broadcast %cst_150 : f32 to vector<2x8xf32>
    %603 = arith.maximumf %601, %602 : vector<2x8xf32>
    %c952 = arith.constant 952 : index
    %c0_151 = arith.constant 0 : index
    %604 = vector.load %arg2[%c952, %c0_151] : memref<968x128xf32, #tpu.memory_space<vmem>>, vector<8x2xf32>
    %cst_152 = arith.constant dense<0.000000e+00> : vector<2x2xf32>
    %605 = tpu.matmul %603, %604, %cst_152 {dimension_numbers = #tpu.dot_dimension_numbers<[1], [0], [0], [1], [0, 0, 1, 1], [], []>} : vector<2x8xf32>, vector<8x2xf32>, vector<2x2xf32> -> vector<2x2xf32>
    %c960 = arith.constant 960 : index
    %c0_153 = arith.constant 0 : index
    %606 = vector.load %arg2[%c960, %c0_153] : memref<968x128xf32, #tpu.memory_space<vmem>>, vector<1x2xf32>
    %607 = vector.broadcast %606 : vector<1x2xf32> to vector<2x2xf32>
    %608 = arith.addf %605, %607 : vector<2x2xf32>
    %c0_154 = arith.constant 0 : index
    %c0_155 = arith.constant 0 : index
    %609 = vector.load %arg3[%c0_154, %c0_155] : memref<2x2xf32, #tpu.memory_space<vmem>>, vector<2x2xf32>
    tpu.vector_store %arg3[%c0_154, %c0_155], %608 {strides = array<i32>} : memref<2x2xf32, #tpu.memory_space<vmem>>, vector<2x2xf32>,
    return
  }
}

</mosaic_0001>

<bundles_post_ra>
// kernel: single_tab_forward.1
= control target key start
LH: loop header
LB: loop body
LE: loop exit
PB: predicated region body
PF: predicated region fallthrough
CT: control target
= control target key end

     0   :  { %8 = vsyncpa [#allocation3], 0  ;;  %s3780_s0 = inlined_call_operand.vmem [shape: s32[24,1], index: 0, kind: input, shape index: {}]   ;;  %s3781_s1 = inlined_call_operand.vmem [shape: f32[2,67], index: 1, kind: input, shape index: {}]   ;;  %s3782_s2 = inlined_call_operand.hbm [shape: f32[968,128], index: 2, kind: input, shape index: {}]   ;;  %s3783_s3 = inlined_call_operand.hbm [shape: f32[2,2], index: 3, kind: output, shape index: {}]  }
   0x1   :  { %9 = vsyncpa [#allocation4], 0  ;;  %s18_s14 = sshll.u32 %s3782_s2, 4  ;;  %s3148_s15 = smov [#allocation2]   ;;  %s19_s14 = int_to_ptr.hbm [resolvable:$true] %s18_s14 }
   0x2   :  { %s20_s16 = sshll.u32 %s3148_s15, 4  ;;  %s3149_s17 = smov 128   ;;  %s21_s16 = int_to_ptr.vmem [resolvable:$true] %s20_s16 }
   0x3   :  { %s3150_s18 = smov 8  }
   0x4   :  { %26 = dma.hbm_to_vmem [thread:$0]  %s19_s14, 15488, %s21_s16, [#allocation3], %s3149_s17, %s3149_s17, %s3150_s18  }
   0x5   :  { %3144 = dma.done.wait [#allocation3], 15488  }
   0x6   :  { %3145 = vsyncadd [#allocation3], 4294951808  ;;  %v3151_v0 = vmov 0   ;;  %vm105_vm0 = vcmask 1041408   ;;  %v31_v1 = vld [vmem:[%s3780_s0] sm:$0xff]  ;;  %v33_v2 = vld [vmem:[%s3780_s0 + $0x10] sm:$0xff]  ;;  %v34_v35 = vlaneseq }
   0x7   :  { %2840 = vset.pattern.permute.xlu0 %v3151_v0  ;;  %2841 = vset.pattern.permute.xlu1 %v3151_v0  ;;  %v79_v3 = vld [vmem:[#allocation2 + $0x78] sm:$0xff]  ;;  %v78_v4 = vld [vmem:[#allocation2 + $0x70] sm:$0xff]  ;;  %v93_v6 = vld [vmem:[#allocation2 + $0xe8] sm:$0xff]  ;;  %vm95_vm1 = vcmask 932864   ;;  %v3152_v39 = vmov 1.0   ;;  %v3153_v40 = vmov 0.0  }
   0x8   :  { %38 = vperm.xlu0 %2840, %v31_v1   ;;  %44 = vperm.xlu1 %2841, %v33_v2   ;;  %v94_v5 = vld [vmem:[#allocation2 + $0xf0] sm:$0x3]  ;;  %v77_v7 = vld [vmem:[#allocation2 + $0x68] sm:$0xff]  ;;  %v92_v8 = vld [vmem:[#allocation2 + $0xe0] sm:$0xff]  ;;  %v3213_v36 = vand.u32 127, %v34_v35  ;;  %vm221_vm8 = vcmask 31744  }
   0x9   :  { %109 = vmatpush.msra.mxu0 %v79_v3  ;;  %2726 = vmatpush.msk.msra.mxu1 %vm105_vm0, %v94_v5  ;;  %v76_v9 = vld [vmem:[#allocation2 + $0x60] sm:$0xff]  ;;  %v91_v10 = vld [vmem:[#allocation2 + $0xd8] sm:$0xff]  ;;  %v32_v11 = vld [vmem:[%s3780_s0 + $0x8] sm:$0xff]  ;;  %v3154_v58 = vmov 4.0   ;;  %s3158_s0 = smov 96   ;;  %s3160_s24 = smov 64  }
   0xa   :  { %v75_v12 = vld [vmem:[#allocation2 + $0x58] sm:$0xff]  ;;  %v90_v13 = vld [vmem:[#allocation2 + $0xd0] sm:$0xff]  ;;  %v89_v15 = vld [vmem:[#allocation2 + $0xc8] sm:$0xff]  ;;  %v36_v37 = vadd.s32 128, %v3213_v36  ;;  %2964 = vrcp.f32 %v3154_v58  ;;  %s3161_s25 = smov 80   ;;  %s3162_s26 = smov 112  }
   0xb   :  { %110 = vmatpush.msra.mxu0 %v78_v4  ;;  %137 = vmatpush.msra.mxu1 %v93_v6  ;;  %v74_v14 = vld [vmem:[#allocation2 + $0x50] sm:$0xff]  ;;  %v73_v16 = vld [vmem:[#allocation2 + $0x48] sm:$0xff]  ;;  %v88_v17 = vld [vmem:[#allocation2 + $0xc0] sm:$0xff]  ;;  %s3163_s27 = smov 48   ;;  %s3164_s28 = smov 16  }
   0xc   :  { %v72_v18 = vld [vmem:[#allocation2 + $0x40] sm:$0xff]  ;;  %v87_v19 = vld [vmem:[#allocation2 + $0xb8] sm:$0xff]  ;;  %v86_v21 = vld [vmem:[#allocation2 + $0xb0] sm:$0xff]  ;;  %s3167_s4 = smov 24   ;;  %s3168_s5 = smov 28  }
   0xd   :  { %111 = vmatpush.msra.mxu0 %v77_v7  ;;  %138 = vmatpush.msra.mxu1 %v92_v8  ;;  %v71_v20 = vld [vmem:[#allocation2 + $0x38] sm:$0xff]  ;;  %v70_v22 = vld [vmem:[#allocation2 + $0x30] sm:$0xff]  ;;  %v85_v23 = vld [vmem:[#allocation2 + $0xa8] sm:$0xff]  ;;  %s3169_s6 = smov 12   ;;  %s3170_s7 = smov 20  }
   0xe   :  { %v69_v24 = vld [vmem:[#allocation2 + $0x28] sm:$0xff]  ;;  %v84_v25 = vld [vmem:[#allocation2 + $0xa0] sm:$0xff]  ;;  %v83_v27 = vld [vmem:[#allocation2 + $0x98] sm:$0xff]  ;;  %s3171_s8 = smov 32   ;;  %s3172_s9 = smov 44  }
   0xf   :  { %112 = vmatpush.msra.mxu0 %v76_v9  ;;  %139 = vmatpush.msra.mxu1 %v91_v10  ;;  %v68_v26 = vld [vmem:[#allocation2 + $0x20] sm:$0xff]  ;;  %v67_v28 = vld [vmem:[#allocation2 + $0x18] sm:$0xff]  ;;  %v82_v29 = vld [vmem:[#allocation2 + $0x90] sm:$0xff]  ;;  %s3173_s10 = smov 36   ;;  %s3174_s11 = smov 40  }
  0x10   :  { %41 = vperm.xlu0 %2840, %v32_v11   ;;  %v66_v30 = vld [vmem:[#allocation2 + $0x10] sm:$0xff]  ;;  %v81_v31 = vld [vmem:[#allocation2 + $0x88] sm:$0xff]  ;;  %v64_v33 = vld [vmem:[#allocation2] sm:$0xff]  ;;  %v2965_v59 = vpop.eup %2964  ;;  %s3175_s12 = smov [#allocation5]   ;;  %s2707_s16 = sshll.u32 %s3783_s3, 4  ;;  %s2708_s16 = int_to_ptr.hbm [resolvable:$true] %s2707_s16 }
  0x11   :  { %113 = vmatpush.msra.mxu0 %v75_v12  ;;  %140 = vmatpush.msra.mxu1 %v90_v13  ;;  %v65_v32 = vld [vmem:[#allocation2 + $0x8] sm:$0xff]  ;;  %v80_v34 = vld [vmem:[#allocation2 + $0x80] sm:$0xff]  ;;  %v232_v60 = vmul.f32 4.0, %v2965_v59  ;;  %vm236_vm9 = vweird.f32 %v2965_v59  ;;  %s2705_s13 = sshll.u32 %s3175_s12, 4  ;;  %s2706_s13 = int_to_ptr.vmem [resolvable:$true] %s2705_s13 }
  0x13   :  { %114 = vmatpush.msra.mxu0 %v74_v14  ;;  %141 = vmatpush.msra.mxu1 %v89_v15  ;;  %v233_v61 = vsub.f32 1.0, %v232_v60 }
  0x15   :  { %115 = vmatpush.msra.mxu0 %v73_v16  ;;  %142 = vmatpush.msra.mxu1 %v88_v17  ;;  %v234_v62 = vmul.f32 %v2965_v59, %v233_v61  ;;  %v3155_v17 = vmov 2  }
  0x16   :  { %2843 = vset.pattern.permute.xlu1 %v3155_v17 }
  0x17   :  { %116 = vmatpush.msra.mxu0 %v72_v18  ;;  %143 = vmatpush.msra.mxu1 %v87_v19  ;;  %v235_v63 = vadd.f32 %v2965_v59, %v234_v62 }
  0x19   :  { %117 = vmatpush.msra.mxu0 %v71_v20  ;;  %144 = vmatpush.msra.mxu1 %v86_v21  ;;  %v3234_v1 = vsel %vm236_vm9, %v2965_v59, %v235_v63  ;;  %v3156_v20 = vmov 1  }
  0x1a   :  { %2842 = vset.pattern.permute.xlu2 %v3156_v20 }
  0x1b   :  { %118 = vmatpush.msra.mxu0 %v70_v22  ;;  %145 = vmatpush.msra.mxu1 %v85_v23 }
  0x1d   :  { %119 = vmatpush.msra.mxu0 %v69_v24  ;;  %146 = vmatpush.msra.mxu1 %v84_v25 }
  0x1f   :  { %120 = vmatpush.msra.mxu0 %v68_v26  ;;  %147 = vmatpush.msra.mxu1 %v83_v27 }
  0x21   :  { %121 = vmatpush.msra.mxu0 %v67_v28  ;;  %148 = vmatpush.msra.mxu1 %v82_v29 }
  0x23   :  { %122 = vmatpush.msra.mxu0 %v66_v30  ;;  %149 = vmatpush.msra.mxu1 %v81_v31 }
  0x25   :  { %123 = vmatpush.msra.mxu0 %v65_v32  ;;  %150 = vmatpush.msra.mxu1 %v80_v34 }
  0x27   :  { %124 = vmatpush.msra.mxu0 %v64_v33 }
  0x7a   :  { %v39_v38 = vpop.permute.xlu0 %38  ;;  %v45_v44 = vpop.permute.xlu1 %44 }
  0x7b   :  { %vm46_vm2 = vcmp.eq.s32.totalorder %v3213_v36, %v39_v38  ;;  %vm47_vm3 = vcmp.eq.s32.totalorder %v36_v37, %v39_v38  ;;  %vm51_vm6 = vcmp.eq.s32.totalorder %v36_v37, %v45_v44  ;;  %vm50_vm7 = vcmp.eq.s32.totalorder %v3213_v36, %v45_v44 }
  0x7c   :  { %2723 = vmatmul.msk.f32.vlgmr.msra.gmra.mxu0 %vm46_vm2, %v3152_v39  ;;  %v2718_v41 = vsel %vm47_vm3, 1.0, %v3153_v40  ;;  %v2722_v45 = vsel %vm51_vm6, 1.0, %v3153_v40  ;;  %vm428_vm6 = vcmask 195584  }
  0x7d   :  { %2727 = vmatmul.msk.f32.vlgmr.msra.gmra.mxu1 %vm95_vm1, %v2718_v41 }
  0x82   :  { %v42_v42 = vpop.permute.xlu0 %41 }
  0x83   :  { %vm48_vm4 = vcmp.eq.s32.totalorder %v3213_v36, %v42_v42  ;;  %vm49_vm5 = vcmp.eq.s32.totalorder %v36_v37, %v42_v42 }
  0x84   :  { %2724 = vmatmul.msk.f32.gmra.mxu0 %vm48_vm4, %v3152_v39  ;;  %v2720_v43 = vsel %vm49_vm5, 1.0, %v3153_v40  ;;  %v2934_v40 = vld [vmem:[#allocation2 + $0xf8] ss:$0 sm:$0xff]  ;;  %vm389_vm4 = vcmask 130048  }
  0x85   :  { %2728 = vmatmul.msk.f32.gmra.mxu1 %vm95_vm1, %v2720_v43 }
  0x8c   :  { %2725 = vmatmul.msk.f32.gmra.mxu0 %vm50_vm7, %v3152_v39 }
  0x8d   :  { %2729 = vmatmul.msk.f32.gmra.mxu1 %vm95_vm1, %v2722_v45  ;;  %v2935_v45 = vld [vmem:[#allocation2 + $0x100] ss:$0 sm:$0xff] }
  0xf9   :  { %v126_v46 = vpop.f32.mrf.mxu0 }
  0xfa   :  { %v152_v47 = vpop.f32.mrf.mxu1 }
  0xfb   :  { %v3226_v52 = vadd.f32 %v152_v47, %v126_v46 }
  0xfd   :  { %v222_v56 = vsel %vm221_vm8, %v3226_v52, 0.0 }
 0x101   :  { %v129_v48 = vpop.f32.mrf.mxu0 }
 0x102   :  { %v155_v49 = vpop.f32.mrf.mxu1 }
 0x103   :  { %v3222_v50 = vadd.f32 %v155_v49, %v129_v48 }
 0x105   :  { %v225_v51 = vsel %vm221_vm8, %v3222_v50, 0.0 }
 0x106   :  { %226 = vadd.xlane.f32.xlu2 %v225_v51 }
 0x109   :  { %v132_v53 = vpop.f32.mrf.mxu0 }
 0x10a   :  { %v158_v54 = vpop.f32.mrf.mxu1 }
 0x10b   :  { %v3228_v55 = vadd.f32 %v158_v54, %v132_v53 }
 0x10d   :  { %v228_v57 = vsel %vm221_vm8, %v3228_v55, 0.0 }
 0x10e   :  { %223 = vadd.xlane.f32.xlu2 %v222_v56  ;;  %229 = vadd.xlane.f32.xlu1 %v228_v57 }
 0x179   :  { %v227_v2 = vpop.xlane.xlu2 %226 }
 0x17a   :  { %v239_v3 = vmul.f32 %v3234_v1, %v227_v2 }
 0x17c   :  { %v242_v4 = vsub.f32 %v3222_v50, %v239_v3  ;;  %v3157_v3 = vmov 3  }
 0x17e   :  { %v245_v5 = vmul.f32 %v242_v4, %v242_v4 }
 0x180   :  { %v250_v6 = vsel %vm221_vm8, %v245_v5, 0.0 }
 0x181   :  { %251 = vadd.xlane.f32.xlu2 %v250_v6  ;;  %v224_v7 = vpop.xlane.xlu2 %223  ;;  %v230_v8 = vpop.xlane.xlu1 %229 }
 0x182   :  { %v238_v9 = vmul.f32 %v3234_v1, %v224_v7  ;;  %v240_v10 = vmul.f32 %v3234_v1, %v230_v8  ;;  %v303_v8 = vld [vmem:[#allocation2 + $0x108] sm:$0xf] }
 0x184   :  { %v241_v11 = vsub.f32 %v3226_v52, %v238_v9  ;;  %v243_v12 = vsub.f32 %v3228_v55, %v240_v10 }
 0x186   :  { %v244_v13 = vmul.f32 %v241_v11, %v241_v11  ;;  %v246_v14 = vmul.f32 %v243_v12, %v243_v12 }
 0x188   :  { %v247_v15 = vsel %vm221_vm8, %v244_v13, 0.0  ;;  %v253_v16 = vsel %vm221_vm8, %v246_v14, 0.0 }
 0x189   :  { %248 = vadd.xlane.f32.xlu2 %v247_v15  ;;  %254 = vadd.xlane.f32.xlu0 %v253_v16  ;;  %v354_v15 = vperm.slane %v303_v8, 2 }
 0x1f4   :  { %v252_v18 = vpop.xlane.xlu2 %251 }
 0x1f5   :  { %v257_v19 = vmul.f32 %v252_v18, %v3234_v1 }
 0x1f7   :  { %v260_v21 = vadd.f32 1e-05, %v257_v19 }
 0x1f9   :  { %2966 = vrsqrt.f32 %v260_v21  ;;  %vm278_vm11 = vweird.f32 %v260_v21 }
 0x1fc   :  { %v249_v22 = vpop.xlane.xlu2 %248  ;;  %v255_v23 = vpop.xlane.xlu0 %254 }
 0x1fd   :  { %v256_v24 = vmul.f32 %v249_v22, %v3234_v1  ;;  %v258_v25 = vmul.f32 %v255_v23, %v3234_v1 }
 0x1ff   :  { %v2967_v26 = vpop.eup %2966  ;;  %v259_v27 = vadd.f32 1e-05, %v256_v24  ;;  %v261_v28 = vadd.f32 1e-05, %v258_v25 }
 0x200   :  { %v273_v29 = vmul.f32 %v2967_v26, %v260_v21  ;;  %vm279_vm10 = vweird.f32 %v2967_v26  ;;  %v373_v21 = vperm.slane %v303_v8, 3 }
 0x201   :  { %2968 = vrsqrt.f32 %v259_v27  ;;  %vm280_vm12 = vmor %vm278_vm11, %vm279_vm10  ;;  %vm268_vm15 = vweird.f32 %v259_v27  ;;  %vm288_vm2 = vweird.f32 %v261_v28  ;;  %vm652_vm10 = vcmask 261120  }
 0x202   :  { %v274_v30 = vmul.f32 %v2967_v26, %v273_v29  ;;  %2970 = vrsqrt.f32 %v261_v28 }
 0x204   :  { %v275_v31 = vmul.f32 0.5, %v274_v30 }
 0x206   :  { %v276_v32 = vsub.f32 1.5, %v275_v31 }
 0x207   :  { %v2969_v33 = vpop.eup %2968 }
 0x208   :  { %v2971_v34 = vpop.eup %2970  ;;  %v277_v37 = vmul.f32 %v2967_v26, %v276_v32  ;;  %v263_v38 = vmul.f32 %v2969_v33, %v259_v27  ;;  %vm269_vm13 = vweird.f32 %v2969_v33 }
 0x209   :  { %v283_v39 = vmul.f32 %v2971_v34, %v261_v28  ;;  %vm289_vm14 = vweird.f32 %v2971_v34  ;;  %vm270_vm1 = vmor %vm268_vm15, %vm269_vm13 }
 0x20a   :  { %v281_v41 = vsel %vm280_vm12, %v2967_v26, %v277_v37  ;;  %v264_v42 = vmul.f32 %v2969_v33, %v263_v38  ;;  %vm290_vm3 = vmor %vm288_vm2, %vm289_vm14 }
 0x20b   :  { %v293_v43 = vmul.f32 %v281_v41, %v242_v4  ;;  %v284_v44 = vmul.f32 %v2971_v34, %v283_v39 }
 0x20c   :  { %v265_v46 = vmul.f32 0.5, %v264_v42 }
 0x20d   :  { %v285_v47 = vmul.f32 0.5, %v284_v44  ;;  %v297_v48 = vmul.f32 %v2934_v40, %v293_v43 }
 0x20e   :  { %v266_v49 = vsub.f32 1.5, %v265_v46 }
 0x20f   :  { %v286_v51 = vsub.f32 1.5, %v285_v47  ;;  %v301_v53 = vadd.f32 %v2935_v45, %v297_v48 }
 0x210   :  { %v267_v54 = vmul.f32 %v2969_v33, %v266_v49  ;;  %v162_v49 = vshrl.u32 %v34_v35, 7 }
 0x211   :  { %v287_v56 = vmul.f32 %v2971_v34, %v286_v51  ;;  %347 = vperm.xlu1 %2843, %v301_v53  }
 0x212   :  { %v271_v57 = vsel %vm270_vm1, %v2969_v33, %v267_v54  ;;  %v169_v51 = vand.u32 1, %v162_v49  ;;  %v163_v54 = vadd.s32 8, %v162_v49 }
 0x213   :  { %v292_v58 = vmul.f32 %v271_v57, %v241_v11  ;;  %v291_v59 = vsel %vm290_vm3, %v2971_v34, %v287_v56  ;;  %v335_v11 = vperm.slane %v303_v8, 1  ;;  %v3159_v56 = vmov -1e+30  }
 0x214   :  { %v294_v60 = vmul.f32 %v291_v59, %v243_v12  ;;  %v319_v12 = vperm.slane %v303_v8, 0 }
 0x215   :  { %v296_v61 = vmul.f32 %v2934_v40, %v292_v58  ;;  %v176_v58 = vand.u32 1, %v163_v54 }
 0x216   :  { %v298_v62 = vmul.f32 %v2934_v40, %v294_v60 }
 0x217   :  { %v300_v63 = vadd.f32 %v2935_v45, %v296_v61 }
 0x218   :  { %v302_v2 = vadd.f32 %v2935_v45, %v298_v62  ;;  %v164_v62 = vadd.s32 16, %v162_v49 }
 0x219   :  { %324 = vperm.xlu2 %2842, %v300_v63   ;;  %2845 = vset.pattern.permute.xlu1 %v3156_v20 }
 0x21a   :  { %306 = vperm.xlu0 %2840, %v300_v63   ;;  %332 = vperm.xlu1 %2845, %v302_v2   ;;  %v183_v35 = vand.u32 1, %v164_v62 }
 0x221   :  { %328 = vperm.xlu2 %2842, %v301_v53  }
 0x222   :  { %311 = vperm.xlu0 %2840, %v301_v53   ;;  %2846 = vset.pattern.permute.xlu1 %v3157_v3 }
 0x223   :  { %366 = vperm.xlu1 %2846, %v301_v53   ;;  %v205_v53 = vand.u32 1, %v3213_v36 }
 0x225   :  { %vm213_vm5 = vcmp.eq.s32.totalorder %v169_v51, %v205_v53  ;;  %vm214_vm7 = vcmp.eq.s32.totalorder %v176_v58, %v205_v53  ;;  %vm215_vm9 = vcmp.eq.s32.totalorder %v183_v35, %v205_v53 }
 0x226   :  { %v3282_v57 = vsel %vm213_vm5, 0.0, %v3159_v56 }
 0x229   :  { %2844 = vset.pattern.permute.xlu2 %v3151_v0 }
 0x22a   :  { %2847 = vset.pattern.permute.xlu0 %v3155_v17  ;;  %316 = vperm.xlu2 %2844, %v302_v2  }
 0x22b   :  { %343 = vperm.xlu0 %2847, %v300_v63   ;;  %2862 = vset.pattern.permute.xlu1 %v3155_v17 }
 0x232   :  { %2848 = vset.pattern.permute.xlu2 %v3155_v17 }
 0x233   :  { %351 = vperm.xlu2 %2848, %v302_v2   ;;  %2861 = vset.pattern.permute.xlu0 %v3156_v20 }
 0x23b   :  { %2849 = vset.pattern.permute.xlu2 %v3157_v3 }
 0x23c   :  { %370 = vperm.xlu2 %2849, %v302_v2  }
 0x244   :  { %362 = vperm.xlu2 %2849, %v300_v63   ;;  %v3286_v63 = vsel %vm214_vm7, 0.0, %v3159_v56 }
 0x24c   :  { %2860 = vset.pattern.permute.xlu2 %v3151_v0 }
 0x273   :  { %v325_v4 = vpop.permute.xlu2 %324 }
 0x274   :  { %v336_v38 = vmul.f32 %v335_v11, %v325_v4 }
 0x27b   :  { %v329_v5 = vpop.permute.xlu2 %328 }
 0x27c   :  { %v337_v23 = vmul.f32 %v335_v11, %v329_v5  ;;  %v3290_v5 = vsel %vm215_vm9, 0.0, %v3159_v56 }
 0x283   :  { %v348_v6 = vpop.permute.xlu1 %347 }
 0x284   :  { %v317_v7 = vpop.permute.xlu2 %316  ;;  %v356_v27 = vmul.f32 %v354_v15, %v348_v6 }
 0x285   :  { %v322_v16 = vmul.f32 %v319_v12, %v317_v7 }
 0x28c   :  { %v307_v9 = vpop.permute.xlu0 %306  ;;  %v333_v10 = vpop.permute.xlu1 %332 }
 0x28d   :  { %v352_v13 = vpop.permute.xlu2 %351  ;;  %v338_v14 = vmul.f32 %v335_v11, %v333_v10  ;;  %v320_v34 = vmul.f32 %v319_v12, %v307_v9 }
 0x28e   :  { %v357_v19 = vmul.f32 %v354_v15, %v352_v13 }
 0x28f   :  { %v341_v18 = vadd.f32 %v338_v14, %v322_v16  ;;  %v339_v40 = vadd.f32 %v336_v38, %v320_v34 }
 0x291   :  { %v360_v28 = vadd.f32 %v357_v19, %v341_v18 }
 0x294   :  { %v312_v22 = vpop.permute.xlu0 %311 }
 0x295   :  { %v321_v24 = vmul.f32 %v319_v12, %v312_v22  ;;  %v367_v25 = vpop.permute.xlu1 %366 }
 0x296   :  { %v371_v26 = vpop.permute.xlu2 %370  ;;  %v375_v32 = vmul.f32 %v373_v21, %v367_v25 }
 0x297   :  { %v340_v29 = vadd.f32 %v337_v23, %v321_v24  ;;  %v376_v30 = vmul.f32 %v373_v21, %v371_v26 }
 0x299   :  { %v359_v31 = vadd.f32 %v356_v27, %v340_v29  ;;  %v3259_v33 = vadd.f32 %v376_v30, %v360_v28 }
 0x29b   :  { %v3261_v37 = vadd.f32 %v375_v32, %v359_v31  ;;  %387 = vrot.lane.b32.xlu1 %v3259_v33, %s3158_s0 }
 0x29d   :  { %v344_v39 = vpop.permute.xlu0 %343  ;;  %385 = vrot.lane.b32.xlu2 %v3261_v37, %s3158_s0  ;;  %v3298_v9 = vpack.i.bf16 %v3261_v37, %v3259_v33 }
 0x29e   :  { %v355_v41 = vmul.f32 %v354_v15, %v344_v39  ;;  %v363_v42 = vpop.permute.xlu2 %362 }
 0x29f   :  { %v374_v43 = vmul.f32 %v373_v21, %v363_v42 }
 0x2a0   :  { %v358_v44 = vadd.f32 %v355_v41, %v339_v40 }
 0x2a2   :  { %v3267_v45 = vadd.f32 %v374_v43, %v358_v44 }
 0x2a4   :  { %383 = vrot.lane.b32.xlu1 %v3267_v45, %s3158_s0 }
 0x2f7   :  { %v386_v47 = vpop.permute.xlu2 %385 }
 0x30d   :  { %v388_v46 = vpop.permute.xlu1 %387 }
 0x30e   :  { %2730 = vmatpush.xpose.msk.msra.mxu2 %vm389_vm4, %v388_v46 }
 0x312   :  { %2731 = vmatpush.xpose.msk.msra.mxu2 %vm389_vm4, %v386_v47 }
 0x316   :  { %v384_v48 = vpop.permute.xlu1 %383 }
 0x317   :  { %2732 = vmatpush.xpose.msk.msra.mxu2 %vm389_vm4, %v384_v48 }
 0x31a   :  { %2733 = vmatmul.msk.f32.vlgmr.msra.gmra.mxu2 %vm389_vm4, %v3267_v45 }
 0x322   :  { %2734 = vmatmul.msk.f32.gmra.mxu2 %vm389_vm4, %v3261_v37 }
 0x32a   :  { %2735 = vmatmul.msk.f32.gmra.mxu2 %vm389_vm4, %v3259_v33 }
 0x39d   :  { %v419_v59 = vpop.f32.mrf.mxu2 }
 0x39e   :  { %v420_v60 = vadd.f32 %v419_v59, %v3282_v57 }
 0x3a0   :  { %v429_v61 = vsel %vm428_vm6, %v420_v60, -inf }
 0x3a1   :  { %430 = vmax.xlane.f32.xlu0 %v429_v61 }
 0x3a5   :  { %v422_v2 = vpop.f32.mrf.mxu2 }
 0x3a6   :  { %v423_v36 = vadd.f32 %v422_v2, %v3286_v63 }
 0x3a8   :  { %v432_v4 = vsel %vm428_vm6, %v423_v36, -inf }
 0x3a9   :  { %433 = vmax.xlane.f32.xlu2 %v432_v4 }
 0x3ad   :  { %v425_v6 = vpop.f32.mrf.mxu2 }
 0x3ae   :  { %v426_v7 = vadd.f32 %v425_v6, %v3290_v5 }
 0x3b0   :  { %v435_v8 = vsel %vm428_vm6, %v426_v7, -inf }
 0x3b1   :  { %436 = vmax.xlane.f32.xlu1 %v435_v8 }
 0x3b5   :  { %462 = vrot.lane.b32.xlu0 %v3267_v45, %s3160_s24 }
 0x3c1   :  { %2851 = vrot.lane.b32.xlu2 %v3298_v9, %s3160_s24 }
 0x3c9   :  { %514 = vrot.lane.b32.xlu2 %v3261_v37, %s3161_s25 }
 0x3d1   :  { %506 = vrot.lane.b32.xlu2 %v3267_v45, %s3162_s26 }
 0x3d9   :  { %510 = vrot.lane.b32.xlu2 %v3259_v33, %s3162_s26 }
 0x414   :  { %v431_v10 = vpop.xlane.xlu0 %430 }
 0x415   :  { %v438_v11 = vsub.f32 %v420_v60, %v431_v10 }
 0x417   :  { %v441_v12 = vmul.f32 1.442695, %v438_v11 }
 0x419   :  { %2972 = vpow2.f32 %v441_v12 }
 0x41c   :  { %v434_v13 = vpop.xlane.xlu2 %433 }
 0x41d   :  { %v439_v14 = vsub.f32 %v423_v36, %v434_v13 }
 0x41f   :  { %v2973_v15 = vpop.eup %2972  ;;  %v443_v16 = vmul.f32 1.442695, %v439_v14 }
 0x420   :  { %v447_v18 = vsel %vm428_vm6, %v2973_v15, 0.0 }
 0x421   :  { %2974 = vpow2.f32 %v443_v16  ;;  %448 = vadd.xlane.f32.xlu0 %v447_v18 }
 0x424   :  { %v437_v19 = vpop.xlane.xlu1 %436  ;;  %v2852_v21 = vpop.permute.xlu2 %2851 }
 0x425   :  { %v440_v22 = vsub.f32 %v426_v7, %v437_v19  ;;  %v2853_v23 = vunpack.i.l.bf16 %v2852_v21  ;;  %v2854_v26 = vunpack.i.h.bf16 %v2852_v21 }
 0x427   :  { %v2975_v24 = vpop.eup %2974  ;;  %v445_v25 = vmul.f32 1.442695, %v440_v22  ;;  %493 = vmatpush.msra.mxu3 %v2853_v23  ;;  %v463_v28 = vpop.permute.xlu0 %462 }
 0x428   :  { %v450_v27 = vsel %vm428_vm6, %v2975_v24, 0.0 }
 0x429   :  { %2976 = vpow2.f32 %v445_v25  ;;  %451 = vadd.xlane.f32.xlu1 %v450_v27  ;;  %494 = vmatpush.msra.mxu3 %v2854_v26 }
 0x42b   :  { %495 = vmatpush.msra.mxu3 %v463_v28 }
 0x42f   :  { %v2977_v29 = vpop.eup %2976 }
 0x430   :  { %v453_v30 = vsel %vm428_vm6, %v2977_v29, 0.0 }
 0x431   :  { %454 = vadd.xlane.f32.xlu1 %v453_v30 }
 0x435   :  { %512 = vrot.lane.b32.xlu0 %v3267_v45, %s3161_s25 }
 0x43d   :  { %508 = vrot.lane.b32.xlu0 %v3261_v37, %s3162_s26 }
 0x44a   :  { %516 = vrot.lane.b32.xlu1 %v3259_v33, %s3161_s25  ;;  %v515_v33 = vpop.permute.xlu2 %514 }
 0x452   :  { %v507_v46 = vpop.permute.xlu2 %506 }
 0x45a   :  { %v511_v48 = vpop.permute.xlu2 %510 }
 0x494   :  { %v449_v31 = vpop.xlane.xlu0 %448 }
 0x495   :  { %2978 = vrcp.f32 %v449_v31 }
 0x49b   :  { %v2979_v32 = vpop.eup %2978 }
 0x49c   :  { %v452_v34 = vpop.xlane.xlu1 %451  ;;  %v459_v38 = vmul.f32 %v2979_v32, %v2973_v15 }
 0x49d   :  { %2980 = vrcp.f32 %v452_v34  ;;  %v651_v34 = vld [vmem:[#allocation2 + $0x128] sm:$0xff] }
 0x49e   :  { %2736 = vmatmul.msk.f32.vlgmr.msra.gmra.mxu3 %vm428_vm6, %v459_v38  ;;  %v650_v38 = vld [vmem:[#allocation2 + $0x120] sm:$0xff]  ;;  %674 = vmatpush.msrb.mxu1 %v651_v34 }
 0x4a0   :  { %675 = vmatpush.msrb.mxu1 %v650_v38 }
 0x4a3   :  { %v2981_v39 = vpop.eup %2980 }
 0x4a4   :  { %v455_v40 = vpop.xlane.xlu1 %454  ;;  %v460_v41 = vmul.f32 %v2981_v39, %v2975_v24  ;;  %v649_v39 = vld [vmem:[#allocation2 + $0x118] sm:$0xff] }
 0x4a5   :  { %2982 = vrcp.f32 %v455_v40  ;;  %676 = vmatpush.msrb.mxu1 %v649_v39 }
 0x4a6   :  { %2737 = vmatmul.msk.f32.gmra.mxu3 %vm428_vm6, %v460_v41 }
 0x4a7   :  { %v513_v44 = vpop.permute.xlu0 %512 }
 0x4ab   :  { %v2983_v42 = vpop.eup %2982 }
 0x4ac   :  { %v461_v43 = vmul.f32 %v2983_v42, %v2977_v29 }
 0x4ae   :  { %2738 = vmatmul.msk.f32.gmra.mxu3 %vm428_vm6, %v461_v43  ;;  %v648_v43 = vld [vmem:[#allocation2 + $0x110] sm:$0xff] }
 0x4af   :  { %v509_v47 = vpop.permute.xlu0 %508  ;;  %677 = vmatpush.msrb.mxu1 %v648_v43 }
 0x4bc   :  { %v517_v37 = vpop.permute.xlu1 %516 }
 0x4bd   :  { %2739 = vmatpush.xpose.msk.msrb.mxu3 %vm389_vm4, %v517_v37 }
 0x4c1   :  { %2740 = vmatpush.xpose.msk.msrb.mxu3 %vm389_vm4, %v515_v33 }
 0x4c5   :  { %2741 = vmatpush.xpose.msk.msrb.mxu3 %vm389_vm4, %v513_v44 }
 0x4c8   :  { %2742 = vmatmul.msk.f32.vlgmr.msrb.gmra.mxu3 %vm389_vm4, %v507_v46 }
 0x4d0   :  { %2743 = vmatmul.msk.f32.gmra.mxu3 %vm389_vm4, %v509_v47 }
 0x4d8   :  { %2744 = vmatmul.msk.f32.gmra.mxu3 %vm389_vm4, %v511_v48 }
 0x521   :  { %v3326_v49 = vpop.f32.mrf.mxu3 }
 0x529   :  { %v3328_v51 = vpop.f32.mrf.mxu3 }
 0x531   :  { %v3330_v53 = vpop.f32.mrf.mxu3 }
 0x54b   :  { %v547_v54 = vpop.f32.mrf.mxu3 }
 0x54c   :  { %v548_v56 = vadd.f32 %v547_v54, %v3282_v57  ;;  %v2936_v54 = vld [vmem:[#allocation2 + $0x130] ss:$0 sm:$0xff] }
 0x54e   :  { %v556_v58 = vsel %vm428_vm6, %v548_v56, -inf }
 0x54f   :  { %557 = vmax.xlane.f32.xlu0 %v556_v58 }
 0x553   :  { %v550_v59 = vpop.f32.mrf.mxu3 }
 0x554   :  { %v551_v60 = vadd.f32 %v550_v59, %v3286_v63 }
 0x556   :  { %v559_v61 = vsel %vm428_vm6, %v551_v60, -inf }
 0x557   :  { %560 = vmax.xlane.f32.xlu1 %v559_v61 }
 0x55b   :  { %v553_v62 = vpop.f32.mrf.mxu3 }
 0x55c   :  { %v554_v35 = vadd.f32 %v553_v62, %v3290_v5 }
 0x55e   :  { %v562_v2 = vsel %vm428_vm6, %v554_v35, -inf }
 0x55f   :  { %563 = vmax.xlane.f32.xlu2 %v562_v2 }
 0x570   :  { %2856 = vrot.lane.b32.xlu1 %v3298_v9, %s3163_s27 }
 0x5c2   :  { %v558_v36 = vpop.xlane.xlu0 %557 }
 0x5c3   :  { %v565_v4 = vsub.f32 %v548_v56, %v558_v36 }
 0x5c5   :  { %v568_v6 = vmul.f32 1.442695, %v565_v4 }
 0x5c7   :  { %2984 = vpow2.f32 %v568_v6 }
 0x5ca   :  { %v561_v7 = vpop.xlane.xlu1 %560 }
 0x5cb   :  { %v566_v8 = vsub.f32 %v551_v60, %v561_v7 }
 0x5cd   :  { %v2985_v10 = vpop.eup %2984  ;;  %v570_v11 = vmul.f32 1.442695, %v566_v8 }
 0x5ce   :  { %v574_v12 = vsel %vm428_vm6, %v2985_v10, 0.0 }
 0x5cf   :  { %2986 = vpow2.f32 %v570_v11  ;;  %575 = vadd.xlane.f32.xlu0 %v574_v12 }
 0x5d2   :  { %v564_v13 = vpop.xlane.xlu2 %563 }
 0x5d3   :  { %v567_v14 = vsub.f32 %v554_v35, %v564_v13 }
 0x5d5   :  { %v2987_v15 = vpop.eup %2986  ;;  %v572_v16 = vmul.f32 1.442695, %v567_v14 }
 0x5d6   :  { %v577_v18 = vsel %vm428_vm6, %v2987_v15, 0.0 }
 0x5d7   :  { %2988 = vpow2.f32 %v572_v16  ;;  %578 = vadd.xlane.f32.xlu2 %v577_v18 }
 0x5dd   :  { %v2989_v9 = vpop.eup %2988 }
 0x5de   :  { %v580_v19 = vsel %vm428_vm6, %v2989_v9, 0.0 }
 0x5df   :  { %581 = vadd.xlane.f32.xlu2 %v580_v19 }
 0x5e2   :  { %v2857_v21 = vpop.permute.xlu1 %2856 }
 0x5e3   :  { %589 = vrot.lane.b32.xlu0 %v3267_v45, %s3163_s27  ;;  %v2858_v22 = vunpack.i.l.bf16 %v2857_v21  ;;  %v2859_v23 = vunpack.i.h.bf16 %v2857_v21 }
 0x5e5   :  { %620 = vmatpush.msrb.mxu2 %v2858_v22 }
 0x5e7   :  { %621 = vmatpush.msrb.mxu2 %v2859_v23 }
 0x642   :  { %v576_v24 = vpop.xlane.xlu0 %575 }
 0x643   :  { %2990 = vrcp.f32 %v576_v24 }
 0x649   :  { %v2991_v26 = vpop.eup %2990 }
 0x64a   :  { %v579_v25 = vpop.xlane.xlu2 %578  ;;  %v586_v28 = vmul.f32 %v2991_v26, %v2985_v10 }
 0x64b   :  { %2992 = vrcp.f32 %v579_v25 }
 0x651   :  { %v2993_v30 = vpop.eup %2992 }
 0x652   :  { %v582_v29 = vpop.xlane.xlu2 %581  ;;  %v587_v31 = vmul.f32 %v2993_v30, %v2987_v15 }
 0x653   :  { %2994 = vrcp.f32 %v582_v29 }
 0x655   :  { %v590_v27 = vpop.permute.xlu0 %589 }
 0x656   :  { %622 = vmatpush.msrb.mxu2 %v590_v27 }
 0x657   :  { %2745 = vmatmul.msk.f32.vlgmr.msrb.gmra.mxu2 %vm428_vm6, %v586_v28  ;;  %v2937_v28 = vld [vmem:[#allocation2 + $0x138] ss:$0 sm:$0xff] }
 0x659   :  { %v2995_v45 = vpop.eup %2994 }
 0x65a   :  { %v588_v32 = vmul.f32 %v2995_v45, %v2989_v9 }
 0x65f   :  { %2746 = vmatmul.msk.f32.gmra.mxu2 %vm428_vm6, %v587_v31  ;;  %v2938_v31 = vld [vmem:[#allocation2 + $0x140] ss:$0 sm:$0xff] }
 0x667   :  { %2747 = vmatmul.msk.f32.gmra.mxu2 %vm428_vm6, %v588_v32 }
 0x6da   :  { %v624_v40 = vpop.f32.mrf.mxu2 }
 0x6db   :  { %636 = vrot.lane.b32.xlu2 %v624_v40, %s3164_s28 }
 0x6e2   :  { %v627_v41 = vpop.f32.mrf.mxu2 }
 0x6e3   :  { %638 = vrot.lane.b32.xlu1 %v627_v41, %s3164_s28 }
 0x6ea   :  { %v630_v42 = vpop.f32.mrf.mxu2 }
 0x6eb   :  { %640 = vrot.lane.b32.xlu0 %v630_v42, %s3164_s28 }
 0x735   :  { %v637_v37 = vpop.permute.xlu2 %636 }
 0x736   :  { %v645_v33 = vsel %vm389_vm4, %v3326_v49, %v637_v37 }
 0x737   :  { %2748 = vmatmul.msk.f32.vlgmr.msrb.gmra.mxu1 %vm652_vm10, %v645_v33 }
 0x755   :  { %v639_v44 = vpop.permute.xlu1 %638 }
 0x756   :  { %v646_v46 = vsel %vm389_vm4, %v3328_v51, %v639_v44 }
 0x757   :  { %2749 = vmatmul.msk.f32.gmra.mxu1 %vm652_vm10, %v646_v46 }
 0x75d   :  { %v641_v47 = vpop.permute.xlu0 %640 }
 0x75e   :  { %v647_v48 = vsel %vm389_vm4, %v3330_v53, %v641_v47 }
 0x75f   :  { %2750 = vmatmul.msk.f32.gmra.mxu1 %vm652_vm10, %v647_v48 }
 0x7b4   :  { %v679_v56 = vpop.f32.mrf.mxu1 }
 0x7b5   :  { %v688_v58 = vadd.f32 %v679_v56, %v3226_v52 }
 0x7b7   :  { %v3361_v59 = vadd.f32 %v2936_v54, %v688_v58 }
 0x7b9   :  { %v698_v49 = vsel %vm221_vm8, %v3361_v59, 0.0 }
 0x7ba   :  { %699 = vadd.xlane.f32.xlu1 %v698_v49 }
 0x7d4   :  { %v682_v60 = vpop.f32.mrf.mxu1 }
 0x7d5   :  { %v689_v51 = vadd.f32 %v682_v60, %v3222_v50 }
 0x7d7   :  { %v3366_v61 = vadd.f32 %v2936_v54, %v689_v51 }
 0x7d9   :  { %v701_v53 = vsel %vm221_vm8, %v3366_v61, 0.0 }
 0x7da   :  { %702 = vadd.xlane.f32.xlu0 %v701_v53 }
 0x7dc   :  { %v685_v62 = vpop.f32.mrf.mxu1 }
 0x7dd   :  { %v690_v35 = vadd.f32 %v685_v62, %v3228_v55 }
 0x7df   :  { %v3371_v2 = vadd.f32 %v2936_v54, %v690_v35 }
 0x7e1   :  { %v704_v52 = vsel %vm221_vm8, %v3371_v2, 0.0 }
 0x7e2   :  { %705 = vadd.xlane.f32.xlu2 %v704_v52 }
 0x82d   :  { %v700_v36 = vpop.xlane.xlu1 %699 }
 0x82e   :  { %v707_v4 = vmul.f32 %v700_v36, %v3234_v1 }
 0x830   :  { %v710_v50 = vsub.f32 %v3361_v59, %v707_v4 }
 0x832   :  { %v713_v6 = vmul.f32 %v710_v50, %v710_v50 }
 0x834   :  { %v716_v7 = vsel %vm221_vm8, %v713_v6, 0.0 }
 0x835   :  { %717 = vadd.xlane.f32.xlu1 %v716_v7  ;;  %v772_v7 = vld [vmem:[#allocation2 + $0x148] sm:$0xf] }
 0x84d   :  { %v703_v8 = vpop.xlane.xlu0 %702 }
 0x84e   :  { %v708_v10 = vmul.f32 %v703_v8, %v3234_v1  ;;  %v788_v8 = vperm.slane %v772_v7, 0 }
 0x850   :  { %v711_v55 = vsub.f32 %v3366_v61, %v708_v10  ;;  %v804_v10 = vperm.slane %v772_v7, 1 }
 0x852   :  { %v714_v11 = vmul.f32 %v711_v55, %v711_v55 }
 0x854   :  { %v719_v12 = vsel %vm221_vm8, %v714_v11, 0.0 }
 0x855   :  { %v706_v13 = vpop.xlane.xlu2 %705  ;;  %720 = vadd.xlane.f32.xlu0 %v719_v12 }
 0x856   :  { %v709_v14 = vmul.f32 %v706_v13, %v3234_v1 }
 0x858   :  { %v3383_v15 = vsub.f32 %v3371_v2, %v709_v14  ;;  %v842_v14 = vperm.slane %v772_v7, 3 }
 0x85a   :  { %v715_v16 = vmul.f32 %v3383_v15, %v3383_v15 }
 0x85c   :  { %v722_v18 = vsel %vm221_vm8, %v715_v16, 0.0 }
 0x85d   :  { %723 = vadd.xlane.f32.xlu1 %v722_v18 }
 0x8a8   :  { %v718_v9 = vpop.xlane.xlu1 %717 }
 0x8a9   :  { %v725_v19 = vmul.f32 %v718_v9, %v3234_v1 }
 0x8ab   :  { %v728_v21 = vadd.f32 1e-05, %v725_v19 }
 0x8ad   :  { %2996 = vrsqrt.f32 %v728_v21  ;;  %vm737_vm12 = vweird.f32 %v728_v21 }
 0x8b3   :  { %v2997_v22 = vpop.eup %2996 }
 0x8b4   :  { %v732_v23 = vmul.f32 %v2997_v22, %v728_v21  ;;  %vm738_vm11 = vweird.f32 %v2997_v22  ;;  %v2939_v21 = vld [vmem:[#allocation2 + $0x150] ss:$0 sm:$0xff] }
 0x8b5   :  { %vm739_vm13 = vmor %vm737_vm12, %vm738_vm11 }
 0x8b6   :  { %v733_v24 = vmul.f32 %v2997_v22, %v732_v23 }
 0x8b8   :  { %v734_v25 = vmul.f32 0.5, %v733_v24 }
 0x8ba   :  { %v735_v26 = vsub.f32 1.5, %v734_v25 }
 0x8bc   :  { %v736_v27 = vmul.f32 %v2997_v22, %v735_v26 }
 0x8be   :  { %v740_v29 = vsel %vm739_vm13, %v2997_v22, %v736_v27 }
 0x8bf   :  { %v761_v30 = vmul.f32 %v740_v29, %v710_v50 }
 0x8c1   :  { %v765_v45 = vmul.f32 %v2937_v28, %v761_v30 }
 0x8c3   :  { %v769_v32 = vadd.f32 %v2938_v31, %v765_v45 }
 0x8c5   :  { %775 = vperm.xlu2 %2860, %v769_v32   ;;  %812 = vperm.xlu1 %2862, %v769_v32  }
 0x8c6   :  { %793 = vperm.xlu0 %2861, %v769_v32  }
 0x8c8   :  { %v721_v34 = vpop.xlane.xlu0 %720 }
 0x8c9   :  { %v726_v38 = vmul.f32 %v721_v34, %v3234_v1 }
 0x8cb   :  { %v729_v39 = vadd.f32 1e-05, %v726_v38 }
 0x8cd   :  { %2998 = vrsqrt.f32 %v729_v39  ;;  %2863 = vset.pattern.permute.xlu2 %v3157_v3  ;;  %2865 = vset.pattern.permute.xlu1 %v3156_v20  ;;  %vm747_vm15 = vweird.f32 %v729_v39 }
 0x8ce   :  { %831 = vperm.xlu2 %2863, %v769_v32   ;;  %2867 = vset.pattern.permute.xlu0 %v3157_v3 }
 0x8d0   :  { %v724_v40 = vpop.xlane.xlu1 %723 }
 0x8d1   :  { %v727_v41 = vmul.f32 %v724_v40, %v3234_v1 }
 0x8d3   :  { %v2999_v42 = vpop.eup %2998  ;;  %v730_v43 = vadd.f32 1e-05, %v727_v41 }
 0x8d4   :  { %v742_v37 = vmul.f32 %v2999_v42, %v729_v39  ;;  %vm748_vm14 = vweird.f32 %v2999_v42 }
 0x8d5   :  { %3000 = vrsqrt.f32 %v730_v43  ;;  %vm749_vm1 = vmor %vm747_vm15, %vm748_vm14  ;;  %vm757_vm3 = vweird.f32 %v730_v43 }
 0x8d6   :  { %v743_v33 = vmul.f32 %v2999_v42, %v742_v37  ;;  %2864 = vset.pattern.permute.xlu2 %v3151_v0 }
 0x8d8   :  { %v744_v44 = vmul.f32 0.5, %v743_v33 }
 0x8da   :  { %v745_v46 = vsub.f32 1.5, %v744_v44 }
 0x8db   :  { %v3001_v47 = vpop.eup %3000 }
 0x8dc   :  { %v746_v48 = vmul.f32 %v2999_v42, %v745_v46  ;;  %v752_v54 = vmul.f32 %v3001_v47, %v730_v43  ;;  %vm758_vm2 = vweird.f32 %v3001_v47 }
 0x8dd   :  { %vm759_vm5 = vmor %vm757_vm3, %vm758_vm2 }
 0x8de   :  { %v750_v56 = vsel %vm749_vm1, %v2999_v42, %v746_v48  ;;  %v753_v58 = vmul.f32 %v3001_v47, %v752_v54 }
 0x8df   :  { %v762_v49 = vmul.f32 %v750_v56, %v711_v55  ;;  %v823_v55 = vperm.slane %v772_v7, 2 }
 0x8e0   :  { %v754_v60 = vmul.f32 0.5, %v753_v58 }
 0x8e1   :  { %v766_v51 = vmul.f32 %v2937_v28, %v762_v49 }
 0x8e2   :  { %v755_v53 = vsub.f32 1.5, %v754_v60 }
 0x8e3   :  { %v770_v62 = vadd.f32 %v2938_v31, %v766_v51  ;;  %v897_v51 = vld [vmem:[#allocation2 + $0x160] sm:$0xff] }
 0x8e4   :  { %v756_v35 = vmul.f32 %v3001_v47, %v755_v53  ;;  %921 = vmatpush.msra.mxu3 %v897_v51 }
 0x8e5   :  { %835 = vperm.xlu0 %2867, %v770_v62   ;;  %797 = vperm.xlu1 %2865, %v770_v62  }
 0x8e6   :  { %v760_v52 = vsel %vm759_vm5, %v3001_v47, %v756_v35  ;;  %780 = vperm.xlu2 %2864, %v770_v62  }
 0x8e7   :  { %v763_v36 = vmul.f32 %v760_v52, %v3383_v15 }
 0x8e9   :  { %v767_v4 = vmul.f32 %v2937_v28, %v763_v36 }
 0x8eb   :  { %v771_v50 = vadd.f32 %v2938_v31, %v767_v4 }
 0x8ed   :  { %2868 = vset.pattern.permute.xlu1 %v3151_v0  ;;  %2872 = vset.pattern.permute.xlu0 %v3151_v0 }
 0x8ee   :  { %2866 = vset.pattern.permute.xlu2 %v3155_v17  ;;  %785 = vperm.xlu1 %2868, %v771_v50  }
 0x8ef   :  { %816 = vperm.xlu2 %2866, %v770_v62  }
 0x8f6   :  { %2870 = vset.pattern.permute.xlu1 %v3155_v17 }
 0x8f7   :  { %2869 = vset.pattern.permute.xlu2 %v3156_v20  ;;  %820 = vperm.xlu1 %2870, %v771_v50  }
 0x8f8   :  { %801 = vperm.xlu2 %2869, %v771_v50  }
 0x8ff   :  { %2873 = vset.pattern.permute.xlu1 %v3156_v20 }
 0x900   :  { %2871 = vset.pattern.permute.xlu2 %v3157_v3 }
 0x901   :  { %839 = vperm.xlu2 %2871, %v771_v50  }
 0x909   :  { %2875 = vset.pattern.permute.xlu2 %v3156_v20 }
 0x91f   :  { %v776_v6 = vpop.permute.xlu2 %775 }
 0x920   :  { %v789_v13 = vmul.f32 %v788_v8, %v776_v6 }
 0x928   :  { %v832_v16 = vpop.permute.xlu2 %831 }
 0x929   :  { %v843_v19 = vmul.f32 %v842_v14, %v832_v16 }
 0x937   :  { %v813_v11 = vpop.permute.xlu1 %812 }
 0x938   :  { %v794_v12 = vpop.permute.xlu0 %793  ;;  %v824_v18 = vmul.f32 %v823_v55, %v813_v11 }
 0x939   :  { %v805_v15 = vmul.f32 %v804_v10, %v794_v12 }
 0x93b   :  { %v808_v9 = vadd.f32 %v805_v15, %v789_v13 }
 0x93d   :  { %v827_v22 = vadd.f32 %v824_v18, %v808_v9 }
 0x93f   :  { %v846_v23 = vadd.f32 %v843_v19, %v827_v22 }
 0x940   :  { %v781_v29 = vpop.permute.xlu2 %780 }
 0x941   :  { %v3404_v24 = vadd.f32 %v2939_v21, %v846_v23  ;;  %v790_v40 = vmul.f32 %v788_v8, %v781_v29 }
 0x943   :  { %v857_v25 = vmul.f32 0.044715, %v3404_v24  ;;  %v854_v45 = vmul.f32 0.5, %v3404_v24 }
 0x945   :  { %v860_v26 = vmul.f32 %v857_v25, %v3404_v24 }
 0x947   :  { %v863_v27 = vmul.f32 %v860_v26, %v3404_v24  ;;  %v896_v26 = vld [vmem:[#allocation2 + $0x158] sm:$0xff] }
 0x948   :  { %922 = vmatpush.msra.mxu3 %v896_v26 }
 0x949   :  { %v866_v28 = vadd.f32 %v863_v27, %v3404_v24  ;;  %v817_v34 = vpop.permute.xlu2 %816 }
 0x94a   :  { %v825_v43 = vmul.f32 %v823_v55, %v817_v34 }
 0x94b   :  { %v869_v30 = vmul.f32 0.7978846, %v866_v28 }
 0x94d   :  { %3002 = vtanh.f32 %v869_v30 }
 0x952   :  { %v802_v47 = vpop.permute.xlu2 %801 }
 0x953   :  { %v3003_v31 = vpop.eup %3002  ;;  %v807_v53 = vmul.f32 %v804_v10, %v802_v47 }
 0x954   :  { %v875_v32 = vadd.f32 1.0, %v3003_v31 }
 0x956   :  { %v878_v38 = vmul.f32 %v875_v32, %v854_v45  ;;  %v2940_v45 = vld [vmem:[#allocation2 + $0x168] ss:$0 sm:$0xff] }
 0x957   :  { %v798_v39 = vpop.permute.xlu1 %797  ;;  %v836_v42 = vpop.permute.xlu0 %835 }
 0x958   :  { %v806_v41 = vmul.f32 %v804_v10, %v798_v39  ;;  %884 = vrot.lane.b32.xlu0 %v878_v38, %s3162_s26  ;;  %v844_v44 = vmul.f32 %v842_v14, %v836_v42 }
 0x95a   :  { %v809_v37 = vadd.f32 %v806_v41, %v790_v40 }
 0x95b   :  { %v840_v35 = vpop.permute.xlu2 %839 }
 0x95c   :  { %v828_v33 = vadd.f32 %v825_v43, %v809_v37  ;;  %v845_v6 = vmul.f32 %v842_v14, %v840_v35 }
 0x95e   :  { %v847_v46 = vadd.f32 %v844_v44, %v828_v33 }
 0x960   :  { %v852_v48 = vadd.f32 %v2939_v21, %v847_v46  ;;  %v786_v54 = vpop.permute.xlu1 %785 }
 0x961   :  { %v791_v49 = vmul.f32 %v788_v8, %v786_v54 }
 0x962   :  { %v858_v56 = vmul.f32 0.044715, %v852_v48  ;;  %v855_v16 = vmul.f32 0.5, %v852_v48 }
 0x963   :  { %v810_v36 = vadd.f32 %v807_v53, %v791_v49 }
 0x964   :  { %v861_v58 = vmul.f32 %v858_v56, %v852_v48 }
 0x966   :  { %v864_v60 = vmul.f32 %v861_v58, %v852_v48 }
 0x968   :  { %v867_v62 = vadd.f32 %v864_v60, %v852_v48 }
 0x969   :  { %v821_v52 = vpop.permute.xlu1 %820 }
 0x96a   :  { %v826_v4 = vmul.f32 %v823_v55, %v821_v52  ;;  %v870_v50 = vmul.f32 0.7978846, %v867_v62 }
 0x96c   :  { %v829_v7 = vadd.f32 %v826_v4, %v810_v36  ;;  %3004 = vtanh.f32 %v870_v50 }
 0x96e   :  { %v848_v11 = vadd.f32 %v845_v6, %v829_v7 }
 0x970   :  { %v853_v12 = vadd.f32 %v2939_v21, %v848_v11 }
 0x972   :  { %v3005_v13 = vpop.eup %3004  ;;  %v859_v15 = vmul.f32 0.044715, %v853_v12  ;;  %v856_v55 = vmul.f32 0.5, %v853_v12 }
 0x973   :  { %v876_v18 = vadd.f32 1.0, %v3005_v13 }
 0x974   :  { %v862_v8 = vmul.f32 %v859_v15, %v853_v12  ;;  %v2941_v15 = vld [vmem:[#allocation2 + $0x170] ss:$0 sm:$0xff] }
 0x975   :  { %v879_v9 = vmul.f32 %v876_v18, %v855_v16 }
 0x976   :  { %v865_v19 = vmul.f32 %v862_v8, %v853_v12  ;;  %v2942_v8 = vld [vmem:[#allocation2 + $0x178] ss:$0 sm:$0xff] }
 0x977   :  { %886 = vrot.lane.b32.xlu1 %v879_v9, %s3162_s26 }
 0x978   :  { %v868_v10 = vadd.f32 %v865_v19, %v853_v12 }
 0x97a   :  { %v871_v22 = vmul.f32 0.7978846, %v868_v10 }
 0x97c   :  { %3006 = vtanh.f32 %v871_v22 }
 0x982   :  { %v3007_v23 = vpop.eup %3006 }
 0x983   :  { %v877_v25 = vadd.f32 1.0, %v3007_v23 }
 0x985   :  { %v880_v14 = vmul.f32 %v877_v25, %v856_v55 }
 0x987   :  { %888 = vrot.lane.b32.xlu2 %v880_v14, %s3162_s26 }
 0x9ca   :  { %v885_v21 = vpop.permute.xlu0 %884 }
 0x9cb   :  { %v893_v27 = vmul.f32 %v885_v21, %v3404_v24 }
 0x9cd   :  { %2751 = vmatmul.msk.f32.vlgmr.msra.gmra.mxu3 %vm389_vm4, %v893_v27 }
 0x9e1   :  { %v889_v30 = vpop.permute.xlu2 %888 }
 0x9e2   :  { %v895_v31 = vmul.f32 %v889_v30, %v853_v12 }
 0x9e9   :  { %v887_v28 = vpop.permute.xlu1 %886 }
 0x9ea   :  { %v894_v29 = vmul.f32 %v887_v28, %v852_v48 }
 0x9ec   :  { %2752 = vmatmul.msk.f32.gmra.mxu3 %vm389_vm4, %v894_v29 }
 0x9f4   :  { %2753 = vmatmul.msk.f32.gmra.mxu3 %vm389_vm4, %v895_v31 }
 0xa50   :  { %v924_v32 = vpop.f32.mrf.mxu3 }
 0xa51   :  { %v933_v34 = vadd.f32 %v924_v32, %v3361_v59 }
 0xa53   :  { %v3419_v38 = vadd.f32 %v2940_v45, %v933_v34 }
 0xa55   :  { %v943_v39 = vsel %vm221_vm8, %v3419_v38, 0.0 }
 0xa56   :  { %944 = vadd.xlane.f32.xlu2 %v943_v39 }
 0xa6f   :  { %v927_v24 = vpop.f32.mrf.mxu3 }
 0xa70   :  { %v934_v40 = vadd.f32 %v927_v24, %v3366_v61 }
 0xa72   :  { %v3424_v41 = vadd.f32 %v2940_v45, %v934_v40 }
 0xa74   :  { %v946_v42 = vsel %vm221_vm8, %v3424_v41, 0.0 }
 0xa75   :  { %947 = vadd.xlane.f32.xlu1 %v946_v42 }
 0xa77   :  { %v930_v43 = vpop.f32.mrf.mxu3 }
 0xa78   :  { %v935_v37 = vadd.f32 %v930_v43, %v3371_v2 }
 0xa7a   :  { %v3429_v33 = vadd.f32 %v2940_v45, %v935_v37 }
 0xa7c   :  { %v949_v59 = vsel %vm221_vm8, %v3429_v33, 0.0 }
 0xa7d   :  { %950 = vadd.xlane.f32.xlu0 %v949_v59 }
 0xac9   :  { %v945_v44 = vpop.xlane.xlu2 %944 }
 0xaca   :  { %v952_v46 = vmul.f32 %v945_v44, %v3234_v1 }
 0xacc   :  { %v955_v61 = vsub.f32 %v3419_v38, %v952_v46 }
 0xace   :  { %v958_v47 = vmul.f32 %v955_v61, %v955_v61 }
 0xad0   :  { %v961_v48 = vsel %vm221_vm8, %v958_v47, 0.0 }
 0xad1   :  { %962 = vadd.xlane.f32.xlu2 %v961_v48 }
 0xae8   :  { %v948_v54 = vpop.xlane.xlu1 %947 }
 0xae9   :  { %v953_v56 = vmul.f32 %v948_v54, %v3234_v1 }
 0xaeb   :  { %v956_v2 = vsub.f32 %v3424_v41, %v953_v56 }
 0xaed   :  { %v959_v58 = vmul.f32 %v956_v2, %v956_v2 }
 0xaef   :  { %v964_v49 = vsel %vm221_vm8, %v959_v58, 0.0 }
 0xaf0   :  { %965 = vadd.xlane.f32.xlu1 %v964_v49  ;;  %v951_v60 = vpop.xlane.xlu0 %950 }
 0xaf1   :  { %v954_v51 = vmul.f32 %v951_v60, %v3234_v1 }
 0xaf3   :  { %v957_v53 = vsub.f32 %v3429_v33, %v954_v51 }
 0xaf5   :  { %v960_v62 = vmul.f32 %v957_v53, %v957_v53 }
 0xaf7   :  { %v967_v35 = vsel %vm221_vm8, %v960_v62, 0.0 }
 0xaf8   :  { %968 = vadd.xlane.f32.xlu0 %v967_v35 }
 0xb44   :  { %v963_v52 = vpop.xlane.xlu2 %962 }
 0xb45   :  { %v970_v36 = vmul.f32 %v963_v52, %v3234_v1 }
 0xb47   :  { %v973_v4 = vadd.f32 1e-05, %v970_v36 }
 0xb49   :  { %3008 = vrsqrt.f32 %v973_v4  ;;  %vm982_vm9 = vweird.f32 %v973_v4 }
 0xb4f   :  { %v3009_v50 = vpop.eup %3008 }
 0xb50   :  { %v977_v6 = vmul.f32 %v3009_v50, %v973_v4  ;;  %vm983_vm7 = vweird.f32 %v3009_v50 }
 0xb51   :  { %vm984_vm11 = vmor %vm982_vm9, %vm983_vm7 }
 0xb52   :  { %v978_v7 = vmul.f32 %v3009_v50, %v977_v6 }
 0xb54   :  { %v979_v11 = vmul.f32 0.5, %v978_v7 }
 0xb56   :  { %v980_v12 = vsub.f32 1.5, %v979_v11 }
 0xb58   :  { %v981_v13 = vmul.f32 %v3009_v50, %v980_v12 }
 0xb5a   :  { %v985_v16 = vsel %vm984_vm11, %v3009_v50, %v981_v13 }
 0xb5b   :  { %v1006_v18 = vmul.f32 %v985_v16, %v955_v61 }
 0xb5d   :  { %v1010_v9 = vmul.f32 %v2941_v15, %v1006_v18 }
 0xb5f   :  { %v1014_v19 = vadd.f32 %v2942_v8, %v1010_v9 }
 0xb61   :  { %1038 = vperm.xlu1 %2873, %v1014_v19   ;;  %1020 = vperm.xlu0 %2872, %v1014_v19  }
 0xb63   :  { %v966_v10 = vpop.xlane.xlu1 %965 }
 0xb64   :  { %v971_v22 = vmul.f32 %v966_v10, %v3234_v1 }
 0xb66   :  { %v974_v23 = vadd.f32 1e-05, %v971_v22 }
 0xb68   :  { %3010 = vrsqrt.f32 %v974_v23  ;;  %vm992_vm13 = vweird.f32 %v974_v23 }
 0xb69   :  { %2874 = vset.pattern.permute.xlu1 %v3151_v0 }
 0xb6b   :  { %v969_v55 = vpop.xlane.xlu0 %968 }
 0xb6c   :  { %v972_v25 = vmul.f32 %v969_v55, %v3234_v1 }
 0xb6e   :  { %v3011_v14 = vpop.eup %3010  ;;  %v975_v26 = vadd.f32 1e-05, %v972_v25 }
 0xb6f   :  { %v987_v21 = vmul.f32 %v3011_v14, %v974_v23  ;;  %vm993_vm12 = vweird.f32 %v3011_v14 }
 0xb70   :  { %3012 = vrsqrt.f32 %v975_v26  ;;  %vm994_vm14 = vmor %vm992_vm13, %vm993_vm12  ;;  %vm1002_vm1 = vweird.f32 %v975_v26 }
 0xb71   :  { %v988_v27 = vmul.f32 %v3011_v14, %v987_v21 }
 0xb73   :  { %v989_v28 = vmul.f32 0.5, %v988_v27 }
 0xb75   :  { %v990_v29 = vsub.f32 1.5, %v989_v28 }
 0xb76   :  { %v3013_v30 = vpop.eup %3012 }
 0xb77   :  { %v991_v31 = vmul.f32 %v3011_v14, %v990_v29  ;;  %v997_v45 = vmul.f32 %v3013_v30, %v975_v26  ;;  %vm1003_vm15 = vweird.f32 %v3013_v30 }
 0xb78   :  { %vm1004_vm2 = vmor %vm1002_vm1, %vm1003_vm15 }
 0xb79   :  { %v995_v32 = vsel %vm994_vm14, %v3011_v14, %v991_v31  ;;  %v998_v34 = vmul.f32 %v3013_v30, %v997_v45 }
 0xb7a   :  { %v1007_v39 = vmul.f32 %v995_v32, %v956_v2  ;;  %v1017_v2 = vld [vmem:[#allocation2 + $0x180] sm:$0xf] }
 0xb7b   :  { %v999_v24 = vmul.f32 0.5, %v998_v34  ;;  %v1049_v58 = vperm.slane %v1017_v2, 1  ;;  %v1033_v49 = vperm.slane %v1017_v2, 0  ;;  %v1068_v60 = vperm.slane %v1017_v2, 2 }
 0xb7c   :  { %v1011_v40 = vmul.f32 %v2941_v15, %v1007_v39  ;;  %v1087_v52 = vperm.slane %v1017_v2, 3 }
 0xb7d   :  { %v1000_v42 = vsub.f32 1.5, %v999_v24 }
 0xb7e   :  { %v1015_v43 = vadd.f32 %v2942_v8, %v1011_v40 }
 0xb7f   :  { %v1001_v37 = vmul.f32 %v3013_v30, %v1000_v42 }
 0xb80   :  { %1042 = vperm.xlu2 %2875, %v1015_v43   ;;  %1025 = vperm.xlu1 %2874, %v1015_v43  }
 0xb81   :  { %v1005_v59 = vsel %vm1004_vm2, %v3013_v30, %v1001_v37 }
 0xb82   :  { %v1008_v44 = vmul.f32 %v1005_v59, %v957_v53 }
 0xb84   :  { %v1012_v46 = vmul.f32 %v2941_v15, %v1008_v44 }
 0xb86   :  { %v1016_v61 = vadd.f32 %v2942_v8, %v1012_v46 }
 0xb88   :  { %2876 = vset.pattern.permute.xlu2 %v3155_v17  ;;  %2877 = vset.pattern.permute.xlu1 %v3156_v20 }
 0xb89   :  { %1030 = vperm.xlu0 %2872, %v1016_v61   ;;  %1061 = vperm.xlu2 %2876, %v1015_v43  }
 0xb8a   :  { %1046 = vperm.xlu1 %2877, %v1016_v61  }
 0xb91   :  { %2879 = vset.pattern.permute.xlu0 %v3155_v17  ;;  %1065 = vperm.xlu2 %2876, %v1016_v61  }
 0xb92   :  { %2880 = vset.pattern.permute.xlu1 %v3157_v3  ;;  %1057 = vperm.xlu0 %2879, %v1014_v19  }
 0xb93   :  { %1084 = vperm.xlu1 %2880, %v1016_v61  }
 0xb99   :  { %2878 = vset.pattern.permute.xlu2 %v3157_v3 }
 0xb9a   :  { %1080 = vperm.xlu2 %2878, %v1015_v43   ;;  %2892 = vset.pattern.permute.xlu0 %v3156_v20 }
 0xb9b   :  { %1076 = vperm.xlu1 %2880, %v1014_v19  }
 0xba3   :  { %2891 = vset.pattern.permute.xlu1 %v3151_v0 }
 0xbd3   :  { %v1039_v54 = vpop.permute.xlu1 %1038  ;;  %v1021_v53 = vpop.permute.xlu0 %1020 }
 0xbd4   :  { %v1050_v23 = vmul.f32 %v1049_v58, %v1039_v54  ;;  %v1034_v55 = vmul.f32 %v1033_v49, %v1021_v53 }
 0xbd6   :  { %v1053_v26 = vadd.f32 %v1050_v23, %v1034_v55 }
 0xbda   :  { %v1043_v47 = vpop.permute.xlu2 %1042 }
 0xbdb   :  { %v1051_v62 = vmul.f32 %v1049_v58, %v1043_v47 }
 0xbe3   :  { %v1062_v48 = vpop.permute.xlu2 %1061 }
 0xbe4   :  { %v1070_v4 = vmul.f32 %v1068_v60, %v1062_v48 }
 0xbeb   :  { %v1066_v56 = vpop.permute.xlu2 %1065 }
 0xbec   :  { %v1071_v8 = vmul.f32 %v1068_v60, %v1066_v56 }
 0xbf2   :  { %v1026_v51 = vpop.permute.xlu1 %1025 }
 0xbf3   :  { %v1035_v35 = vmul.f32 %v1033_v49, %v1026_v51 }
 0xbf4   :  { %v1081_v36 = vpop.permute.xlu2 %1080 }
 0xbf5   :  { %v1054_v50 = vadd.f32 %v1051_v62, %v1035_v35  ;;  %v1089_v7 = vmul.f32 %v1087_v52, %v1081_v36 }
 0xbf7   :  { %v1073_v6 = vadd.f32 %v1070_v4, %v1054_v50 }
 0xbf9   :  { %v3453_v11 = vadd.f32 %v1089_v7, %v1073_v6 }
 0xbfb   :  { %v1031_v12 = vpop.permute.xlu0 %1030  ;;  %1226 = vrot.lane.b32.xlu1 %v3453_v11, %s3161_s25 }
 0xbfc   :  { %v1047_v13 = vpop.permute.xlu1 %1046  ;;  %v1036_v15 = vmul.f32 %v1033_v49, %v1031_v12 }
 0xbfd   :  { %v1052_v16 = vmul.f32 %v1049_v58, %v1047_v13 }
 0xbff   :  { %v1055_v18 = vadd.f32 %v1052_v16, %v1036_v15 }
 0xc01   :  { %v1074_v19 = vadd.f32 %v1071_v8, %v1055_v18 }
 0xc03   :  { %1220 = vrot.lane.b32.xlu1 %v3453_v11, %s3162_s26 }
 0xc04   :  { %v1058_v22 = vpop.permute.xlu0 %1057 }
 0xc05   :  { %v1085_v9 = vpop.permute.xlu1 %1084  ;;  %v1069_v14 = vmul.f32 %v1068_v60, %v1058_v22 }
 0xc06   :  { %v1090_v10 = vmul.f32 %v1087_v52, %v1085_v9 }
 0xc07   :  { %v1072_v27 = vadd.f32 %v1069_v14, %v1053_v26 }
 0xc08   :  { %v1093_v25 = vadd.f32 %v1090_v10, %v1074_v19 }
 0xc0a   :  { %1228 = vrot.lane.b32.xlu2 %v1093_v25, %s3161_s25 }
 0xc0b   :  { %1099 = vrot.lane.b32.xlu1 %v3453_v11, %s3158_s0 }
 0xc0d   :  { %v1077_v21 = vpop.permute.xlu1 %1076 }
 0xc0e   :  { %v1088_v28 = vmul.f32 %v1087_v52, %v1077_v21  ;;  %v2881_v52 = vpack.i.bf16 %v3453_v11, %v1093_v25 }
 0xc10   :  { %v3462_v29 = vadd.f32 %v1088_v28, %v1072_v27 }
 0xc12   :  { %1218 = vrot.lane.b32.xlu0 %v3462_v29, %s3162_s26  ;;  %1224 = vrot.lane.b32.xlu2 %v3462_v29, %s3161_s25 }
 0xc1a   :  { %1101 = vrot.lane.b32.xlu0 %v1093_v25, %s3158_s0  ;;  %1222 = vrot.lane.b32.xlu2 %v1093_v25, %s3162_s26 }
 0xc22   :  { %1097 = vrot.lane.b32.xlu2 %v3462_v29, %s3158_s0 }
 0xc64   :  { %v1229_v30 = vpop.permute.xlu2 %1228 }
 0xc65   :  { %2763 = vmatpush.xpose.msk.msra.mxu1 %vm389_vm4, %v1229_v30 }
 0xc6c   :  { %v1225_v45 = vpop.permute.xlu2 %1224 }
 0xc6d   :  { %v1227_v31 = vpop.permute.xlu1 %1226 }
 0xc6e   :  { %2764 = vmatpush.xpose.msk.msra.mxu1 %vm389_vm4, %v1227_v31 }
 0xc72   :  { %2765 = vmatpush.xpose.msk.msra.mxu1 %vm389_vm4, %v1225_v45 }
 0xc74   :  { %v1223_v39 = vpop.permute.xlu2 %1222 }
 0xc75   :  { %v1221_v34 = vpop.permute.xlu1 %1220 }
 0xc7c   :  { %v1098_v42 = vpop.permute.xlu2 %1097 }
 0xc7d   :  { %v1100_v40 = vpop.permute.xlu1 %1099 }
 0xc84   :  { %v1219_v32 = vpop.permute.xlu0 %1218 }
 0xc85   :  { %2766 = vmatmul.msk.f32.vlgmr.msra.gmra.mxu1 %vm389_vm4, %v1219_v32 }
 0xc8c   :  { %v1102_v24 = vpop.permute.xlu0 %1101 }
 0xc8d   :  { %2754 = vmatpush.xpose.msk.msrb.mxu0 %vm389_vm4, %v1102_v24  ;;  %2767 = vmatmul.msk.f32.gmra.mxu1 %vm389_vm4, %v1221_v34 }
 0xc91   :  { %2755 = vmatpush.xpose.msk.msrb.mxu0 %vm389_vm4, %v1100_v40 }
 0xc95   :  { %2756 = vmatpush.xpose.msk.msrb.mxu0 %vm389_vm4, %v1098_v42  ;;  %2768 = vmatmul.msk.f32.gmra.mxu1 %vm389_vm4, %v1223_v39 }
 0xc98   :  { %2757 = vmatmul.msk.f32.vlgmr.msrb.gmra.mxu0 %vm389_vm4, %v3462_v29 }
 0xca0   :  { %2758 = vmatmul.msk.f32.gmra.mxu0 %vm389_vm4, %v3453_v11 }
 0xca8   :  { %2759 = vmatmul.msk.f32.gmra.mxu0 %vm389_vm4, %v1093_v25 }
 0xd02   :  { %v1259_v43 = vpop.f32.mrf.mxu1 }
 0xd03   :  { %v1260_v37 = vadd.f32 %v1259_v43, %v3282_v57 }
 0xd05   :  { %v1268_v59 = vsel %vm428_vm6, %v1260_v37, -inf }
 0xd06   :  { %1269 = vmax.xlane.f32.xlu0 %v1268_v59 }
 0xd0a   :  { %v1262_v44 = vpop.f32.mrf.mxu1 }
 0xd0b   :  { %v1263_v46 = vadd.f32 %v1262_v44, %v3286_v63 }
 0xd0d   :  { %v1271_v61 = vsel %vm428_vm6, %v1263_v46, -inf }
 0xd0e   :  { %1272 = vmax.xlane.f32.xlu1 %v1271_v61 }
 0xd12   :  { %v1265_v47 = vpop.f32.mrf.mxu1 }
 0xd13   :  { %v1266_v48 = vadd.f32 %v1265_v47, %v3290_v5 }
 0xd15   :  { %v1132_v54 = vpop.f32.mrf.mxu0  ;;  %v1274_v56 = vsel %vm428_vm6, %v1266_v48, -inf }
 0xd16   :  { %v1133_v2 = vadd.f32 %v1132_v54, %v3282_v57  ;;  %1275 = vmax.xlane.f32.xlu2 %v1274_v56 }
 0xd18   :  { %v1141_v58 = vsel %vm428_vm6, %v1133_v2, -inf }
 0xd19   :  { %1142 = vmax.xlane.f32.xlu0 %v1141_v58 }
 0xd1d   :  { %v1135_v49 = vpop.f32.mrf.mxu0 }
 0xd1e   :  { %v1136_v60 = vadd.f32 %v1135_v49, %v3286_v63 }
 0xd20   :  { %v1144_v51 = vsel %vm428_vm6, %v1136_v60, -inf }
 0xd21   :  { %1145 = vmax.xlane.f32.xlu1 %v1144_v51 }
 0xd25   :  { %v1138_v53 = vpop.f32.mrf.mxu0 }
 0xd26   :  { %v1139_v62 = vadd.f32 %v1138_v53, %v3290_v5 }
 0xd28   :  { %v1147_v35 = vsel %vm428_vm6, %v1139_v62, -inf }
 0xd29   :  { %1148 = vmax.xlane.f32.xlu0 %v1147_v35 }
 0xd3a   :  { %2882 = vrot.lane.b32.xlu1 %v2881_v52, %s3163_s27 }
 0xd3d   :  { %1301 = vrot.lane.b32.xlu0 %v3462_v29, %s3163_s27 }
 0xd42   :  { %2887 = vrot.lane.b32.xlu1 %v2881_v52, %s3160_s24 }
 0xd79   :  { %v1270_v36 = vpop.xlane.xlu0 %1269 }
 0xd7a   :  { %v1277_v4 = vsub.f32 %v1260_v37, %v1270_v36 }
 0xd7c   :  { %v1280_v50 = vmul.f32 1.442695, %v1277_v4 }
 0xd7e   :  { %3014 = vpow2.f32 %v1280_v50 }
 0xd81   :  { %v1273_v12 = vpop.xlane.xlu1 %1272 }
 0xd82   :  { %v1278_v16 = vsub.f32 %v1263_v46, %v1273_v12  ;;  %v1362_v12 = vld [vmem:[#allocation2 + $0x198] sm:$0xff] }
 0xd84   :  { %v3015_v6 = vpop.eup %3014  ;;  %v1282_v18 = vmul.f32 1.442695, %v1278_v16 }
 0xd85   :  { %v1286_v7 = vsel %vm428_vm6, %v3015_v6, 0.0 }
 0xd86   :  { %1287 = vadd.xlane.f32.xlu2 %v1286_v7  ;;  %v1363_v7 = vld [vmem:[#allocation2 + $0x1a0] sm:$0xff] }
 0xd87   :  { %1385 = vmatpush.msra.mxu0 %v1363_v7 }
 0xd89   :  { %v1276_v8 = vpop.xlane.xlu2 %1275  ;;  %1386 = vmatpush.msra.mxu0 %v1362_v12 }
 0xd8a   :  { %v1279_v22 = vsub.f32 %v1266_v48, %v1276_v8 }
 0xd8c   :  { %v1143_v13 = vpop.xlane.xlu0 %1142  ;;  %v1284_v25 = vmul.f32 1.442695, %v1279_v22 }
 0xd8d   :  { %v1150_v15 = vsub.f32 %v1133_v2, %v1143_v13  ;;  %v1361_v13 = vld [vmem:[#allocation2 + $0x190] sm:$0xff] }
 0xd8e   :  { %1387 = vmatpush.msra.mxu0 %v1361_v13 }
 0xd8f   :  { %v1153_v11 = vmul.f32 1.442695, %v1150_v15 }
 0xd91   :  { %3016 = vpow2.f32 %v1153_v11  ;;  %v1360_v11 = vld [vmem:[#allocation2 + $0x188] sm:$0xff] }
 0xd92   :  { %3018 = vpow2.f32 %v1282_v18  ;;  %1388 = vmatpush.msra.mxu0 %v1360_v11 }
 0xd94   :  { %v1146_v9 = vpop.xlane.xlu1 %1145 }
 0xd95   :  { %v1151_v19 = vsub.f32 %v1136_v60, %v1146_v9 }
 0xd97   :  { %v3017_v10 = vpop.eup %3016  ;;  %v1155_v23 = vmul.f32 1.442695, %v1151_v19 }
 0xd98   :  { %v1159_v55 = vsel %vm428_vm6, %v3017_v10, 0.0  ;;  %v3019_v26 = vpop.eup %3018 }
 0xd99   :  { %3020 = vpow2.f32 %v1155_v23  ;;  %1160 = vadd.xlane.f32.xlu2 %v1159_v55  ;;  %v1289_v31 = vsel %vm428_vm6, %v3019_v26, 0.0 }
 0xd9a   :  { %3022 = vpow2.f32 %v1284_v25 }
 0xd9c   :  { %v1149_v14 = vpop.xlane.xlu0 %1148 }
 0xd9d   :  { %v1152_v21 = vsub.f32 %v1139_v62, %v1149_v14  ;;  %v2943_v14 = vld [vmem:[#allocation2 + $0x1a8] ss:$0 sm:$0xff] }
 0xd9f   :  { %v3021_v27 = vpop.eup %3020  ;;  %v1157_v28 = vmul.f32 1.442695, %v1152_v21 }
 0xda0   :  { %v1162_v30 = vsel %vm428_vm6, %v3021_v27, 0.0  ;;  %v3023_v45 = vpop.eup %3022 }
 0xda1   :  { %3024 = vpow2.f32 %v1157_v28  ;;  %1163 = vadd.xlane.f32.xlu0 %v1162_v30  ;;  %1290 = vadd.xlane.f32.xlu2 %v1289_v31  ;;  %v1292_v39 = vsel %vm428_vm6, %v3023_v45, 0.0 }
 0xda7   :  { %v3025_v32 = vpop.eup %3024 }
 0xda8   :  { %v1165_v34 = vsel %vm428_vm6, %v3025_v32, 0.0 }
 0xda9   :  { %1166 = vadd.xlane.f32.xlu1 %v1165_v34  ;;  %1293 = vadd.xlane.f32.xlu2 %v1292_v39 }
 0xdac   :  { %v2883_v24 = vpop.permute.xlu1 %2882 }
 0xdad   :  { %v2884_v40 = vunpack.i.l.bf16 %v2883_v24  ;;  %v2885_v42 = vunpack.i.h.bf16 %v2883_v24 }
 0xdaf   :  { %1332 = vmatpush.msrb.mxu3 %v2884_v40  ;;  %v1302_v43 = vpop.permute.xlu0 %1301 }
 0xdb1   :  { %1333 = vmatpush.msrb.mxu3 %v2885_v42 }
 0xdb3   :  { %1334 = vmatpush.msrb.mxu3 %v1302_v43 }
 0xdb4   :  { %v2888_v37 = vpop.permute.xlu1 %2887 }
 0xdb5   :  { %v2889_v59 = vunpack.i.l.bf16 %v2888_v37  ;;  %v2890_v44 = vunpack.i.h.bf16 %v2888_v37 }
 0xdb7   :  { %1205 = vmatpush.msra.mxu2 %v2889_v59 }
 0xdb9   :  { %1206 = vmatpush.msra.mxu2 %v2890_v44 }
 0xdc1   :  { %1174 = vrot.lane.b32.xlu2 %v3462_v29, %s3160_s24 }
 0xdf9   :  { %v1288_v46 = vpop.xlane.xlu2 %1287 }
 0xdfa   :  { %3026 = vrcp.f32 %v1288_v46 }
 0xe00   :  { %v3027_v61 = vpop.eup %3026 }
 0xe01   :  { %v1298_v47 = vmul.f32 %v3027_v61, %v3015_v6 }
 0xe03   :  { %2769 = vmatmul.msk.f32.vlgmr.msrb.gmra.mxu3 %vm428_vm6, %v1298_v47 }
 0xe0c   :  { %v1161_v48 = vpop.xlane.xlu2 %1160 }
 0xe14   :  { %v1291_v54 = vpop.xlane.xlu2 %1290  ;;  %v1164_v49 = vpop.xlane.xlu0 %1163 }
 0xe15   :  { %3028 = vrcp.f32 %v1291_v54 }
 0xe16   :  { %3030 = vrcp.f32 %v1161_v48 }
 0xe1b   :  { %v3029_v56 = vpop.eup %3028 }
 0xe1c   :  { %v1294_v2 = vpop.xlane.xlu2 %1293  ;;  %v1299_v58 = vmul.f32 %v3029_v56, %v3019_v26  ;;  %v3031_v60 = vpop.eup %3030 }
 0xe1d   :  { %3032 = vrcp.f32 %v1294_v2  ;;  %v1171_v51 = vmul.f32 %v3031_v60, %v3017_v10  ;;  %v1167_v35 = vpop.xlane.xlu1 %1166 }
 0xe1e   :  { %2770 = vmatmul.msk.f32.gmra.mxu3 %vm428_vm6, %v1299_v58  ;;  %3034 = vrcp.f32 %v1164_v49 }
 0xe1f   :  { %3036 = vrcp.f32 %v1167_v35 }
 0xe23   :  { %v3033_v29 = vpop.eup %3032 }
 0xe24   :  { %v1175_v53 = vpop.permute.xlu2 %1174  ;;  %v1300_v62 = vmul.f32 %v3033_v29, %v3023_v45  ;;  %v3035_v52 = vpop.eup %3034 }
 0xe25   :  { %1207 = vmatpush.msra.mxu2 %v1175_v53  ;;  %v1172_v36 = vmul.f32 %v3035_v52, %v3021_v27  ;;  %v3037_v4 = vpop.eup %3036 }
 0xe26   :  { %2760 = vmatmul.msk.f32.vlgmr.msra.gmra.mxu2 %vm428_vm6, %v1171_v51  ;;  %2771 = vmatmul.msk.f32.gmra.mxu3 %vm428_vm6, %v1300_v62  ;;  %v1173_v50 = vmul.f32 %v3037_v4, %v3025_v32 }
 0xe2e   :  { %2761 = vmatmul.msk.f32.gmra.mxu2 %vm428_vm6, %v1172_v36  ;;  %v2944_v36 = vld [vmem:[#allocation2 + $0x1b0] ss:$0 sm:$0xff] }
 0xe36   :  { %2762 = vmatmul.msk.f32.gmra.mxu2 %vm428_vm6, %v1173_v50 }
 0xe86   :  { %v1336_v6 = vpop.f32.mrf.mxu3 }
 0xe87   :  { %1348 = vrot.lane.b32.xlu2 %v1336_v6, %s3164_s28  ;;  %v2945_v6 = vld [vmem:[#allocation2 + $0x1b8] ss:$0 sm:$0xff] }
 0xea1   :  { %v1339_v15 = vpop.f32.mrf.mxu3 }
 0xea2   :  { %1350 = vrot.lane.b32.xlu2 %v1339_v15, %s3164_s28 }
 0xea9   :  { %v1342_v16 = vpop.f32.mrf.mxu3  ;;  %v1209_v18 = vpop.f32.mrf.mxu2 }
 0xeaa   :  { %1352 = vrot.lane.b32.xlu2 %v1342_v16, %s3164_s28 }
 0xeb1   :  { %v1212_v19 = vpop.f32.mrf.mxu2 }
 0xeb9   :  { %v1215_v23 = vpop.f32.mrf.mxu2 }
 0xee1   :  { %v1349_v8 = vpop.permute.xlu2 %1348 }
 0xee2   :  { %v1357_v9 = vsel %vm389_vm4, %v1209_v18, %v1349_v8 }
 0xee3   :  { %2772 = vmatmul.msk.f32.vlgmr.msra.gmra.mxu0 %vm652_vm10, %v1357_v9 }
 0xefc   :  { %v1351_v10 = vpop.permute.xlu2 %1350 }
 0xefd   :  { %v1358_v22 = vsel %vm389_vm4, %v1212_v19, %v1351_v10 }
 0xefe   :  { %2773 = vmatmul.msk.f32.gmra.mxu0 %vm652_vm10, %v1358_v22 }
 0xf04   :  { %v1353_v55 = vpop.permute.xlu2 %1352 }
 0xf05   :  { %v1359_v25 = vsel %vm389_vm4, %v1215_v23, %v1353_v55 }
 0xf06   :  { %2774 = vmatmul.msk.f32.gmra.mxu0 %vm652_vm10, %v1359_v25 }
 0xf60   :  { %v1390_v26 = vpop.f32.mrf.mxu0 }
 0xf61   :  { %v1399_v21 = vadd.f32 %v1390_v26, %v3419_v38 }
 0xf63   :  { %v3527_v27 = vadd.f32 %v2943_v14, %v1399_v21 }
 0xf65   :  { %v1409_v28 = vsel %vm221_vm8, %v3527_v27, 0.0 }
 0xf66   :  { %1410 = vadd.xlane.f32.xlu0 %v1409_v28 }
 0xf7b   :  { %v1393_v30 = vpop.f32.mrf.mxu0 }
 0xf7c   :  { %v1400_v31 = vadd.f32 %v1393_v30, %v3424_v41 }
 0xf7e   :  { %v3532_v45 = vadd.f32 %v2943_v14, %v1400_v31 }
 0xf80   :  { %v1412_v32 = vsel %vm221_vm8, %v3532_v45, 0.0 }
 0xf81   :  { %1413 = vadd.xlane.f32.xlu1 %v1412_v32 }
 0xf83   :  { %v1396_v34 = vpop.f32.mrf.mxu0 }
 0xf84   :  { %v1401_v39 = vadd.f32 %v1396_v34, %v3429_v33 }
 0xf86   :  { %v3537_v24 = vadd.f32 %v2943_v14, %v1401_v39 }
 0xf88   :  { %v1415_v38 = vsel %vm221_vm8, %v3537_v24, 0.0 }
 0xf89   :  { %1416 = vadd.xlane.f32.xlu2 %v1415_v38 }
 0xfd9   :  { %v1411_v40 = vpop.xlane.xlu0 %1410 }
 0xfda   :  { %v1418_v42 = vmul.f32 %v1411_v40, %v3234_v1 }
 0xfdc   :  { %v1421_v41 = vsub.f32 %v3527_v27, %v1418_v42 }
 0xfde   :  { %v1424_v43 = vmul.f32 %v1421_v41, %v1421_v41 }
 0xfe0   :  { %v1427_v37 = vsel %vm221_vm8, %v1424_v43, 0.0 }
 0xfe1   :  { %1428 = vadd.xlane.f32.xlu0 %v1427_v37  ;;  %v1483_v37 = vld [vmem:[#allocation2 + $0x1c0] sm:$0xf] }
 0xff4   :  { %v1414_v59 = vpop.xlane.xlu1 %1413 }
 0xff5   :  { %v1419_v44 = vmul.f32 %v1414_v59, %v3234_v1  ;;  %v1499_v59 = vperm.slane %v1483_v37, 0 }
 0xff7   :  { %v1422_v33 = vsub.f32 %v3532_v45, %v1419_v44  ;;  %v1515_v44 = vperm.slane %v1483_v37, 1 }
 0xff9   :  { %v1425_v46 = vmul.f32 %v1422_v33, %v1422_v33 }
 0xffb   :  { %v1430_v61 = vsel %vm221_vm8, %v1425_v46, 0.0 }
 0xffc   :  { %1431 = vadd.xlane.f32.xlu1 %v1430_v61  ;;  %v1417_v47 = vpop.xlane.xlu2 %1416 }
 0xffd   :  { %v1420_v48 = vmul.f32 %v1417_v47, %v3234_v1  ;;  %v1534_v47 = vperm.slane %v1483_v37, 2 }
 0xfff   :  { %v3549_v54 = vsub.f32 %v3537_v24, %v1420_v48  ;;  %v1553_v48 = vperm.slane %v1483_v37, 3 }
0x1001   :  { %v1426_v56 = vmul.f32 %v3549_v54, %v3549_v54 }
0x1003   :  { %v1433_v2 = vsel %vm221_vm8, %v1426_v56, 0.0 }
0x1004   :  { %1434 = vadd.xlane.f32.xlu0 %v1433_v2 }
0x1054   :  { %v1429_v58 = vpop.xlane.xlu0 %1428 }
0x1055   :  { %v1436_v49 = vmul.f32 %v1429_v58, %v3234_v1 }
0x1057   :  { %v1439_v60 = vadd.f32 1e-05, %v1436_v49 }
0x1059   :  { %3038 = vrsqrt.f32 %v1439_v60  ;;  %vm1448_vm5 = vweird.f32 %v1439_v60 }
0x105f   :  { %v3039_v29 = vpop.eup %3038 }
0x1060   :  { %v1443_v51 = vmul.f32 %v3039_v29, %v1439_v60  ;;  %vm1449_vm3 = vweird.f32 %v3039_v29  ;;  %v2946_v60 = vld [vmem:[#allocation2 + $0x1c8] ss:$0 sm:$0xff] }
0x1061   :  { %vm1450_vm7 = vmor %vm1448_vm5, %vm1449_vm3 }
0x1062   :  { %v1444_v53 = vmul.f32 %v3039_v29, %v1443_v51 }
0x1064   :  { %v1445_v62 = vmul.f32 0.5, %v1444_v53 }
0x1066   :  { %v1446_v35 = vsub.f32 1.5, %v1445_v62 }
0x1068   :  { %v1447_v52 = vmul.f32 %v3039_v29, %v1446_v35 }
0x106a   :  { %v1451_v4 = vsel %vm1450_vm7, %v3039_v29, %v1447_v52 }
0x106b   :  { %v1472_v50 = vmul.f32 %v1451_v4, %v1421_v41 }
0x106d   :  { %v1476_v7 = vmul.f32 %v2944_v36, %v1472_v50 }
0x106f   :  { %v1480_v12 = vadd.f32 %v2945_v6, %v1476_v7  ;;  %v1432_v13 = vpop.xlane.xlu1 %1431 }
0x1070   :  { %v1437_v15 = vmul.f32 %v1432_v13, %v3234_v1 }
0x1071   :  { %1486 = vperm.xlu1 %2891, %v1480_v12   ;;  %1542 = vperm.xlu2 %2878, %v1480_v12  }
0x1072   :  { %1504 = vperm.xlu0 %2892, %v1480_v12   ;;  %v1440_v16 = vadd.f32 1e-05, %v1437_v15 }
0x1074   :  { %3040 = vrsqrt.f32 %v1440_v16  ;;  %vm1458_vm11 = vweird.f32 %v1440_v16 }
0x1077   :  { %v1435_v11 = vpop.xlane.xlu0 %1434 }
0x1078   :  { %v1438_v18 = vmul.f32 %v1435_v11, %v3234_v1 }
0x1079   :  { %2893 = vset.pattern.permute.xlu1 %v3155_v17  ;;  %2898 = vset.pattern.permute.xlu2 %v3151_v0 }
0x107a   :  { %1523 = vperm.xlu1 %2893, %v1480_v12   ;;  %2896 = vset.pattern.permute.xlu0 %v3155_v17  ;;  %v3041_v8 = vpop.eup %3040  ;;  %v1441_v9 = vadd.f32 1e-05, %v1438_v18 }
0x107b   :  { %v1453_v19 = vmul.f32 %v3041_v8, %v1440_v16  ;;  %vm1459_vm9 = vweird.f32 %v3041_v8 }
0x107c   :  { %3042 = vrsqrt.f32 %v1441_v9  ;;  %vm1460_vm12 = vmor %vm1458_vm11, %vm1459_vm9  ;;  %vm1468_vm14 = vweird.f32 %v1441_v9 }
0x107d   :  { %v1454_v10 = vmul.f32 %v3041_v8, %v1453_v19 }
0x107f   :  { %v1455_v22 = vmul.f32 0.5, %v1454_v10 }
0x1081   :  { %v1456_v23 = vsub.f32 1.5, %v1455_v22 }
0x1082   :  { %2894 = vset.pattern.permute.xlu1 %v3151_v0  ;;  %v3043_v55 = vpop.eup %3042 }
0x1083   :  { %v1457_v25 = vmul.f32 %v3041_v8, %v1456_v23  ;;  %v1463_v14 = vmul.f32 %v3043_v55, %v1441_v9  ;;  %vm1469_vm13 = vweird.f32 %v3043_v55 }
0x1084   :  { %vm1470_vm15 = vmor %vm1468_vm14, %vm1469_vm13 }
0x1085   :  { %v1461_v26 = vsel %vm1460_vm12, %v3041_v8, %v1457_v25  ;;  %v1464_v21 = vmul.f32 %v3043_v55, %v1463_v14 }
0x1086   :  { %v1473_v28 = vmul.f32 %v1461_v26, %v1422_v33 }
0x1087   :  { %v1465_v30 = vmul.f32 0.5, %v1464_v21 }
0x1088   :  { %v1477_v31 = vmul.f32 %v2944_v36, %v1473_v28 }
0x1089   :  { %v1466_v32 = vsub.f32 1.5, %v1465_v30  ;;  %v1608_v30 = vld [vmem:[#allocation2 + $0x1d8] sm:$0xff] }
0x108a   :  { %v1481_v34 = vadd.f32 %v2945_v6, %v1477_v31  ;;  %1632 = vmatpush.msrb.mxu2 %v1608_v30 }
0x108b   :  { %v1467_v39 = vmul.f32 %v3043_v55, %v1466_v32 }
0x108c   :  { %1491 = vperm.xlu1 %2894, %v1481_v34   ;;  %1527 = vperm.xlu0 %2896, %v1481_v34  }
0x108d   :  { %v1471_v38 = vsel %vm1470_vm15, %v3043_v55, %v1467_v39 }
0x108e   :  { %v1474_v40 = vmul.f32 %v1471_v38, %v3549_v54 }
0x1090   :  { %v1478_v42 = vmul.f32 %v2944_v36, %v1474_v40 }
0x1092   :  { %v1482_v41 = vadd.f32 %v2945_v6, %v1478_v42 }
0x1094   :  { %2895 = vset.pattern.permute.xlu1 %v3156_v20  ;;  %1531 = vperm.xlu0 %2896, %v1482_v41  }
0x1095   :  { %1496 = vperm.xlu2 %2898, %v1482_v41   ;;  %1508 = vperm.xlu1 %2895, %v1481_v34  }
0x109c   :  { %2902 = vset.pattern.permute.xlu0 %v3151_v0 }
0x109d   :  { %2900 = vset.pattern.permute.xlu2 %v3157_v3  ;;  %2897 = vset.pattern.permute.xlu1 %v3157_v3 }
0x109e   :  { %1550 = vperm.xlu2 %2900, %v1482_v41   ;;  %1546 = vperm.xlu1 %2897, %v1481_v34  }
0x10a6   :  { %2899 = vset.pattern.permute.xlu1 %v3156_v20  ;;  %2903 = vset.pattern.permute.xlu2 %v3156_v20 }
0x10a7   :  { %1512 = vperm.xlu1 %2899, %v1482_v41  }
0x10af   :  { %2901 = vset.pattern.permute.xlu1 %v3151_v0 }
0x10cb   :  { %v1543_v54 = vpop.permute.xlu2 %1542 }
0x10cc   :  { %v1554_v49 = vmul.f32 %v1553_v48, %v1543_v54 }
0x10e3   :  { %v1487_v43 = vpop.permute.xlu1 %1486 }
0x10e4   :  { %v1505_v33 = vpop.permute.xlu0 %1504  ;;  %v1500_v46 = vmul.f32 %v1499_v59, %v1487_v43 }
0x10e5   :  { %v1516_v61 = vmul.f32 %v1515_v44, %v1505_v33 }
0x10e7   :  { %v1519_v2 = vadd.f32 %v1516_v61, %v1500_v46 }
0x10ec   :  { %v1524_v56 = vpop.permute.xlu1 %1523 }
0x10ed   :  { %v1535_v58 = vmul.f32 %v1534_v47, %v1524_v56 }
0x10ef   :  { %v1538_v29 = vadd.f32 %v1535_v58, %v1519_v2  ;;  %v1497_v10 = vpop.permute.xlu2 %1496 }
0x10f0   :  { %v1502_v31 = vmul.f32 %v1499_v59, %v1497_v10 }
0x10f1   :  { %v1557_v51 = vadd.f32 %v1554_v49, %v1538_v29 }
0x10f3   :  { %v3569_v53 = vadd.f32 %v2946_v60, %v1557_v51 }
0x10f5   :  { %v1568_v62 = vmul.f32 0.044715, %v3569_v53  ;;  %v1565_v7 = vmul.f32 0.5, %v3569_v53 }
0x10f7   :  { %v1571_v35 = vmul.f32 %v1568_v62, %v3569_v53 }
0x10f8   :  { %v1551_v34 = vpop.permute.xlu2 %1550 }
0x10f9   :  { %v1574_v52 = vmul.f32 %v1571_v35, %v3569_v53  ;;  %v1556_v41 = vmul.f32 %v1553_v48, %v1551_v34  ;;  %v1607_v35 = vld [vmem:[#allocation2 + $0x1d0] sm:$0xff] }
0x10fa   :  { %1633 = vmatpush.msrb.mxu2 %v1607_v35 }
0x10fb   :  { %v1577_v36 = vadd.f32 %v1574_v52, %v3569_v53 }
0x10fd   :  { %v1580_v4 = vmul.f32 0.7978846, %v1577_v36 }
0x10fe   :  { %v1492_v50 = vpop.permute.xlu1 %1491  ;;  %v1528_v18 = vpop.permute.xlu0 %1527 }
0x10ff   :  { %3044 = vtanh.f32 %v1580_v4  ;;  %v1501_v11 = vmul.f32 %v1499_v59, %v1492_v50  ;;  %v1536_v9 = vmul.f32 %v1534_v47, %v1528_v18 }
0x1105   :  { %v3045_v6 = vpop.eup %3044 }
0x1106   :  { %v1586_v12 = vadd.f32 1.0, %v3045_v6  ;;  %v1532_v26 = vpop.permute.xlu0 %1531 }
0x1107   :  { %v1509_v13 = vpop.permute.xlu1 %1508  ;;  %v1537_v38 = vmul.f32 %v1534_v47, %v1532_v26 }
0x1108   :  { %v1589_v15 = vmul.f32 %v1586_v12, %v1565_v7  ;;  %v1517_v16 = vmul.f32 %v1515_v44, %v1509_v13  ;;  %v2947_v7 = vld [vmem:[#allocation2 + $0x1e0] ss:$0 sm:$0xff] }
0x110a   :  { %1595 = vrot.lane.b32.xlu1 %v1589_v15, %s3162_s26  ;;  %v1520_v8 = vadd.f32 %v1517_v16, %v1501_v11 }
0x110c   :  { %v1539_v22 = vadd.f32 %v1536_v9, %v1520_v8 }
0x1110   :  { %v1547_v19 = vpop.permute.xlu1 %1546 }
0x1111   :  { %v1555_v23 = vmul.f32 %v1553_v48, %v1547_v19 }
0x1113   :  { %v1558_v55 = vadd.f32 %v1555_v23, %v1539_v22 }
0x1115   :  { %v1563_v25 = vadd.f32 %v2946_v60, %v1558_v55 }
0x1117   :  { %v1569_v14 = vmul.f32 0.044715, %v1563_v25  ;;  %v1566_v2 = vmul.f32 0.5, %v1563_v25 }
0x1119   :  { %v1513_v21 = vpop.permute.xlu1 %1512  ;;  %v1572_v28 = vmul.f32 %v1569_v14, %v1563_v25 }
0x111a   :  { %v1518_v32 = vmul.f32 %v1515_v44, %v1513_v21 }
0x111b   :  { %v1575_v39 = vmul.f32 %v1572_v28, %v1563_v25 }
0x111c   :  { %v1521_v40 = vadd.f32 %v1518_v32, %v1502_v31 }
0x111d   :  { %v1578_v42 = vadd.f32 %v1575_v39, %v1563_v25 }
0x111e   :  { %v1540_v43 = vadd.f32 %v1537_v38, %v1521_v40 }
0x111f   :  { %v1581_v37 = vmul.f32 0.7978846, %v1578_v42 }
0x1120   :  { %v1559_v33 = vadd.f32 %v1556_v41, %v1540_v43 }
0x1121   :  { %3046 = vtanh.f32 %v1581_v37 }
0x1122   :  { %v1564_v46 = vadd.f32 %v2946_v60, %v1559_v33 }
0x1124   :  { %v1570_v61 = vmul.f32 0.044715, %v1564_v46  ;;  %v1567_v51 = vmul.f32 0.5, %v1564_v46 }
0x1126   :  { %v1573_v54 = vmul.f32 %v1570_v61, %v1564_v46 }
0x1127   :  { %v3047_v56 = vpop.eup %3046 }
0x1128   :  { %v1587_v58 = vadd.f32 1.0, %v3047_v56  ;;  %v1576_v49 = vmul.f32 %v1573_v54, %v1564_v46  ;;  %v2948_v54 = vld [vmem:[#allocation2 + $0x1e8] ss:$0 sm:$0xff] }
0x112a   :  { %v1590_v59 = vmul.f32 %v1587_v58, %v1566_v2  ;;  %v1579_v44 = vadd.f32 %v1576_v49, %v1564_v46  ;;  %v2949_v58 = vld [vmem:[#allocation2 + $0x1f0] ss:$0 sm:$0xff] }
0x112c   :  { %1597 = vrot.lane.b32.xlu0 %v1590_v59, %s3162_s26  ;;  %v1582_v29 = vmul.f32 0.7978846, %v1579_v44 }
0x112e   :  { %3048 = vtanh.f32 %v1582_v29 }
0x1134   :  { %v3049_v47 = vpop.eup %3048 }
0x1135   :  { %v1588_v48 = vadd.f32 1.0, %v3049_v47 }
0x1137   :  { %v1591_v62 = vmul.f32 %v1588_v48, %v1567_v51 }
0x1139   :  { %1599 = vrot.lane.b32.xlu2 %v1591_v62, %s3162_s26 }
0x117c   :  { %v1596_v60 = vpop.permute.xlu1 %1595 }
0x117d   :  { %v1604_v52 = vmul.f32 %v1596_v60, %v3569_v53 }
0x117f   :  { %2775 = vmatmul.msk.f32.vlgmr.msrb.gmra.mxu2 %vm389_vm4, %v1604_v52 }
0x1193   :  { %v1600_v50 = vpop.permute.xlu2 %1599 }
0x1194   :  { %v1606_v6 = vmul.f32 %v1600_v50, %v1564_v46 }
0x119e   :  { %v1598_v36 = vpop.permute.xlu0 %1597 }
0x119f   :  { %v1605_v4 = vmul.f32 %v1598_v36, %v1563_v25 }
0x11a1   :  { %2776 = vmatmul.msk.f32.gmra.mxu2 %vm389_vm4, %v1605_v4 }
0x11a9   :  { %2777 = vmatmul.msk.f32.gmra.mxu2 %vm389_vm4, %v1606_v6 }
0x1202   :  { %v1635_v12 = vpop.f32.mrf.mxu2 }
0x1203   :  { %v1644_v13 = vadd.f32 %v1635_v12, %v3527_v27 }
0x1205   :  { %v3584_v15 = vadd.f32 %v2947_v7, %v1644_v13 }
0x1207   :  { %v1654_v16 = vsel %vm221_vm8, %v3584_v15, 0.0 }
0x1208   :  { %1655 = vadd.xlane.f32.xlu2 %v1654_v16 }
0x1224   :  { %v1638_v53 = vpop.f32.mrf.mxu2 }
0x1225   :  { %v1645_v11 = vadd.f32 %v1638_v53, %v3532_v45 }
0x1227   :  { %v3589_v18 = vadd.f32 %v2947_v7, %v1645_v11 }
0x1229   :  { %v1657_v8 = vsel %vm221_vm8, %v3589_v18, 0.0 }
0x122a   :  { %1658 = vadd.xlane.f32.xlu0 %v1657_v8 }
0x122c   :  { %v1641_v9 = vpop.f32.mrf.mxu2 }
0x122d   :  { %v1646_v19 = vadd.f32 %v1641_v9, %v3537_v24 }
0x122f   :  { %v3594_v10 = vadd.f32 %v2947_v7, %v1646_v19 }
0x1231   :  { %v1660_v27 = vsel %vm221_vm8, %v3594_v10, 0.0 }
0x1232   :  { %1661 = vadd.xlane.f32.xlu1 %v1660_v27 }
0x127b   :  { %v1656_v22 = vpop.xlane.xlu2 %1655 }
0x127c   :  { %v1663_v23 = vmul.f32 %v1656_v22, %v3234_v1 }
0x127e   :  { %v1666_v45 = vsub.f32 %v3584_v15, %v1663_v23 }
0x1280   :  { %v1669_v55 = vmul.f32 %v1666_v45, %v1666_v45 }
0x1282   :  { %v1672_v25 = vsel %vm221_vm8, %v1669_v55, 0.0 }
0x1283   :  { %1673 = vadd.xlane.f32.xlu0 %v1672_v25 }
0x129d   :  { %v1659_v14 = vpop.xlane.xlu0 %1658 }
0x129e   :  { %v1664_v26 = vmul.f32 %v1659_v14, %v3234_v1 }
0x12a0   :  { %v1667_v24 = vsub.f32 %v3589_v18, %v1664_v26  ;;  %v1728_v26 = vld [vmem:[#allocation2 + $0x1f8] sm:$0xf] }
0x12a2   :  { %v1670_v21 = vmul.f32 %v1667_v24, %v1667_v24 }
0x12a4   :  { %v1675_v28 = vsel %vm221_vm8, %v1670_v21, 0.0  ;;  %v1744_v21 = vperm.slane %v1728_v26, 0 }
0x12a5   :  { %1676 = vadd.xlane.f32.xlu2 %v1675_v28  ;;  %v1662_v30 = vpop.xlane.xlu1 %1661  ;;  %v1779_v28 = vperm.slane %v1728_v26, 2 }
0x12a6   :  { %v1665_v31 = vmul.f32 %v1662_v30, %v3234_v1 }
0x12a8   :  { %v1668_v32 = vsub.f32 %v3594_v10, %v1665_v31 }
0x12aa   :  { %v1671_v34 = vmul.f32 %v1668_v32, %v1668_v32 }
0x12ac   :  { %v1678_v39 = vsel %vm221_vm8, %v1671_v34, 0.0 }
0x12ad   :  { %1679 = vadd.xlane.f32.xlu1 %v1678_v39 }
0x12f6   :  { %v1674_v38 = vpop.xlane.xlu0 %1673 }
0x12f7   :  { %v1681_v40 = vmul.f32 %v1674_v38, %v3234_v1 }
0x12f9   :  { %v1684_v42 = vadd.f32 1e-05, %v1681_v40 }
0x12fb   :  { %3050 = vrsqrt.f32 %v1684_v42  ;;  %vm1693_vm2 = vweird.f32 %v1684_v42 }
0x1301   :  { %v3051_v41 = vpop.eup %3050 }
0x1302   :  { %v1688_v43 = vmul.f32 %v3051_v41, %v1684_v42  ;;  %vm1694_vm1 = vweird.f32 %v3051_v41 }
0x1303   :  { %vm1695_vm3 = vmor %vm1693_vm2, %vm1694_vm1 }
0x1304   :  { %v1689_v37 = vmul.f32 %v3051_v41, %v1688_v43 }
0x1306   :  { %v1690_v33 = vmul.f32 0.5, %v1689_v37 }
0x1308   :  { %v1691_v46 = vsub.f32 1.5, %v1690_v33 }
0x130a   :  { %v1692_v61 = vmul.f32 %v3051_v41, %v1691_v46 }
0x130c   :  { %v1696_v56 = vsel %vm1695_vm3, %v3051_v41, %v1692_v61 }
0x130d   :  { %v1717_v2 = vmul.f32 %v1696_v56, %v1666_v45 }
0x130f   :  { %v1721_v49 = vmul.f32 %v2948_v54, %v1717_v2 }
0x1311   :  { %v1725_v59 = vadd.f32 %v2949_v58, %v1721_v49 }
0x1313   :  { %1731 = vperm.xlu1 %2901, %v1725_v59  }
0x1318   :  { %v1677_v44 = vpop.xlane.xlu2 %1676 }
0x1319   :  { %v1682_v29 = vmul.f32 %v1677_v44, %v3234_v1 }
0x131b   :  { %v1685_v47 = vadd.f32 1e-05, %v1682_v29 }
0x131d   :  { %3052 = vrsqrt.f32 %v1685_v47  ;;  %vm1703_vm7 = vweird.f32 %v1685_v47 }
0x1320   :  { %v1680_v51 = vpop.xlane.xlu1 %1679 }
0x1321   :  { %v1683_v48 = vmul.f32 %v1680_v51, %v3234_v1 }
0x1323   :  { %v3053_v62 = vpop.eup %3052  ;;  %v1686_v35 = vadd.f32 1e-05, %v1683_v48 }
0x1324   :  { %v1698_v60 = vmul.f32 %v3053_v62, %v1685_v47  ;;  %vm1704_vm5 = vweird.f32 %v3053_v62 }
0x1325   :  { %3054 = vrsqrt.f32 %v1686_v35  ;;  %vm1705_vm9 = vmor %vm1703_vm7, %vm1704_vm5  ;;  %vm1713_vm12 = vweird.f32 %v1686_v35 }
0x1326   :  { %v1699_v52 = vmul.f32 %v3053_v62, %v1698_v60 }
0x1328   :  { %v1700_v36 = vmul.f32 0.5, %v1699_v52 }
0x132a   :  { %v1701_v4 = vsub.f32 1.5, %v1700_v36 }
0x132b   :  { %v3055_v50 = vpop.eup %3054 }
0x132c   :  { %v1702_v6 = vmul.f32 %v3053_v62, %v1701_v4  ;;  %v1708_v7 = vmul.f32 %v3055_v50, %v1686_v35  ;;  %vm1714_vm11 = vweird.f32 %v3055_v50 }
0x132d   :  { %vm1715_vm13 = vmor %vm1713_vm12, %vm1714_vm11  ;;  %vm2366_vm12 = vcmask 541696  }
0x132e   :  { %v1706_v12 = vsel %vm1705_vm9, %v3053_v62, %v1702_v6  ;;  %v1709_v13 = vmul.f32 %v3055_v50, %v1708_v7 }
0x132f   :  { %v1718_v16 = vmul.f32 %v1706_v12, %v1667_v24  ;;  %v1760_v24 = vperm.slane %v1728_v26, 1 }
0x1330   :  { %v1710_v53 = vmul.f32 0.5, %v1709_v13 }
0x1331   :  { %v1722_v11 = vmul.f32 %v2948_v54, %v1718_v16 }
0x1332   :  { %v1711_v8 = vsub.f32 1.5, %v1710_v53 }
0x1333   :  { %v1726_v9 = vadd.f32 %v2949_v58, %v1722_v11 }
0x1334   :  { %v1712_v19 = vmul.f32 %v3055_v50, %v1711_v8 }
0x1335   :  { %1753 = vperm.xlu2 %2903, %v1726_v9   ;;  %1736 = vperm.xlu0 %2902, %v1726_v9  }
0x1336   :  { %v1716_v27 = vsel %vm1715_vm13, %v3055_v50, %v1712_v19 }
0x1337   :  { %v1719_v22 = vmul.f32 %v1716_v27, %v1668_v32  ;;  %v1798_v32 = vperm.slane %v1728_v26, 3 }
0x1339   :  { %v1723_v23 = vmul.f32 %v2948_v54, %v1719_v22 }
0x133b   :  { %v1727_v45 = vadd.f32 %v2949_v58, %v1723_v23 }
0x133d   :  { %1741 = vperm.xlu1 %2901, %v1727_v45   ;;  %2904 = vset.pattern.permute.xlu2 %v3155_v17 }
0x133e   :  { %2906 = vset.pattern.permute.xlu0 %v3155_v17  ;;  %1772 = vperm.xlu2 %2904, %v1726_v9  }
0x133f   :  { %1776 = vperm.xlu0 %2906, %v1727_v45  }
0x1345   :  { %2909 = vset.pattern.permute.xlu1 %v3157_v3 }
0x1346   :  { %1795 = vperm.xlu1 %2909, %v1727_v45   ;;  %2905 = vset.pattern.permute.xlu2 %v3156_v20 }
0x1347   :  { %2907 = vset.pattern.permute.xlu0 %v3156_v20  ;;  %1757 = vperm.xlu2 %2905, %v1727_v45  }
0x1348   :  { %1749 = vperm.xlu0 %2907, %v1725_v59  }
0x134e   :  { %2910 = vset.pattern.permute.xlu1 %v3155_v17 }
0x134f   :  { %1768 = vperm.xlu1 %2910, %v1725_v59   ;;  %2908 = vset.pattern.permute.xlu2 %v3157_v3 }
0x1350   :  { %1791 = vperm.xlu2 %2908, %v1726_v9   ;;  %2923 = vset.pattern.permute.xlu0 %v3155_v17 }
0x1357   :  { %2921 = vset.pattern.permute.xlu1 %v3151_v0 }
0x1358   :  { %1787 = vperm.xlu2 %2908, %v1725_v59  }
0x1360   :  { %2922 = vset.pattern.permute.xlu2 %v3156_v20 }
0x1385   :  { %v1732_v30 = vpop.permute.xlu1 %1731 }
0x1386   :  { %v1745_v51 = vmul.f32 %v1744_v21, %v1732_v30 }
0x138f   :  { %v1754_v55 = vpop.permute.xlu2 %1753 }
0x1390   :  { %v1762_v34 = vmul.f32 %v1760_v24, %v1754_v55 }
0x1398   :  { %v1773_v25 = vpop.permute.xlu2 %1772 }
0x1399   :  { %v1781_v38 = vmul.f32 %v1779_v28, %v1773_v25 }
0x13a1   :  { %v1758_v14 = vpop.permute.xlu2 %1757 }
0x13a2   :  { %v1763_v54 = vmul.f32 %v1760_v24, %v1758_v14 }
0x13a7   :  { %v1737_v31 = vpop.permute.xlu0 %1736 }
0x13a8   :  { %v1746_v39 = vmul.f32 %v1744_v21, %v1737_v31 }
0x13aa   :  { %v1765_v40 = vadd.f32 %v1762_v34, %v1746_v39  ;;  %v1792_v42 = vpop.permute.xlu2 %1791 }
0x13ab   :  { %v1800_v41 = vmul.f32 %v1798_v32, %v1792_v42 }
0x13ac   :  { %v1784_v43 = vadd.f32 %v1781_v38, %v1765_v40 }
0x13ae   :  { %v3620_v37 = vadd.f32 %v1800_v41, %v1784_v43 }
0x13af   :  { %v1742_v33 = vpop.permute.xlu1 %1741 }
0x13b0   :  { %1937 = vrot.lane.b32.xlu0 %v3620_v37, %s3161_s25  ;;  %v1747_v46 = vmul.f32 %v1744_v21, %v1742_v33 }
0x13b1   :  { %v1777_v61 = vpop.permute.xlu0 %1776 }
0x13b2   :  { %v1766_v56 = vadd.f32 %v1763_v54, %v1747_v46  ;;  %v1782_v2 = vmul.f32 %v1779_v28, %v1777_v61  ;;  %v1788_v48 = vpop.permute.xlu2 %1787 }
0x13b3   :  { %v1799_v52 = vmul.f32 %v1798_v32, %v1788_v48 }
0x13b4   :  { %v1785_v49 = vadd.f32 %v1782_v2, %v1766_v56 }
0x13b8   :  { %v1796_v58 = vpop.permute.xlu1 %1795  ;;  %1931 = vrot.lane.b32.xlu0 %v3620_v37, %s3162_s26 }
0x13b9   :  { %v1801_v59 = vmul.f32 %v1798_v32, %v1796_v58 }
0x13ba   :  { %v1750_v29 = vpop.permute.xlu0 %1749 }
0x13bb   :  { %v3626_v44 = vadd.f32 %v1801_v59, %v1785_v49  ;;  %v1761_v47 = vmul.f32 %v1760_v24, %v1750_v29 }
0x13bd   :  { %1939 = vrot.lane.b32.xlu1 %v3626_v44, %s3161_s25  ;;  %v1764_v35 = vadd.f32 %v1761_v47, %v1745_v51  ;;  %v2911_v38 = vpack.i.bf16 %v3620_v37, %v3626_v44 }
0x13c0   :  { %1810 = vrot.lane.b32.xlu0 %v3620_v37, %s3158_s0 }
0x13c1   :  { %v1769_v62 = vpop.permute.xlu1 %1768 }
0x13c2   :  { %v1780_v60 = vmul.f32 %v1779_v28, %v1769_v62 }
0x13c4   :  { %v1783_v36 = vadd.f32 %v1780_v60, %v1764_v35 }
0x13c6   :  { %v1802_v4 = vadd.f32 %v1799_v52, %v1783_v36 }
0x13c8   :  { %1929 = vrot.lane.b32.xlu1 %v1802_v4, %s3162_s26  ;;  %1935 = vrot.lane.b32.xlu2 %v1802_v4, %s3161_s25 }
0x13d0   :  { %1812 = vrot.lane.b32.xlu1 %v3626_v44, %s3158_s0  ;;  %1933 = vrot.lane.b32.xlu2 %v3626_v44, %s3162_s26 }
0x13d8   :  { %1808 = vrot.lane.b32.xlu2 %v1802_v4, %s3158_s0 }
0x1422   :  { %v1938_v6 = vpop.permute.xlu0 %1937  ;;  %v1936_v7 = vpop.permute.xlu2 %1935 }
0x142a   :  { %v1932_v13 = vpop.permute.xlu0 %1931  ;;  %v1934_v16 = vpop.permute.xlu2 %1933 }
0x142f   :  { %v1940_v50 = vpop.permute.xlu1 %1939 }
0x1430   :  { %2787 = vmatpush.xpose.msk.msrb.mxu0 %vm389_vm4, %v1940_v50 }
0x1432   :  { %v1811_v11 = vpop.permute.xlu0 %1810  ;;  %v1809_v8 = vpop.permute.xlu2 %1808 }
0x1434   :  { %2788 = vmatpush.xpose.msk.msrb.mxu0 %vm389_vm4, %v1938_v6 }
0x1438   :  { %2789 = vmatpush.xpose.msk.msrb.mxu0 %vm389_vm4, %v1936_v7 }
0x143a   :  { %v1930_v12 = vpop.permute.xlu1 %1929 }
0x143b   :  { %2790 = vmatmul.msk.f32.vlgmr.msrb.gmra.mxu0 %vm389_vm4, %v1930_v12 }
0x1442   :  { %v1813_v53 = vpop.permute.xlu1 %1812 }
0x1443   :  { %2778 = vmatpush.xpose.msk.msrb.mxu1 %vm389_vm4, %v1813_v53  ;;  %2791 = vmatmul.msk.f32.gmra.mxu0 %vm389_vm4, %v1932_v13 }
0x1447   :  { %2779 = vmatpush.xpose.msk.msrb.mxu1 %vm389_vm4, %v1811_v11 }
0x144b   :  { %2780 = vmatpush.xpose.msk.msrb.mxu1 %vm389_vm4, %v1809_v8  ;;  %2792 = vmatmul.msk.f32.gmra.mxu0 %vm389_vm4, %v1934_v16 }
0x144e   :  { %2781 = vmatmul.msk.f32.vlgmr.msrb.gmra.mxu1 %vm389_vm4, %v1802_v4 }
0x1456   :  { %2782 = vmatmul.msk.f32.gmra.mxu1 %vm389_vm4, %v3620_v37 }
0x145e   :  { %2783 = vmatmul.msk.f32.gmra.mxu1 %vm389_vm4, %v3626_v44 }
0x14b8   :  { %v1970_v9 = vpop.f32.mrf.mxu0 }
0x14b9   :  { %v1971_v19 = vadd.f32 %v1970_v9, %v3282_v57 }
0x14bb   :  { %v1979_v27 = vsel %vm428_vm6, %v1971_v19, -inf }
0x14bc   :  { %1980 = vmax.xlane.f32.xlu1 %v1979_v27 }
0x14c0   :  { %v1973_v22 = vpop.f32.mrf.mxu0 }
0x14c1   :  { %v1974_v23 = vadd.f32 %v1973_v22, %v3286_v63 }
0x14c3   :  { %v1982_v45 = vsel %vm428_vm6, %v1974_v23, -inf }
0x14c4   :  { %1983 = vmax.xlane.f32.xlu0 %v1982_v45 }
0x14c8   :  { %v1976_v55 = vpop.f32.mrf.mxu0 }
0x14c9   :  { %v1977_v25 = vadd.f32 %v1976_v55, %v3290_v5 }
0x14cb   :  { %v1843_v14 = vpop.f32.mrf.mxu1  ;;  %v1985_v26 = vsel %vm428_vm6, %v1977_v25, -inf }
0x14cc   :  { %v1844_v24 = vadd.f32 %v1843_v14, %v3282_v57  ;;  %1986 = vmax.xlane.f32.xlu2 %v1985_v26 }
0x14ce   :  { %v1852_v21 = vsel %vm428_vm6, %v1844_v24, -inf }
0x14cf   :  { %1853 = vmax.xlane.f32.xlu1 %v1852_v21 }
0x14d3   :  { %v1846_v28 = vpop.f32.mrf.mxu1 }
0x14d4   :  { %v1847_v30 = vadd.f32 %v1846_v28, %v3286_v63 }
0x14d6   :  { %v1855_v31 = vsel %vm428_vm6, %v1847_v30, -inf }
0x14d7   :  { %1856 = vmax.xlane.f32.xlu0 %v1855_v31 }
0x14db   :  { %v1849_v32 = vpop.f32.mrf.mxu1 }
0x14dc   :  { %v1850_v34 = vadd.f32 %v1849_v32, %v3290_v5 }
0x14de   :  { %v1858_v39 = vsel %vm428_vm6, %v1850_v34, -inf }
0x14df   :  { %1859 = vmax.xlane.f32.xlu1 %v1858_v39 }
0x14eb   :  { %2912 = vrot.lane.b32.xlu0 %v2911_v38, %s3163_s27 }
0x14f3   :  { %2917 = vrot.lane.b32.xlu0 %v2911_v38, %s3160_s24 }
0x14f8   :  { %2012 = vrot.lane.b32.xlu1 %v1802_v4, %s3163_s27 }
0x14fb   :  { %1885 = vrot.lane.b32.xlu0 %v1802_v4, %s3160_s24 }
0x152f   :  { %v1981_v57 = vpop.xlane.xlu1 %1980 }
0x1530   :  { %v1988_v63 = vsub.f32 %v1971_v19, %v1981_v57 }
0x1532   :  { %v1991_v40 = vmul.f32 1.442695, %v1988_v63 }
0x1534   :  { %3056 = vpow2.f32 %v1991_v40  ;;  %v2074_v40 = vld [vmem:[#allocation2 + $0x218] sm:$0xff] }
0x1535   :  { %2096 = vmatpush.msra.mxu1 %v2074_v40 }
0x1537   :  { %v1984_v42 = vpop.xlane.xlu0 %1983 }
0x1538   :  { %v1989_v5 = vsub.f32 %v1974_v23, %v1984_v42  ;;  %v2073_v42 = vld [vmem:[#allocation2 + $0x210] sm:$0xff] }
0x1539   :  { %2097 = vmatpush.msra.mxu1 %v2073_v42 }
0x153a   :  { %v3057_v41 = vpop.eup %3056  ;;  %v1993_v43 = vmul.f32 1.442695, %v1989_v5  ;;  %v2072_v5 = vld [vmem:[#allocation2 + $0x208] sm:$0xff] }
0x153b   :  { %v1997_v33 = vsel %vm428_vm6, %v3057_v41, 0.0  ;;  %2098 = vmatpush.msra.mxu1 %v2072_v5 }
0x153c   :  { %3058 = vpow2.f32 %v1993_v43  ;;  %1998 = vadd.xlane.f32.xlu2 %v1997_v33  ;;  %v2071_v43 = vld [vmem:[#allocation2 + $0x200] sm:$0xff] }
0x153d   :  { %2099 = vmatpush.msra.mxu1 %v2071_v43 }
0x153f   :  { %v1987_v37 = vpop.xlane.xlu2 %1986 }
0x1540   :  { %v1990_v46 = vsub.f32 %v1977_v25, %v1987_v37 }
0x1542   :  { %v3059_v61 = vpop.eup %3058  ;;  %v1995_v54 = vmul.f32 1.442695, %v1990_v46  ;;  %v1854_v56 = vpop.xlane.xlu1 %1853 }
0x1543   :  { %v1861_v2 = vsub.f32 %v1844_v24, %v1854_v56  ;;  %v2000_v58 = vsel %vm428_vm6, %v3059_v61, 0.0 }
0x1544   :  { %3060 = vpow2.f32 %v1995_v54  ;;  %2001 = vadd.xlane.f32.xlu2 %v2000_v58 }
0x1545   :  { %v1864_v49 = vmul.f32 1.442695, %v1861_v2 }
0x1547   :  { %3062 = vpow2.f32 %v1864_v49 }
0x154a   :  { %v3061_v59 = vpop.eup %3060  ;;  %v1857_v44 = vpop.xlane.xlu0 %1856 }
0x154b   :  { %v1862_v29 = vsub.f32 %v1847_v30, %v1857_v44  ;;  %v2003_v47 = vsel %vm428_vm6, %v3061_v59, 0.0 }
0x154c   :  { %2004 = vadd.xlane.f32.xlu2 %v2003_v47 }
0x154d   :  { %v1866_v51 = vmul.f32 1.442695, %v1862_v29  ;;  %v3063_v48 = vpop.eup %3062 }
0x154e   :  { %v1870_v60 = vsel %vm428_vm6, %v3063_v48, 0.0 }
0x154f   :  { %3064 = vpow2.f32 %v1866_v51 }
0x1552   :  { %v1860_v62 = vpop.xlane.xlu1 %1859 }
0x1553   :  { %v1863_v35 = vsub.f32 %v1850_v34, %v1860_v62 }
0x1554   :  { %1871 = vadd.xlane.f32.xlu2 %v1870_v60 }
0x1555   :  { %v1868_v52 = vmul.f32 1.442695, %v1863_v35  ;;  %v3065_v36 = vpop.eup %3064 }
0x1556   :  { %v1873_v4 = vsel %vm428_vm6, %v3065_v36, 0.0 }
0x1557   :  { %3066 = vpow2.f32 %v1868_v52 }
0x155c   :  { %1874 = vadd.xlane.f32.xlu2 %v1873_v4 }
0x155d   :  { %v3067_v50 = vpop.eup %3066  ;;  %v2913_v6 = vpop.permute.xlu0 %2912 }
0x155e   :  { %v2914_v7 = vunpack.i.l.bf16 %v2913_v6  ;;  %v1876_v12 = vsel %vm428_vm6, %v3067_v50, 0.0  ;;  %v2915_v13 = vunpack.i.h.bf16 %v2913_v6 }
0x155f   :  { %1877 = vadd.xlane.f32.xlu1 %v1876_v12 }
0x1560   :  { %2043 = vmatpush.msra.mxu2 %v2914_v7 }
0x1562   :  { %2044 = vmatpush.msra.mxu2 %v2915_v13 }
0x1565   :  { %v2918_v16 = vpop.permute.xlu0 %2917 }
0x1566   :  { %v2919_v53 = vunpack.i.l.bf16 %v2918_v16  ;;  %v2920_v11 = vunpack.i.h.bf16 %v2918_v16 }
0x1568   :  { %1916 = vmatpush.msra.mxu3 %v2919_v53 }
0x156a   :  { %v2013_v8 = vpop.permute.xlu1 %2012  ;;  %1917 = vmatpush.msra.mxu3 %v2920_v11 }
0x156b   :  { %2045 = vmatpush.msra.mxu2 %v2013_v8 }
0x156d   :  { %v1886_v9 = vpop.permute.xlu0 %1885 }
0x156e   :  { %1918 = vmatpush.msra.mxu3 %v1886_v9 }
0x15af   :  { %v1999_v19 = vpop.xlane.xlu2 %1998 }
0x15b0   :  { %3068 = vrcp.f32 %v1999_v19 }
0x15b6   :  { %v3069_v27 = vpop.eup %3068 }
0x15b7   :  { %v2009_v22 = vmul.f32 %v3069_v27, %v3057_v41  ;;  %v2002_v23 = vpop.xlane.xlu2 %2001 }
0x15b8   :  { %3070 = vrcp.f32 %v2002_v23 }
0x15b9   :  { %2793 = vmatmul.msk.f32.vlgmr.msra.gmra.mxu2 %vm428_vm6, %v2009_v22 }
0x15be   :  { %v3071_v45 = vpop.eup %3070 }
0x15bf   :  { %v2005_v55 = vpop.xlane.xlu2 %2004  ;;  %v2010_v25 = vmul.f32 %v3071_v45, %v3059_v61 }
0x15c0   :  { %3072 = vrcp.f32 %v2005_v55 }
0x15c1   :  { %2794 = vmatmul.msk.f32.gmra.mxu2 %vm428_vm6, %v2010_v25 }
0x15c6   :  { %v3073_v14 = vpop.eup %3072 }
0x15c7   :  { %v1872_v26 = vpop.xlane.xlu2 %1871  ;;  %v2011_v24 = vmul.f32 %v3073_v14, %v3061_v59  ;;  %v2950_v59 = vld [vmem:[#allocation2 + $0x220] ss:$0 sm:$0xff] }
0x15c8   :  { %3074 = vrcp.f32 %v1872_v26 }
0x15c9   :  { %2795 = vmatmul.msk.f32.gmra.mxu2 %vm428_vm6, %v2011_v24 }
0x15ce   :  { %v3075_v21 = vpop.eup %3074 }
0x15cf   :  { %v1882_v28 = vmul.f32 %v3075_v21, %v3063_v48  ;;  %v1875_v30 = vpop.xlane.xlu2 %1874 }
0x15d0   :  { %3076 = vrcp.f32 %v1875_v30  ;;  %v2951_v30 = vld [vmem:[#allocation2 + $0x228] ss:$0 sm:$0xff] }
0x15d1   :  { %2784 = vmatmul.msk.f32.vlgmr.msra.gmra.mxu3 %vm428_vm6, %v1882_v28 }
0x15d2   :  { %v1878_v31 = vpop.xlane.xlu1 %1877 }
0x15d3   :  { %3078 = vrcp.f32 %v1878_v31 }
0x15d6   :  { %v3077_v32 = vpop.eup %3076 }
0x15d7   :  { %v1883_v34 = vmul.f32 %v3077_v32, %v3065_v36 }
0x15d9   :  { %2785 = vmatmul.msk.f32.gmra.mxu3 %vm428_vm6, %v1883_v34  ;;  %v3079_v39 = vpop.eup %3078  ;;  %v2952_v34 = vld [vmem:[#allocation2 + $0x230] ss:$0 sm:$0xff] }
0x15da   :  { %v1884_v38 = vmul.f32 %v3079_v39, %v3067_v50 }
0x15e1   :  { %2786 = vmatmul.msk.f32.gmra.mxu3 %vm428_vm6, %v1884_v38 }
0x163c   :  { %v2047_v57 = vpop.f32.mrf.mxu2 }
0x163d   :  { %2059 = vrot.lane.b32.xlu2 %v2047_v57, %s3164_s28 }
0x1644   :  { %v2050_v63 = vpop.f32.mrf.mxu2 }
0x1645   :  { %2061 = vrot.lane.b32.xlu0 %v2050_v63, %s3164_s28 }
0x164c   :  { %v2053_v41 = vpop.f32.mrf.mxu2 }
0x164d   :  { %2063 = vrot.lane.b32.xlu0 %v2053_v41, %s3164_s28 }
0x1654   :  { %v1920_v33 = vpop.f32.mrf.mxu3 }
0x165c   :  { %v1923_v61 = vpop.f32.mrf.mxu3 }
0x1664   :  { %v1926_v2 = vpop.f32.mrf.mxu3 }
0x1697   :  { %v2060_v37 = vpop.permute.xlu2 %2059 }
0x1698   :  { %v2068_v46 = vsel %vm389_vm4, %v1920_v33, %v2060_v37 }
0x1699   :  { %2796 = vmatmul.msk.f32.vlgmr.msra.gmra.mxu1 %vm652_vm10, %v2068_v46 }
0x16b7   :  { %v2062_v54 = vpop.permute.xlu0 %2061 }
0x16b8   :  { %v2069_v56 = vsel %vm389_vm4, %v1923_v61, %v2062_v54 }
0x16b9   :  { %2797 = vmatmul.msk.f32.gmra.mxu1 %vm652_vm10, %v2069_v56 }
0x16bf   :  { %v2064_v58 = vpop.permute.xlu0 %2063 }
0x16c0   :  { %v2070_v49 = vsel %vm389_vm4, %v1926_v2, %v2064_v58 }
0x16c1   :  { %2798 = vmatmul.msk.f32.gmra.mxu1 %vm652_vm10, %v2070_v49 }
0x1716   :  { %v2101_v44 = vpop.f32.mrf.mxu1 }
0x1717   :  { %v2110_v29 = vadd.f32 %v2101_v44, %v3584_v15 }
0x1719   :  { %v3693_v47 = vadd.f32 %v2950_v59, %v2110_v29 }
0x171b   :  { %v2120_v51 = vsel %vm221_vm8, %v3693_v47, 0.0 }
0x171c   :  { %2121 = vadd.xlane.f32.xlu0 %v2120_v51 }
0x1736   :  { %v2104_v48 = vpop.f32.mrf.mxu1 }
0x1737   :  { %v2111_v62 = vadd.f32 %v2104_v48, %v3589_v18 }
0x1739   :  { %v3698_v35 = vadd.f32 %v2950_v59, %v2111_v62 }
0x173b   :  { %v2123_v60 = vsel %vm221_vm8, %v3698_v35, 0.0 }
0x173c   :  { %2124 = vadd.xlane.f32.xlu2 %v2123_v60 }
0x173e   :  { %v2107_v52 = vpop.f32.mrf.mxu1 }
0x173f   :  { %v2112_v36 = vadd.f32 %v2107_v52, %v3594_v10 }
0x1741   :  { %v3703_v4 = vadd.f32 %v2950_v59, %v2112_v36  ;;  %v2194_v36 = vld [vmem:[#allocation2 + $0x238] sm:$0xf] }
0x1743   :  { %v2126_v15 = vsel %vm221_vm8, %v3703_v4, 0.0 }
0x1744   :  { %2127 = vadd.xlane.f32.xlu1 %v2126_v15  ;;  %v2210_v15 = vperm.slane %v2194_v36, 0 }
0x178f   :  { %v2122_v50 = vpop.xlane.xlu0 %2121 }
0x1790   :  { %v2129_v6 = vmul.f32 %v2122_v50, %v3234_v1  ;;  %v2226_v50 = vperm.slane %v2194_v36, 1 }
0x1792   :  { %v2132_v18 = vsub.f32 %v3693_v47, %v2129_v6 }
0x1794   :  { %v2135_v7 = vmul.f32 %v2132_v18, %v2132_v18 }
0x1796   :  { %v2138_v12 = vsel %vm221_vm8, %v2135_v7, 0.0 }
0x1797   :  { %2139 = vadd.xlane.f32.xlu1 %v2138_v12 }
0x17af   :  { %v2125_v13 = vpop.xlane.xlu2 %2124 }
0x17b0   :  { %v2130_v16 = vmul.f32 %v2125_v13, %v3234_v1  ;;  %v2245_v13 = vperm.slane %v2194_v36, 2 }
0x17b2   :  { %v2133_v10 = vsub.f32 %v3698_v35, %v2130_v16 }
0x17b4   :  { %v2136_v53 = vmul.f32 %v2133_v10, %v2133_v10 }
0x17b6   :  { %v2141_v11 = vsel %vm221_vm8, %v2136_v53, 0.0 }
0x17b7   :  { %v2128_v8 = vpop.xlane.xlu1 %2127  ;;  %2142 = vadd.xlane.f32.xlu1 %v2141_v11 }
0x17b8   :  { %v2131_v9 = vmul.f32 %v2128_v8, %v3234_v1 }
0x17ba   :  { %v3715_v19 = vsub.f32 %v3703_v4, %v2131_v9 }
0x17bc   :  { %v2137_v27 = vmul.f32 %v3715_v19, %v3715_v19 }
0x17be   :  { %v2144_v22 = vsel %vm221_vm8, %v2137_v27, 0.0 }
0x17bf   :  { %2145 = vadd.xlane.f32.xlu0 %v2144_v22 }
0x180a   :  { %v2140_v23 = vpop.xlane.xlu1 %2139 }
0x180b   :  { %v2147_v45 = vmul.f32 %v2140_v23, %v3234_v1 }
0x180d   :  { %v2150_v55 = vadd.f32 1e-05, %v2147_v45 }
0x180f   :  { %3080 = vrsqrt.f32 %v2150_v55  ;;  %vm2159_vm15 = vweird.f32 %v2150_v55 }
0x1815   :  { %v3081_v25 = vpop.eup %3080 }
0x1816   :  { %v2154_v14 = vmul.f32 %v3081_v25, %v2150_v55  ;;  %vm2160_vm14 = vweird.f32 %v3081_v25 }
0x1817   :  { %vm2161_vm1 = vmor %vm2159_vm15, %vm2160_vm14 }
0x1818   :  { %v2155_v26 = vmul.f32 %v3081_v25, %v2154_v14 }
0x181a   :  { %v2156_v24 = vmul.f32 0.5, %v2155_v26 }
0x181c   :  { %v2157_v21 = vsub.f32 1.5, %v2156_v24 }
0x181e   :  { %v2158_v28 = vmul.f32 %v3081_v25, %v2157_v21 }
0x1820   :  { %v2162_v31 = vsel %vm2161_vm1, %v3081_v25, %v2158_v28 }
0x1821   :  { %v2183_v32 = vmul.f32 %v2162_v31, %v2132_v18 }
0x1823   :  { %v2187_v39 = vmul.f32 %v2951_v30, %v2183_v32 }
0x1825   :  { %v2191_v38 = vadd.f32 %v2952_v34, %v2187_v39 }
0x1827   :  { %2234 = vperm.xlu0 %2923, %v2191_v38   ;;  %2215 = vperm.xlu2 %2922, %v2191_v38  }
0x1828   :  { %2197 = vperm.xlu1 %2921, %v2191_v38  }
0x182a   :  { %v2143_v57 = vpop.xlane.xlu1 %2142 }
0x182b   :  { %v2148_v63 = vmul.f32 %v2143_v57, %v3234_v1 }
0x182d   :  { %v2151_v40 = vadd.f32 1e-05, %v2148_v63 }
0x182f   :  { %3082 = vrsqrt.f32 %v2151_v40  ;;  %2925 = vset.pattern.permute.xlu2 %v3151_v0  ;;  %2930 = vset.pattern.permute.xlu0 %v3156_v20  ;;  %vm2169_vm3 = vweird.f32 %v2151_v40 }
0x1830   :  { %2924 = vset.pattern.permute.xlu1 %v3157_v3 }
0x1831   :  { %2253 = vperm.xlu1 %2924, %v2191_v38  }
0x1832   :  { %v2146_v42 = vpop.xlane.xlu0 %2145 }
0x1833   :  { %v2149_v5 = vmul.f32 %v2146_v42, %v3234_v1 }
0x1835   :  { %v3083_v41 = vpop.eup %3082  ;;  %v2152_v43 = vadd.f32 1e-05, %v2149_v5 }
0x1836   :  { %v2164_v33 = vmul.f32 %v3083_v41, %v2151_v40  ;;  %vm2170_vm2 = vweird.f32 %v3083_v41 }
0x1837   :  { %3084 = vrsqrt.f32 %v2152_v43  ;;  %vm2171_vm5 = vmor %vm2169_vm3, %vm2170_vm2  ;;  %vm2179_vm9 = vweird.f32 %v2152_v43  ;;  %vm2490_vm2 = vcmask 1042432   ;;  %vm2450_vm3 = vcmask 64512  }
0x1838   :  { %v2165_v37 = vmul.f32 %v3083_v41, %v2164_v33 }
0x1839   :  { %2926 = vset.pattern.permute.xlu1 %v3156_v20 }
0x183a   :  { %v2166_v46 = vmul.f32 0.5, %v2165_v37  ;;  %v2319_v37 = vld [vmem:[#allocation2 + $0x250] sm:$0xff] }
0x183b   :  { %2343 = vmatpush.msrb.mxu3 %v2319_v37 }
0x183c   :  { %v2167_v61 = vsub.f32 1.5, %v2166_v46 }
0x183d   :  { %v3085_v54 = vpop.eup %3084 }
0x183e   :  { %v2168_v56 = vmul.f32 %v3083_v41, %v2167_v61  ;;  %v2174_v2 = vmul.f32 %v3085_v54, %v2152_v43  ;;  %vm2180_vm7 = vweird.f32 %v3085_v54 }
0x183f   :  { %vm2181_vm11 = vmor %vm2179_vm9, %vm2180_vm7  ;;  %vm2455_vm7 = vcmask 162816   ;;  %vm2461_vm9 = vcmask 293888  }
0x1840   :  { %v2172_v58 = vsel %vm2171_vm5, %v3083_v41, %v2168_v56  ;;  %v2175_v49 = vmul.f32 %v3085_v54, %v2174_v2  ;;  %vm2452_vm5 = vcmask 97280  }
0x1841   :  { %v2184_v59 = vmul.f32 %v2172_v58, %v2133_v10 }
0x1842   :  { %v2176_v44 = vmul.f32 0.5, %v2175_v49 }
0x1843   :  { %v2188_v1 = vmul.f32 %v2951_v30, %v2184_v59 }
0x1844   :  { %v2177_v29 = vsub.f32 1.5, %v2176_v44 }
0x1845   :  { %v2192_v51 = vadd.f32 %v2952_v34, %v2188_v1 }
0x1846   :  { %v2178_v48 = vmul.f32 %v3085_v54, %v2177_v29 }
0x1847   :  { %2219 = vperm.xlu1 %2926, %v2192_v51   ;;  %2202 = vperm.xlu2 %2925, %v2192_v51  }
0x1848   :  { %v2182_v20 = vsel %vm2181_vm11, %v3085_v54, %v2178_v48  ;;  %vm2463_vm11 = vcmask 326656  }
0x1849   :  { %v2185_v62 = vmul.f32 %v2182_v20, %v3715_v19 }
0x184b   :  { %v2189_v60 = vmul.f32 %v2951_v30, %v2185_v62 }
0x184d   :  { %v2193_v52 = vadd.f32 %v2952_v34, %v2189_v60 }
0x184f   :  { %2928 = vset.pattern.permute.xlu1 %v3157_v3  ;;  %2927 = vset.pattern.permute.xlu2 %v3155_v17 }
0x1850   :  { %2223 = vperm.xlu0 %2930, %v2193_v52   ;;  %2257 = vperm.xlu1 %2928, %v2192_v51  }
0x1851   :  { %2238 = vperm.xlu2 %2927, %v2192_v51  }
0x1858   :  { %2931 = vset.pattern.permute.xlu1 %v3155_v17  ;;  %2933 = vset.pattern.permute.xlu0 %v3157_v3  ;;  %v2264_v17 = vperm.slane %v2194_v36, 3 }
0x1859   :  { %2929 = vset.pattern.permute.xlu2 %v3151_v0  ;;  %2242 = vperm.xlu1 %2931, %v2193_v52   ;;  %v2953_v0 = vld [vmem:[#allocation2 + $0x240] ss:$0 sm:$0xff] }
0x185a   :  { %2207 = vperm.xlu2 %2929, %v2193_v52  }
0x1862   :  { %2932 = vset.pattern.permute.xlu2 %v3157_v3 }
0x1863   :  { %2261 = vperm.xlu2 %2932, %v2193_v52  }
0x1881   :  { %v2216_v18 = vpop.permute.xlu2 %2215 }
0x1882   :  { %v2227_v12 = vmul.f32 %v2226_v50, %v2216_v18 }
0x1899   :  { %v2235_v16 = vpop.permute.xlu0 %2234 }
0x189a   :  { %v2198_v6 = vpop.permute.xlu1 %2197  ;;  %v2246_v53 = vmul.f32 %v2245_v13, %v2235_v16 }
0x189b   :  { %v2211_v7 = vmul.f32 %v2210_v15, %v2198_v6 }
0x189d   :  { %v2230_v10 = vadd.f32 %v2227_v12, %v2211_v7  ;;  %v2363_v7 = vld [vmem:[%s3781_s1] sm:$0x3]  ;;  %s3166_s1 = smov 4  }
0x189f   :  { %v2249_v8 = vadd.f32 %v2246_v53, %v2230_v10  ;;  %v2367_v10 = vsel %vm2366_vm12, %v2363_v7, 0.0  ;;  %v2318_v53 = vld [vmem:[#allocation2 + $0x248] sm:$0xff] }
0x18a0   :  { %2344 = vmatpush.msrb.mxu3 %v2318_v53 }
0x18a1   :  { %v2203_v23 = vpop.permute.xlu2 %2202 }
0x18a2   :  { %v2212_v31 = vmul.f32 %v2210_v15, %v2203_v23 }
0x18a3   :  { %v2254_v11 = vpop.permute.xlu1 %2253 }
0x18a4   :  { %v2265_v9 = vmul.f32 %v2264_v17, %v2254_v11 }
0x18a6   :  { %v2268_v19 = vadd.f32 %v2265_v9, %v2249_v8 }
0x18a8   :  { %v3734_v27 = vadd.f32 %v2953_v0, %v2268_v19  ;;  %v3165_v19 = vmov 67.0  }
0x18aa   :  { %v2279_v3 = vmul.f32 0.044715, %v3734_v27  ;;  %v2276_v28 = vmul.f32 0.5, %v3734_v27 }
0x18ab   :  { %v2239_v14 = vpop.permute.xlu2 %2238 }
0x18ac   :  { %v2282_v22 = vmul.f32 %v2279_v3, %v3734_v27  ;;  %v2247_v39 = vmul.f32 %v2245_v13, %v2239_v14 }
0x18ae   :  { %v2285_v45 = vmul.f32 %v2282_v22, %v3734_v27 }
0x18b0   :  { %v2288_v55 = vadd.f32 %v2285_v45, %v3734_v27 }
0x18b2   :  { %v2291_v25 = vmul.f32 0.7978846, %v2288_v55 }
0x18b4   :  { %3086 = vtanh.f32 %v2291_v25  ;;  %v2208_v38 = vpop.permute.xlu2 %2207 }
0x18b5   :  { %v2213_v46 = vmul.f32 %v2210_v15, %v2208_v38 }
0x18b9   :  { %v2220_v26 = vpop.permute.xlu1 %2219 }
0x18ba   :  { %v3087_v24 = vpop.eup %3086  ;;  %v2228_v21 = vmul.f32 %v2226_v50, %v2220_v26 }
0x18bb   :  { %v2297_v30 = vadd.f32 1.0, %v3087_v24 }
0x18bc   :  { %v2231_v34 = vadd.f32 %v2228_v21, %v2212_v31  ;;  %v2954_v31 = vld [vmem:[#allocation2 + $0x258] ss:$0 sm:$0xff] }
0x18bd   :  { %v2300_v32 = vmul.f32 %v2297_v30, %v2276_v28  ;;  %v2262_v61 = vpop.permute.xlu2 %2261 }
0x18be   :  { %v2250_v63 = vadd.f32 %v2247_v39, %v2231_v34  ;;  %v2267_v59 = vmul.f32 %v2264_v17, %v2262_v61 }
0x18bf   :  { %2306 = vrot.lane.b32.xlu1 %v2300_v32, %s3162_s26 }
0x18c2   :  { %v2258_v57 = vpop.permute.xlu1 %2257  ;;  %v2224_v42 = vpop.permute.xlu0 %2223 }
0x18c3   :  { %v2266_v40 = vmul.f32 %v2264_v17, %v2258_v57  ;;  %v2229_v43 = vmul.f32 %v2226_v50, %v2224_v42 }
0x18c5   :  { %v2269_v5 = vadd.f32 %v2266_v40, %v2250_v63  ;;  %v2232_v2 = vadd.f32 %v2229_v43, %v2213_v46 }
0x18c7   :  { %v2274_v41 = vadd.f32 %v2953_v0, %v2269_v5 }
0x18c9   :  { %v2280_v33 = vmul.f32 0.044715, %v2274_v41  ;;  %v2277_v36 = vmul.f32 0.5, %v2274_v41 }
0x18cb   :  { %v2243_v54 = vpop.permute.xlu1 %2242  ;;  %v2283_v56 = vmul.f32 %v2280_v33, %v2274_v41 }
0x18cc   :  { %v2248_v58 = vmul.f32 %v2245_v13, %v2243_v54 }
0x18cd   :  { %v2286_v49 = vmul.f32 %v2283_v56, %v2274_v41 }
0x18ce   :  { %v2251_v44 = vadd.f32 %v2248_v58, %v2232_v2 }
0x18cf   :  { %v2289_v1 = vadd.f32 %v2286_v49, %v2274_v41 }
0x18d0   :  { %v2270_v29 = vadd.f32 %v2267_v59, %v2251_v44 }
0x18d1   :  { %v2292_v51 = vmul.f32 0.7978846, %v2289_v1 }
0x18d2   :  { %v2275_v48 = vadd.f32 %v2953_v0, %v2270_v29  ;;  %v2955_v29 = vld [vmem:[#allocation2 + $0x260] ss:$0 sm:$0xff] }
0x18d3   :  { %3088 = vtanh.f32 %v2292_v51 }
0x18d4   :  { %v2281_v20 = vmul.f32 0.044715, %v2275_v48  ;;  %v2278_v13 = vmul.f32 0.5, %v2275_v48 }
0x18d6   :  { %v2284_v62 = vmul.f32 %v2281_v20, %v2275_v48 }
0x18d8   :  { %v2287_v60 = vmul.f32 %v2284_v62, %v2275_v48  ;;  %v2956_v62 = vld [vmem:[#allocation2 + $0x268] ss:$0 sm:$0xff] }
0x18d9   :  { %v3089_v52 = vpop.eup %3088 }
0x18da   :  { %v2298_v15 = vadd.f32 1.0, %v3089_v52  ;;  %v2290_v50 = vadd.f32 %v2287_v60, %v2275_v48 }
0x18dc   :  { %v2301_v6 = vmul.f32 %v2298_v15, %v2277_v36  ;;  %v2293_v18 = vmul.f32 0.7978846, %v2290_v50  ;;  %v2483_v36 = vld [vmem:[#allocation2 + $0x2e0] sm:$0x7]  ;;  %v2482_v50 = vld [vmem:[#allocation2 + $0x2d8] sm:$0xff] }
0x18dd   :  { %2802 = vmatpush.msk.msra.mxu0 %vm2490_vm2, %v2483_v36  ;;  %v2613_v36 = vld [vmem:[#allocation2 + $0x370] sm:$0xff] }
0x18de   :  { %2308 = vrot.lane.b32.xlu2 %v2301_v6, %s3162_s26  ;;  %3090 = vtanh.f32 %v2293_v18  ;;  %v2481_v6 = vld [vmem:[#allocation2 + $0x2d0] sm:$0xff]  ;;  %v2480_v18 = vld [vmem:[#allocation2 + $0x2c8] sm:$0xff] }
0x18df   :  { %3092 = vrcp.f32 %v3165_v19  ;;  %2496 = vmatpush.msra.mxu0 %v2482_v50  ;;  %v2645_v50 = vld [vmem:[#allocation2 + $0x3a8] sm:$0xff] }
0x18e1   :  { %2497 = vmatpush.msra.mxu0 %v2481_v6  ;;  %v2960_v6 = vld [vmem:[#allocation2 + $0x360] ss:$0 sm:$0xff] }
0x18e3   :  { %2498 = vmatpush.msra.mxu0 %v2480_v18 }
0x18e4   :  { %v3091_v12 = vpop.eup %3090 }
0x18e5   :  { %v2299_v16 = vadd.f32 1.0, %v3091_v12  ;;  %v3093_v3 = vpop.eup %3092 }
0x18e6   :  { %v2371_v22 = vmul.f32 67.0, %v3093_v3  ;;  %vm2375_vm13 = vweird.f32 %v3093_v3 }
0x18e7   :  { %v2302_v17 = vmul.f32 %v2299_v16, %v2278_v13  ;;  %v2478_v13 = vld [vmem:[#allocation2 + $0x2b8] sm:$0xff]  ;;  %v2477_v16 = vld [vmem:[#allocation2 + $0x2b0] sm:$0xff] }
0x18e8   :  { %v2372_v23 = vsub.f32 1.0, %v2371_v22  ;;  %v2469_v22 = vld [vmem:[#allocation2 + $0x270] sm:$0xff] }
0x18e9   :  { %2368 = vadd.xlane.f32.xlu1 %v2367_v10  ;;  %2310 = vrot.lane.b32.xlu0 %v2302_v17, %s3162_s26  ;;  %v2476_v10 = vld [vmem:[#allocation2 + $0x2a8] sm:$0xff]  ;;  %v2475_v17 = vld [vmem:[#allocation2 + $0x2a0] sm:$0xff] }
0x18ea   :  { %v2373_v45 = vmul.f32 %v3093_v3, %v2372_v23  ;;  %v2520_v23 = vld [vmem:[#allocation2 + $0x318] sm:$0x3] }
0x18eb   :  { %2804 = vmatpush.msk.msrb.mxu2 %vm105_vm0, %v2520_v23  ;;  %vm2458_vm0 = vcmask 228352   ;;  %v2963_v23 = vld [vmem:[#allocation2 + $0x3c0] ss:$0 sm:$0xff] }
0x18ec   :  { %v2374_v55 = vadd.f32 %v3093_v3, %v2373_v45  ;;  %v2519_v45 = vld [vmem:[#allocation2 + $0x310] sm:$0xff] }
0x18ed   :  { %2541 = vmatpush.msrb.mxu2 %v2519_v45 }
0x18ee   :  { %v2376_v25 = vsel %vm2375_vm13, %v3093_v3, %v2374_v55  ;;  %v2470_v3 = vld [vmem:[#allocation2 + $0x278] sm:$0xff]  ;;  %v2518_v55 = vld [vmem:[#allocation2 + $0x308] sm:$0xff]  ;;  %vm2486_vm13 = vcmask 941056  }
0x18ef   :  { %2542 = vmatpush.msrb.mxu2 %v2518_v55 }
0x1931   :  { %v2307_v11 = vpop.permute.xlu1 %2306 }
0x1932   :  { %v2315_v8 = vmul.f32 %v2307_v11, %v3734_v27  ;;  %v2474_v11 = vld [vmem:[#allocation2 + $0x298] sm:$0xff] }
0x1934   :  { %2799 = vmatmul.msk.f32.vlgmr.msrb.gmra.mxu3 %vm389_vm4, %v2315_v8  ;;  %v2473_v8 = vld [vmem:[#allocation2 + $0x290] sm:$0xff] }
0x1938   :  { %v2309_v0 = vpop.permute.xlu2 %2308 }
0x1939   :  { %v2316_v9 = vmul.f32 %v2309_v0, %v2274_v41  ;;  %v2472_v0 = vld [vmem:[#allocation2 + $0x288] sm:$0xff] }
0x193c   :  { %2800 = vmatmul.msk.f32.gmra.mxu3 %vm389_vm4, %v2316_v9  ;;  %v2471_v9 = vld [vmem:[#allocation2 + $0x280] sm:$0xff] }
0x195b   :  { %v2311_v14 = vpop.permute.xlu0 %2310 }
0x195c   :  { %v2369_v26 = vpop.xlane.xlu1 %2368  ;;  %v2317_v24 = vmul.f32 %v2311_v14, %v2275_v48 }
0x195d   :  { %v2377_v21 = vmul.f32 %v2376_v25, %v2369_v26 }
0x195e   :  { %2801 = vmatmul.msk.f32.gmra.mxu3 %vm389_vm4, %v2317_v24 }
0x195f   :  { %v2378_v27 = vsub.f32 %v2363_v7, %v2377_v21  ;;  %v2479_v7 = vld [vmem:[#allocation2 + $0x2c0] sm:$0xff] }
0x1960   :  { %2499 = vmatpush.msra.mxu0 %v2479_v7 }
0x1961   :  { %v2379_v28 = vmul.f32 %v2378_v27, %v2378_v27 }
0x1962   :  { %2500 = vmatpush.msra.mxu0 %v2478_v13  ;;  %v2644_v13 = vld [vmem:[#allocation2 + $0x3a0] sm:$0xff] }
0x1963   :  { %v2380_v30 = vsel %vm2366_vm12, %v2379_v28, 0.0  ;;  %vm2467_vm12 = vcmask 392192  }
0x1964   :  { %2381 = vadd.xlane.f32.xlu2 %v2380_v30  ;;  %2501 = vmatpush.msra.mxu0 %v2477_v16  ;;  %v2643_v16 = vld [vmem:[#allocation2 + $0x398] sm:$0xff] }
0x1966   :  { %2502 = vmatpush.msra.mxu0 %v2476_v10  ;;  %v2642_v10 = vld [vmem:[#allocation2 + $0x390] sm:$0xff] }
0x1968   :  { %2503 = vmatpush.msra.mxu0 %v2475_v17  ;;  %v2672_v17 = vld [vmem:[#allocation2 + $0x3b8] sm:$0xff] }
0x1969   :  { %2693 = vmatpush.msrb.mxu1 %v2672_v17 }
0x196a   :  { %2504 = vmatpush.msra.mxu0 %v2474_v11 }
0x196c   :  { %2505 = vmatpush.msra.mxu0 %v2473_v8 }
0x196e   :  { %2506 = vmatpush.msra.mxu0 %v2472_v0 }
0x1970   :  { %2507 = vmatpush.msra.mxu0 %v2471_v9  ;;  %v2962_v9 = vld [vmem:[#allocation2 + $0x3b0] ss:$0 sm:$0xff] }
0x1972   :  { %2508 = vmatpush.msra.mxu0 %v2470_v3 }
0x1974   :  { %2509 = vmatpush.msra.mxu0 %v2469_v22 }
0x19b7   :  { %v2346_v32 = vpop.f32.mrf.mxu3 }
0x19b8   :  { %v2355_v34 = vadd.f32 %v2346_v32, %v3693_v47 }
0x19ba   :  { %v3754_v39 = vadd.f32 %v2954_v31, %v2355_v34 }
0x19bc   :  { %v2401_v38 = vrot.slane %v3754_v39, 2  ;;  %v2405_v41 = vrot.slane %v3754_v39, 4  ;;  %v2409_v47 = vrot.slane %v3754_v39, 6 }
0x19be   :  { %2402 = vrot.lane.b32.xlu0 %v2401_v38, %s3166_s1 }
0x19bf   :  { %v2349_v57 = vpop.f32.mrf.mxu3 }
0x19c0   :  { %v2356_v63 = vadd.f32 %v2349_v57, %v3698_v35 }
0x19c2   :  { %v2361_v40 = vadd.f32 %v2954_v31, %v2356_v63 }
0x19c4   :  { %v2421_v42 = vrot.slane %v2361_v40, 4  ;;  %v2425_v5 = vrot.slane %v2361_v40, 6  ;;  %v2417_v37 = vrot.slane %v2361_v40, 2 }
0x19c6   :  { %2422 = vrot.lane.b32.xlu1 %v2421_v42, %s3167_s4  ;;  %2426 = vrot.lane.b32.xlu2 %v2425_v5, %s3168_s5 }
0x19c7   :  { %2406 = vrot.lane.b32.xlu0 %v2405_v41, %s3150_s18 }
0x19cf   :  { %2410 = vrot.lane.b32.xlu0 %v2409_v47, %s3169_s6 }
0x19d7   :  { %2414 = vrot.lane.b32.xlu0 %v2361_v40, %s3164_s28  ;;  %v2382_v43 = vpop.xlane.xlu2 %2381 }
0x19d8   :  { %v2383_v33 = vmul.f32 %v2382_v43, %v2376_v25  ;;  %v2517_v43 = vld [vmem:[#allocation2 + $0x300] sm:$0xff] }
0x19d9   :  { %2543 = vmatpush.msrb.mxu2 %v2517_v43 }
0x19da   :  { %v2384_v35 = vadd.f32 1e-05, %v2383_v33  ;;  %v2516_v33 = vld [vmem:[#allocation2 + $0x2f8] sm:$0xff] }
0x19db   :  { %2544 = vmatpush.msrb.mxu2 %v2516_v33 }
0x19dc   :  { %3094 = vrsqrt.f32 %v2384_v35  ;;  %vm2391_vm14 = vweird.f32 %v2384_v35 }
0x19df   :  { %2418 = vrot.lane.b32.xlu0 %v2417_v37, %s3170_s7  ;;  %v2554_v37 = vld [vmem:[#allocation2 + $0x340] sm:$0xf] }
0x19e1   :  { %v2352_v46 = vpop.f32.mrf.mxu3 }
0x19e2   :  { %v3095_v61 = vpop.eup %3094  ;;  %v2357_v54 = vadd.f32 %v2352_v46, %v3703_v4  ;;  %v2957_v46 = vld [vmem:[#allocation2 + $0x2e8] ss:$0 sm:$0xff] }
0x19e3   :  { %v2386_v56 = vmul.f32 %v3095_v61, %v2384_v35  ;;  %vm2392_vm15 = vweird.f32 %v3095_v61  ;;  %v2515_v35 = vld [vmem:[#allocation2 + $0x2f0] sm:$0xff] }
0x19e4   :  { %v2362_v2 = vadd.f32 %v2954_v31, %v2357_v54  ;;  %vm2393_vm1 = vmor %vm2391_vm14, %vm2392_vm15  ;;  %2545 = vmatpush.msrb.mxu2 %v2515_v35  ;;  %vm2523_vm14 = vcmask 343040  }
0x19e5   :  { %v2387_v58 = vmul.f32 %v3095_v61, %v2386_v56 }
0x19e6   :  { %v2441_v49 = vrot.slane %v2362_v2, 6  ;;  %v2433_v48 = vrot.slane %v2362_v2, 2  ;;  %v2437_v52 = vrot.slane %v2362_v2, 4 }
0x19e7   :  { %v2388_v59 = vmul.f32 0.5, %v2387_v58  ;;  %2430 = vrot.lane.b32.xlu0 %v2362_v2, %s3171_s8  ;;  %v2553_v2 = vld [vmem:[#allocation2 + $0x338] sm:$0xff]  ;;  %v2552_v58 = vld [vmem:[#allocation2 + $0x330] sm:$0xff] }
0x19e8   :  { %2442 = vrot.lane.b32.xlu1 %v2441_v49, %s3172_s9  ;;  %v2551_v49 = vld [vmem:[#allocation2 + $0x328] sm:$0xff] }
0x19e9   :  { %v2389_v44 = vsub.f32 1.5, %v2388_v59  ;;  %v2958_v59 = vld [vmem:[#allocation2 + $0x320] ss:$0 sm:$0xff] }
0x19eb   :  { %v2390_v1 = vmul.f32 %v3095_v61, %v2389_v44 }
0x19ed   :  { %v2394_v51 = vsel %vm2393_vm1, %v3095_v61, %v2390_v1 }
0x19ee   :  { %v2395_v20 = vmul.f32 %v2394_v51, %v2378_v27  ;;  %v2585_v51 = vld [vmem:[#allocation2 + $0x358] sm:$0xff] }
0x19ef   :  { %2434 = vrot.lane.b32.xlu0 %v2433_v48, %s3173_s10  ;;  %2605 = vmatpush.msrb.mxu0 %v2585_v51  ;;  %v2584_v48 = vld [vmem:[#allocation2 + $0x350] sm:$0xff] }
0x19f0   :  { %v2397_v4 = vmul.f32 %v2955_v29, %v2395_v20  ;;  %v2615_v20 = vld [vmem:[#allocation2 + $0x380] sm:$0xff] }
0x19f1   :  { %2606 = vmatpush.msrb.mxu0 %v2584_v48 }
0x19f2   :  { %v2399_v60 = vadd.f32 %v2956_v62, %v2397_v4  ;;  %v2959_v62 = vld [vmem:[#allocation2 + $0x348] ss:$0 sm:$0xff] }
0x19f4   :  { %2446 = vrot.lane.b32.xlu2 %v2399_v60, %s3163_s27 }
0x19f7   :  { %2438 = vrot.lane.b32.xlu0 %v2437_v52, %s3174_s11  ;;  %v2614_v52 = vld [vmem:[#allocation2 + $0x378] sm:$0xff] }
0x1a20   :  { %v2427_v32 = vpop.permute.xlu2 %2426 }
0x1a30   :  { %v2403_v15 = vpop.permute.xlu0 %2402 }
0x1a31   :  { %v2449_v26 = vsel %vm221_vm8, %v3754_v39, %v2403_v15  ;;  %vm2465_vm8 = vcmask 359424   ;;  %v2612_v15 = vld [vmem:[#allocation2 + $0x368] sm:$0xff] }
0x1a38   :  { %v2423_v31 = vpop.permute.xlu1 %2422 }
0x1a39   :  { %v2407_v12 = vpop.permute.xlu0 %2406 }
0x1a3a   :  { %v2451_v24 = vsel %vm2450_vm3, %v2449_v26, %v2407_v12 }
0x1a41   :  { %v2411_v53 = vpop.permute.xlu0 %2410 }
0x1a42   :  { %v2453_v21 = vsel %vm2452_vm5, %v2451_v24, %v2411_v53  ;;  %v2961_v53 = vld [vmem:[#allocation2 + $0x388] ss:$0 sm:$0xff] }
0x1a49   :  { %v2415_v19 = vpop.permute.xlu0 %2414 }
0x1a4a   :  { %v2454_v27 = vsel %vm389_vm4, %v2453_v21, %v2415_v19 }
0x1a4e   :  { %v2447_v5 = vpop.permute.xlu2 %2446 }
0x1a51   :  { %v2419_v25 = vpop.permute.xlu0 %2418 }
0x1a52   :  { %v2456_v28 = vsel %vm2455_vm7, %v2454_v27, %v2419_v25 }
0x1a53   :  { %v2457_v34 = vsel %vm428_vm6, %v2456_v28, %v2423_v31  ;;  %vm2560_vm6 = vcmask 1043456  }
0x1a54   :  { %v2459_v38 = vsel %vm2458_vm0, %v2457_v34, %v2427_v32  ;;  %2806 = vmatpush.msk.msra.mxu2 %vm2560_vm6, %v2554_v37 }
0x1a56   :  { %2577 = vmatpush.msra.mxu2 %v2553_v2 }
0x1a58   :  { %2578 = vmatpush.msra.mxu2 %v2552_v58 }
0x1a59   :  { %v2431_v14 = vpop.permute.xlu0 %2430 }
0x1a5a   :  { %v2460_v57 = vsel %vm652_vm10, %v2459_v38, %v2431_v14  ;;  %v2443_v40 = vpop.permute.xlu1 %2442  ;;  %2579 = vmatpush.msra.mxu2 %v2551_v49 }
0x1a61   :  { %v2435_v30 = vpop.permute.xlu0 %2434 }
0x1a62   :  { %v2462_v39 = vsel %vm2461_vm9, %v2460_v57, %v2435_v30 }
0x1a69   :  { %v2439_v63 = vpop.permute.xlu0 %2438 }
0x1a6a   :  { %v2464_v42 = vsel %vm2463_vm11, %v2462_v39, %v2439_v63 }
0x1a6b   :  { %v2466_v41 = vsel %vm2465_vm8, %v2464_v42, %v2443_v40 }
0x1a6c   :  { %v2468_v47 = vsel %vm2467_vm12, %v2466_v41, %v2447_v5 }
0x1a6d   :  { %2803 = vmatmul.msk.f32.vlgmr.msra.gmra.mxu0 %vm2486_vm13, %v2468_v47 }
0x1a6e   :  { %2663 = vmatpush.msra.mxu0 %v2645_v50 }
0x1a70   :  { %2664 = vmatpush.msra.mxu0 %v2644_v13 }
0x1a72   :  { %2665 = vmatpush.msra.mxu0 %v2643_v16 }
0x1a74   :  { %2666 = vmatpush.msra.mxu0 %v2642_v10 }
0x1aea   :  { %v2511_v61 = vpop.f32.mrf.mxu0 }
0x1aeb   :  { %v2512_v54 = vadd.f32 %v2957_v46, %v2511_v61 }
0x1aed   :  { %v2514_v56 = vmax.f32 %v2512_v54, 0.0 }
0x1aef   :  { %2805 = vmatmul.msk.f32.vlgmr.msrb.gmra.mxu2 %vm2523_vm14, %v2514_v56 }
0x1af0   :  { %2633 = vmatpush.msrb.mxu2 %v2615_v20 }
0x1af2   :  { %2634 = vmatpush.msrb.mxu2 %v2614_v52 }
0x1af4   :  { %2635 = vmatpush.msrb.mxu2 %v2613_v36 }
0x1af6   :  { %2636 = vmatpush.msrb.mxu2 %v2612_v15 }
0x1b72   :  { %v2547_v44 = vpop.f32.mrf.mxu2 }
0x1b73   :  { %v2548_v1 = vadd.f32 %v2958_v59, %v2547_v44 }
0x1b75   :  { %v2550_v29 = vmax.f32 %v2548_v1, 0.0 }
0x1b77   :  { %2807 = vmatmul.msk.f32.vlgmr.msra.gmra.mxu2 %vm2458_vm0, %v2550_v29 }
0x1bfa   :  { %v2581_v4 = vpop.f32.mrf.mxu2 }
0x1bfb   :  { %v2582_v60 = vadd.f32 %v2959_v62, %v2581_v4 }
0x1bfd   :  { %2808 = vmatmul.msk.f32.vlgmr.msrb.gmra.mxu0 %vm389_vm4, %v2582_v60  ;;  %vm2698_vm4 = vcmask 9216  }
0x1c7a   :  { %v2608_v18 = vpop.f32.mrf.mxu0 }
0x1c7b   :  { %v2609_v7 = vadd.f32 %v2960_v6, %v2608_v18 }
0x1c7d   :  { %v2611_v12 = vmax.f32 %v2609_v7, 0.0 }
0x1c7f   :  { %2809 = vmatmul.msk.f32.vlgmr.msrb.gmra.mxu2 %vm652_vm10, %v2611_v12 }
0x1d02   :  { %v2638_v11 = vpop.f32.mrf.mxu2 }
0x1d03   :  { %v2639_v8 = vadd.f32 %v2961_v53, %v2638_v11 }
0x1d05   :  { %v2641_v0 = vmax.f32 %v2639_v8, 0.0 }
0x1d07   :  { %2810 = vmatmul.msk.f32.vlgmr.msra.gmra.mxu0 %vm652_vm10, %v2641_v0 }
0x1d84   :  { %v2668_v19 = vpop.f32.mrf.mxu0 }
0x1d85   :  { %v2669_v3 = vadd.f32 %v2962_v9, %v2668_v19 }
0x1d87   :  { %v2671_v22 = vmax.f32 %v2669_v3, 0.0 }
0x1d89   :  { %2811 = vmatmul.msk.f32.vlgmr.msrb.gmra.mxu1 %vm2450_vm3, %v2671_v22 }
0x1e06   :  { %v2695_v45 = vpop.f32.mrf.mxu1 }
0x1e07   :  { %v2696_v55 = vadd.f32 %v2963_v23, %v2695_v45 }
0x1e09   :  { %2699 = vst.msk [vmem:[#allocation5] sm:$0x3] %vm2698_vm4, %v2696_v55 }
0x1e0a   :  { %2710 = dma.vmem_to_hbm [thread:$0]  %s2706_s13, 32, %s2708_s16, [#allocation4]  }
0x1e0b   :  { %3146 = dma.done.wait [#allocation4], 32  }
0x1e0c   :  { %3147 = vsyncadd [#allocation4], 4294967264 }
0x1e0d   :  { %2715 = vsyncpa [#allocation3], 1 }
0x1e0e   :  { %2716 = vsyncpa [#allocation4], 1 }

</bundles_post_ra>
